<compile_context>
chip_gen: v5e
topology: v5e:2x2
jax: 0.10.0
libtpu: 0.0.40
codegen_flags: <defaults>
</compile_context>

<pallas_src>
import functools

import jax
import jax.numpy as jnp
from jax.experimental import pallas as pl
from jax.experimental.pallas import tpu as pltpu


def _round_up(a: int, b: int) -> int:
    return -(-a // b) * b


def _pick_fold(r_total: int, wo: int) -> int:
    """Fold factor k (dividing r_total) so the output lane dim k*wo is >= 128."""
    if wo >= 128 or r_total <= 1:
        return 1
    k_target = min(r_total, -(-128 // wo))          # ceil(128 / wo)
    hi = min(r_total, 4 * k_target)
    for d in range(k_target, hi + 1):               # smallest divisor >= target (bounded)
        if r_total % d == 0:
            return d
    for d in range(k_target - 1, 0, -1):            # else largest divisor below target
        if r_total % d == 0:
            return d
    return 1


def _maxpool2x2_kernel(x_ref, o_ref, *, k: int, w: int):
    # x_ref: (TR, k*2*w)  -- k merged row-pairs per super-row, each [top | bottom]
    # o_ref: (TR, k*wo)
    x = x_ref[...]
    tr = x.shape[0]
    wo = w // 2
    # Horizontal (W) pooling: adjacent-lane pair max across the whole lane span.
    xh = jnp.max(x.reshape(tr, k * w, 2), axis=-1)                  # (TR, k*w)
    # Vertical (H) pooling: each length-w segment is [hpool(top) | hpool(bottom)].
    # (If a bundle dump ever shows an extra relayout copy here, the equivalent
    #  jnp.max(xh.reshape(tr, k, 2, wo), axis=2) variant is a drop-in swap.)
    x3 = xh.reshape(tr, k, w)
    o_ref[...] = jnp.maximum(x3[:, :, :wo], x3[:, :, wo:]).reshape(tr, k * wo)


def downsample(x: jax.Array) -> jax.Array:
    """MaxPool2d(kernel_size=2, stride=2) on an NCHW tensor (Pallas TPU)."""
    N, C, H, W = x.shape
    assert H % 2 == 0 and W % 2 == 0, "even spatial dims expected (MaxPool2d(2))"
    Ho, Wo = H // 2, W // 2
    r_total = N * C * Ho                        # one merged row per output row

    k = _pick_fold(r_total, Wo)                 # lane-dense output: k*Wo >= 128 when possible
    R = r_total // k
    l_in, l_out = k * 2 * W, k * Wo

    # Free (contiguous) reshape: k merged row-pairs per super-row.
    x_folded = x.reshape(R, l_in)

    # --- Padding-aware tile sizing -------------------------------------------
    itemsize = jnp.dtype(x.dtype).itemsize
    sub = {4: 8, 2: 16, 1: 32}.get(itemsize, 8)             # sublane packing multiple
    row_bytes = (_round_up(l_in, 128) + _round_up(l_out, 128)) * itemsize

    target_block = 4 << 20                      # ~4 MiB combined (in+out) per grid step
    tr = max(sub, (target_block // row_bytes) // sub * sub)
    # Large tensors: keep >= 8 grid steps (>= 2 per v7x TensorCore; real
    # double-buffer overlap on single-core v5e/v6e) while tiles stay aligned.
    min_steps = 8
    if R >= min_steps * sub:
        tr = min(tr, max(sub, (R // min_steps) // sub * sub))
    tr = min(tr, R)

    block_bytes = _round_up(tr, sub) * row_bytes            # padded in+out block
    vmem_limit = min(48 << 20, max(16 << 20, 2 * block_bytes + (4 << 20)))

    out_flat = pl.pallas_call(
        functools.partial(_maxpool2x2_kernel, k=k, w=W),
        out_shape=jax.ShapeDtypeStruct((R, l_out), x.dtype),
        grid=(pl.cdiv(R, tr),),
        in_specs=[pl.BlockSpec((tr, l_in), lambda i: (i, 0))],
        out_specs=pl.BlockSpec((tr, l_out), lambda i: (i, 0)),
        compiler_params=pltpu.CompilerParams(
            dimension_semantics=("parallel",),
            vmem_limit_bytes=vmem_limit,
        ),
    )(x_folded)

    return out_flat.reshape(N, C, Ho, Wo)


if __name__ == "__main__":
    key = jax.random.PRNGKey(0)
    # Small NCHW input consistent with the module's forward.
    x = jax.random.normal(key, (2, 4, 16, 16), dtype=jnp.float32)

    y = downsample(x)
    jax.block_until_ready(y)

    # Pure-JAX reference check (MaxPool2d(2) semantics).
    ref = jnp.max(x.reshape(2, 4, 8, 2, 8, 2), axis=(3, 5))
    assert y.shape == (2, 4, 8, 8)
    assert jnp.allclose(y, ref), "mismatch vs reference max-pool"

    print("KERNEL_OK")
</pallas_src>

<mosaic_0001>
module attributes {stable_mosaic.version = 11 : i64} {
  func.func @_maxpool2x2_kernel(%arg0: i32, %arg1: memref<4x512xf32, #tpu.memory_space<vmem>>, %arg2: memref<4x128xf32, #tpu.memory_space<vmem>>) attributes {dimension_semantics = [#tpu.dimension_semantics<parallel>], iteration_bounds = array<i64: 1>, scalar_prefetch = 0 : i64, scratch_operands = 0 : i64, tpu.core_type = #tpu.core_type<tc>, window_params = [{transform_indices = @transform_0, window_bounds = array<i64: 4, 512>}, {transform_indices = @transform_1, window_bounds = array<i64: 4, 128>}]} {
    %c0 = arith.constant 0 : index
    %c0_0 = arith.constant 0 : index
    %0 = vector.load %arg1[%c0, %c0_0] : memref<4x512xf32, #tpu.memory_space<vmem>>, vector<4x512xf32>
    %1 = vector.shape_cast %0 : vector<4x512xf32> to vector<4x256x2xf32>
    %cst = arith.constant dense<0xFF800000> : vector<4x256xf32>
    %2 = vector.multi_reduction <maximumf>, %1, %cst [2] : vector<4x256x2xf32> to vector<4x256xf32>
    %3 = vector.shape_cast %2 : vector<4x256xf32> to vector<4x16x16xf32>
    %4 = vector.extract_strided_slice %3 {offsets = [0, 0, 0], sizes = [4, 16, 8], strides = [1, 1, 1]} : vector<4x16x16xf32> to vector<4x16x8xf32>
    %5 = vector.extract_strided_slice %3 {offsets = [0, 0, 8], sizes = [4, 16, 8], strides = [1, 1, 1]} : vector<4x16x16xf32> to vector<4x16x8xf32>
    %6 = arith.maximumf %4, %5 : vector<4x16x8xf32>
    %7 = vector.shape_cast %6 : vector<4x16x8xf32> to vector<4x128xf32>
    %c0_1 = arith.constant 0 : index
    %c0_2 = arith.constant 0 : index
    %8 = vector.load %arg2[%c0_1, %c0_2] : memref<4x128xf32, #tpu.memory_space<vmem>>, vector<4x128xf32>
    tpu.vector_store %arg2[%c0_1, %c0_2], %7 {strides = array<i32>} : memref<4x128xf32, #tpu.memory_space<vmem>>, vector<4x128xf32>,
    return
  }
  func.func @transform_0(%arg0: i32) -> (i32, i32) {
    %c0_i32 = arith.constant 0 : i32
    %c0_i32_0 = arith.constant 0 : i32
    return %arg0, %c0_i32 : i32, i32
  }
  func.func @transform_1(%arg0: i32) -> (i32, i32) {
    %c0_i32 = arith.constant 0 : i32
    %c0_i32_0 = arith.constant 0 : i32
    return %arg0, %c0_i32 : i32, i32
  }
}

</mosaic_0001>

<bundles_post_ra>
// kernel: tpu_custom_call.1
= control target key start
LH: loop header
LB: loop body
LE: loop exit
PB: predicated region body
PF: predicated region fallthrough
CT: control target
= control target key end

     0   :  { %6 = vsyncpa [#allocation3], 0  ;;  %s8243_s0 = inlined_call_operand.hbm [shape: f32[4,512], index: 0, kind: input, shape index: {}]   ;;  %s8244_s1 = inlined_call_operand.hbm [shape: f32[4,128], index: 1, kind: output, shape index: {}]  }
   0x1   :  { %7 = vsyncpa [#allocation4], 0  ;;  %s13_s8 = sshll.u32 %s8243_s0, 4  ;;  %s4949_s9 = smov [#allocation2]   ;;  %s14_s8 = int_to_ptr.hbm [resolvable:$true] %s13_s8 }
   0x2   :  { %s15_s10 = sshll.u32 %s4949_s9, 4  ;;  %s16_s10 = int_to_ptr.vmem [resolvable:$true] %s15_s10 }
   0x3   :  { %18 = dma.hbm_to_vmem [thread:$0]  %s14_s8, 256, %s16_s10, [#allocation3]  }
   0x4   :  { %4945 = dma.done.wait [#allocation3], 256  }
   0x5   :  { %4946 = vsyncadd [#allocation3], 4294967040  ;;  %v5030_v0 = vld [vmem:[#allocation2] sm:$0xff]  ;;  %s4950_s11 = smov 118   ;;  %s4951_s12 = smov 122   ;;  %vm662_vm0 = vcmask 1047556  }
   0x6   :  { %44 = vrot.lane.b32.xlu2 %v5030_v0, %s4950_s11  ;;  %36 = vrot.lane.b32.xlu1 %v5030_v0, %s4951_s12  ;;  %s4952_s13 = smov 126   ;;  %s4953_s0 = smov 116   ;;  %v4995_v6 = vmov 1983009808   ;;  %v26_v13 = vrot.slane %v5030_v0, 4  ;;  %vm3229_vm1 = vcmask 15360  }
   0x7   :  { %28 = vrot.lane.b32.xlu0 %v5030_v0, %s4952_s13  ;;  %s4954_s14 = smov 120   ;;  %s4955_s15 = smov 124   ;;  %v665_v7 = vunpack.c.l.s4 %v4995_v6  ;;  %v4999_v20 = vmov 1934713408   ;;  %vm4131_vm2 = vcmask 130112   ;;  %vm4322_vm3 = vcmask 1041409  }
   0x8   :  { %s4956_s16 = smov 110   ;;  %s4957_s17 = smov 112   ;;  %v679_v21 = vunpack.c.l.s4 %v4999_v20  ;;  %vm4324_vm4 = vcmask 1042434   ;;  %vm4326_vm5 = vcmask 1043459   ;;  %vm4713_vm6 = vcmask 64512  }
   0x9   :  { %s4958_s18 = smov 114   ;;  %s4959_s19 = smov 104   ;;  %v5128_v10 = vunpack.c.0.s8 %v665_v7  ;;  %vm4715_vm7 = vcmask 130048   ;;  %vm4717_vm8 = vcmask 195584   ;;  %vm4719_vm9 = vcmask 261120  }
   0xa   :  { %s4960_s20 = smov 106   ;;  %s4961_s21 = smov 108   ;;  %v5154_v32 = vunpack.c.0.s8 %v679_v21  ;;  %vm4721_vm10 = vcmask 326656   ;;  %vm4723_vm11 = vcmask 392192   ;;  %vm4725_vm12 = vcmask 457728  }
   0xb   :  { %s4962_s22 = smov 98   ;;  %s4963_s23 = smov 100   ;;  %8328 = vst [vmem:[#allocation8_spill] sm:$0xff] %v5128_v10  ;;  %vm4727_vm13 = vcmask 523264   ;;  %vm4729_vm14 = vcmask 588800   ;;  %vm4731_vm15 = vcmask 654336  }
   0xc   :  { %s4964_s24 = smov 102   ;;  %s4965_s25 = smov 92   ;;  %8329 = vst [vmem:[#allocation9_spill] sm:$0xff] %v5154_v32 }
   0xd   :  { %s4966_s26 = smov 94   ;;  %s4967_s27 = smov 96  }
   0xe   :  { %48 = vrot.lane.b32.xlu2 %v5030_v0, %s4953_s0  ;;  %40 = vrot.lane.b32.xlu1 %v5030_v0, %s4954_s14  ;;  %s4968_s28 = smov 86   ;;  %s4969_s29 = smov 88  }
   0xf   :  { %32 = vrot.lane.b32.xlu0 %v5030_v0, %s4955_s15  ;;  %s4970_s30 = smov 90   ;;  %s4971_s2 = smov 80  }
  0x10   :  { %s4972_s3 = smov 82   ;;  %s4973_s4 = smov 84  }
  0x11   :  { %s8245_s5 = smov 74   ;;  %s8246_s6 = smov 76  }
  0x12   :  { %s8247_s7 = smov 78   ;;  %s8248_s8 = smov 68  }
  0x13   :  { %s8249_s9 = smov 70   ;;  %s8250_s10 = smov 72  }
  0x16   :  { %60 = vrot.lane.b32.xlu2 %v5030_v0, %s4956_s16  ;;  %56 = vrot.lane.b32.xlu1 %v5030_v0, %s4957_s17 }
  0x17   :  { %52 = vrot.lane.b32.xlu0 %v5030_v0, %s4958_s18 }
  0x1e   :  { %72 = vrot.lane.b32.xlu2 %v5030_v0, %s4959_s19  ;;  %68 = vrot.lane.b32.xlu1 %v5030_v0, %s4960_s20 }
  0x1f   :  { %64 = vrot.lane.b32.xlu0 %v5030_v0, %s4961_s21 }
  0x26   :  { %84 = vrot.lane.b32.xlu2 %v5030_v0, %s4962_s22  ;;  %80 = vrot.lane.b32.xlu1 %v5030_v0, %s4963_s23 }
  0x27   :  { %76 = vrot.lane.b32.xlu0 %v5030_v0, %s4964_s24 }
  0x2e   :  { %96 = vrot.lane.b32.xlu2 %v5030_v0, %s4965_s25  ;;  %92 = vrot.lane.b32.xlu1 %v5030_v0, %s4966_s26 }
  0x2f   :  { %88 = vrot.lane.b32.xlu0 %v5030_v0, %s4967_s27 }
  0x36   :  { %108 = vrot.lane.b32.xlu2 %v5030_v0, %s4968_s28  ;;  %104 = vrot.lane.b32.xlu1 %v5030_v0, %s4969_s29 }
  0x37   :  { %100 = vrot.lane.b32.xlu0 %v5030_v0, %s4970_s30 }
  0x3e   :  { %120 = vrot.lane.b32.xlu2 %v5030_v0, %s4971_s2  ;;  %116 = vrot.lane.b32.xlu1 %v5030_v0, %s4972_s3 }
  0x3f   :  { %112 = vrot.lane.b32.xlu0 %v5030_v0, %s4973_s4 }
  0x46   :  { %132 = vrot.lane.b32.xlu2 %v5030_v0, %s8245_s5  ;;  %128 = vrot.lane.b32.xlu1 %v5030_v0, %s8246_s6  ;;  %s8252_s5 = smov 62   ;;  %s8253_s6 = smov 64  }
  0x47   :  { %124 = vrot.lane.b32.xlu0 %v5030_v0, %s8247_s7  ;;  %s8255_s7 = smov 66  }
  0x4e   :  { %144 = vrot.lane.b32.xlu2 %v5030_v0, %s8248_s8  ;;  %140 = vrot.lane.b32.xlu1 %v5030_v0, %s8249_s9  ;;  %s8258_s8 = smov 56   ;;  %s8256_s9 = smov 58  }
  0x4f   :  { %136 = vrot.lane.b32.xlu0 %v5030_v0, %s8250_s10  ;;  %s8257_s10 = smov 60  }
  0x56   :  { %156 = vrot.lane.b32.xlu2 %v5030_v0, %s8252_s5  ;;  %152 = vrot.lane.b32.xlu1 %v5030_v0, %s8253_s6  ;;  %s8262_s5 = smov 50   ;;  %s8260_s6 = smov 52  }
  0x57   :  { %148 = vrot.lane.b32.xlu0 %v5030_v0, %s8255_s7  ;;  %s8261_s7 = smov 54  }
  0x5e   :  { %168 = vrot.lane.b32.xlu2 %v5030_v0, %s8258_s8  ;;  %164 = vrot.lane.b32.xlu1 %v5030_v0, %s8256_s9  ;;  %s4989_s9 = smov 44   ;;  %s4991_s8 = smov 48  }
  0x5f   :  { %160 = vrot.lane.b32.xlu0 %v5030_v0, %s8257_s10  ;;  %s4990_s10 = smov 46  }
  0x60   :  { %v5104_v1 = vpop.permute.xlu2 %44 }
  0x61   :  { %v46_v41 = vrot.slane %v5104_v1, 4 }
  0x66   :  { %180 = vrot.lane.b32.xlu2 %v5030_v0, %s8262_s5  ;;  %176 = vrot.lane.b32.xlu1 %v5030_v0, %s8260_s6  ;;  %s8263_s6 = smov 38   ;;  %s8266_s5 = smov 42  }
  0x67   :  { %172 = vrot.lane.b32.xlu0 %v5030_v0, %s8261_s7  ;;  %s8264_s7 = smov 40  }
  0x68   :  { %v49_v2 = vpop.permute.xlu2 %48 }
  0x69   :  { %v690_v24 = vrot.slane %v49_v2, 4 }
  0x6e   :  { %192 = vrot.lane.b32.xlu2 %v5030_v0, %s4989_s9  ;;  %188 = vrot.lane.b32.xlu1 %v5030_v0, %s4990_s10 }
  0x6f   :  { %184 = vrot.lane.b32.xlu0 %v5030_v0, %s4991_s8 }
  0x70   :  { %v5118_v3 = vpop.permute.xlu2 %60 }
  0x71   :  { %v62_v58 = vrot.slane %v5118_v3, 4 }
  0x76   :  { %204 = vrot.lane.b32.xlu2 %v5030_v0, %s8263_s6  ;;  %200 = vrot.lane.b32.xlu1 %v5030_v0, %s8264_s7  ;;  %s8269_s6 = smov 32   ;;  %s8268_s7 = smov 34  }
  0x77   :  { %196 = vrot.lane.b32.xlu0 %v5030_v0, %s8266_s5  ;;  %s8267_s5 = smov 36  }
  0x78   :  { %v37_v4 = vpop.permute.xlu1 %36  ;;  %v5126_v5 = vpop.permute.xlu2 %72 }
  0x79   :  { %v29_v8 = vpop.permute.xlu0 %28  ;;  %v668_v9 = vrot.slane %v37_v4, 4 }
  0x7a   :  { %v30_v11 = vrot.slane %v29_v8, 4 }
  0x7b   :  { %v669_v12 = vsel %vm662_vm0, %v668_v9, %v29_v8 }
  0x7c   :  { %v673_v16 = vperm.slane %v669_v12, %v5128_v10  ;;  %v1117_v17 = vsel %vm662_vm0, %v37_v4, %v30_v11 }
  0x7d   :  { %v5147_v26 = vperm.slane %v1117_v17, %v5128_v10 }
  0x7e   :  { %216 = vrot.lane.b32.xlu2 %v5030_v0, %s8269_s6  ;;  %212 = vrot.lane.b32.xlu1 %v5030_v0, %s8268_s7  ;;  %v674_v28 = vrot.slane %v673_v16, 4  ;;  %s8272_s7 = smov 28   ;;  %s8271_s6 = smov 30  }
  0x7f   :  { %208 = vrot.lane.b32.xlu0 %v5030_v0, %s8267_s5  ;;  %s8273_s5 = smov 26  }
  0x80   :  { %v41_v14 = vpop.permute.xlu1 %40  ;;  %v5138_v15 = vpop.permute.xlu2 %84 }
  0x81   :  { %v42_v18 = vrot.slane %v41_v14, 4  ;;  %v33_v19 = vpop.permute.xlu0 %32  ;;  %v691_v33 = vsel %vm662_vm0, %v690_v24, %v41_v14  ;;  %v752_v17 = vrot.slane %v5138_v15, 4 }
  0x82   :  { %v661_v22 = vrot.slane %v33_v19, 4  ;;  %v1111_v23 = vsel %vm662_vm0, %v33_v19, %v26_v13  ;;  %v695_v44 = vperm.slane %v691_v33, %v5128_v10  ;;  %v74_v13 = vrot.slane %v5126_v5, 4 }
  0x83   :  { %v5144_v25 = vperm.slane %v1111_v23, %v5128_v10  ;;  %v1139_v29 = vsel %vm662_vm0, %v49_v2, %v42_v18 }
  0x84   :  { %v663_v27 = vsel %vm662_vm0, %v661_v22, %v5030_v0  ;;  %v5169_v37 = vperm.slane %v1139_v29, %v5128_v10  ;;  %v704_v50 = vrot.slane %v695_v44, 4 }
  0x85   :  { %v667_v30 = vperm.slane %v663_v27, %v5128_v10  ;;  %v1124_v31 = vrot.slane %v5144_v25, 4 }
  0x86   :  { %228 = vrot.lane.b32.xlu2 %v5030_v0, %s8273_s5  ;;  %224 = vrot.lane.b32.xlu1 %v5030_v0, %s8272_s7  ;;  %v1152_v47 = vrot.slane %v5169_v37, 4  ;;  %s8276_s7 = smov 22   ;;  %s8274_s5 = smov 24  }
  0x87   :  { %v675_v34 = vsel %vm662_vm0, %v674_v28, %v667_v30  ;;  %v676_v35 = vrot.slane %v667_v30, 4  ;;  %v5164_v36 = vsel %vm662_vm0, %v5147_v26, %v1124_v31  ;;  %220 = vrot.lane.b32.xlu0 %v5030_v0, %s8271_s6  ;;  %s8277_s6 = smov 20  }
  0x88   :  { %8330 = vst [vmem:[#allocation10_spill] sm:$0xff] %v5164_v36  ;;  %v5172_v38 = vperm.slane %v675_v34, %v5154_v32  ;;  %v57_v39 = vpop.permute.xlu1 %56  ;;  %v5174_v40 = vpop.permute.xlu2 %96 }
  0x89   :  { %v5178_v42 = vsel %vm662_vm0, %v673_v16, %v676_v35  ;;  %v53_v43 = vpop.permute.xlu0 %52  ;;  %v58_v53 = vrot.slane %v57_v39, 4 }
  0x8a   :  { %8331 = vst [vmem:[#allocation11_spill] sm:$0xff] %v5178_v42  ;;  %v696_v45 = vrot.slane %v53_v43, 4  ;;  %v1145_v46 = vsel %vm662_vm0, %v53_v43, %v46_v41 }
  0x8b   :  { %2710 = vst [vmem:[#allocation1] ss:$2 sm:$0xff] %v5172_v38  ;;  %v5185_v48 = vperm.slane %v1145_v46, %v5128_v10 }
  0x8c   :  { %v697_v49 = vsel %vm662_vm0, %v696_v45, %v5104_v1 }
  0x8d   :  { %v701_v51 = vperm.slane %v697_v49, %v5128_v10  ;;  %v5192_v52 = vsel %vm662_vm0, %v5185_v48, %v1152_v47 }
  0x8e   :  { %8332 = vst [vmem:[#allocation12_spill] sm:$0xff] %v5192_v52  ;;  %240 = vrot.lane.b32.xlu2 %v5030_v0, %s8277_s6  ;;  %236 = vrot.lane.b32.xlu1 %v5030_v0, %s8276_s7  ;;  %s8279_s7 = smov 16   ;;  %s8278_s6 = smov 18  }
  0x8f   :  { %232 = vrot.lane.b32.xlu0 %v5030_v0, %s8274_s5  ;;  %v702_v54 = vrot.slane %v701_v51, 4  ;;  %v5201_v55 = vsel %vm662_vm0, %v701_v51, %v704_v50  ;;  %s8281_s5 = smov 14   ;;  %v774_v51 = vrot.slane %v5174_v40, 4 }
  0x90   :  { %8333 = vst [vmem:[#allocation13_spill] sm:$0xff] %v5201_v55  ;;  %v69_v56 = vpop.permute.xlu1 %68  ;;  %v5203_v57 = vpop.permute.xlu2 %108 }
  0x91   :  { %v724_v59 = vrot.slane %v69_v56, 4  ;;  %v65_v60 = vpop.permute.xlu0 %64  ;;  %v703_v61 = vsel %vm662_vm0, %v702_v54, %v695_v44  ;;  %v1173_v2 = vsel %vm662_vm0, %v69_v56, %v62_v58 }
  0x92   :  { %v718_v62 = vrot.slane %v65_v60, 4  ;;  %v1167_v63 = vsel %vm662_vm0, %v65_v60, %v58_v53  ;;  %v5209_v1 = vperm.slane %v703_v61, %v5154_v32  ;;  %v5221_v9 = vperm.slane %v1173_v2, %v5128_v10 }
  0x93   :  { %v725_v4 = vsel %vm662_vm0, %v724_v59, %v5118_v3  ;;  %v5216_v7 = vperm.slane %v1167_v63, %v5128_v10 }
  0x94   :  { %v719_v6 = vsel %vm662_vm0, %v718_v62, %v57_v39  ;;  %2712 = vst [vmem:[#allocation1 + $0x1] ss:$2 sm:$0xff] %v5209_v1  ;;  %v729_v8 = vperm.slane %v725_v4, %v5128_v10 }
  0x95   :  { %v723_v11 = vperm.slane %v719_v6, %v5128_v10  ;;  %v1180_v12 = vrot.slane %v5216_v7, 4 }
  0x96   :  { %252 = vrot.lane.b32.xlu2 %v5030_v0, %s8281_s5  ;;  %248 = vrot.lane.b32.xlu1 %v5030_v0, %s8279_s7  ;;  %v730_v3 = vrot.slane %v729_v8, 4  ;;  %s8283_s7 = smov 10   ;;  %s8282_s5 = smov 12  }
  0x97   :  { %244 = vrot.lane.b32.xlu0 %v5030_v0, %s8278_s6  ;;  %v732_v14 = vrot.slane %v723_v11, 4  ;;  %v5234_v16 = vsel %vm662_vm0, %v5221_v9, %v1180_v12  ;;  %s8284_s6 = smov 8  }
  0x98   :  { %8334 = vst [vmem:[#allocation14_spill] sm:$0xff] %v5234_v16  ;;  %v81_v18 = vpop.permute.xlu1 %80  ;;  %v5237_v19 = vpop.permute.xlu2 %120  ;;  %v731_v20 = vsel %vm662_vm0, %v730_v3, %v723_v11 }
  0x99   :  { %v746_v21 = vrot.slane %v81_v18, 4  ;;  %v77_v22 = vpop.permute.xlu0 %76  ;;  %v5241_v23 = vsel %vm662_vm0, %v729_v8, %v732_v14  ;;  %v5244_v24 = vperm.slane %v731_v20, %v5154_v32  ;;  %v1195_v27 = vsel %vm662_vm0, %v81_v18, %v74_v13  ;;  %v5303_v8 = vld [vmem:[#allocation2 + $0x8] sm:$0xff] }
  0x9a   :  { %8335 = vst [vmem:[#allocation15_spill] sm:$0xff] %v5241_v23  ;;  %v78_v28 = vrot.slane %v77_v22, 4  ;;  %v5252_v31 = vperm.slane %v1195_v27, %v5128_v10  ;;  %v753_v33 = vsel %vm662_vm0, %v752_v17, %v77_v22  ;;  %v1178_v23 = vrot.slane %v5221_v9, 4 }
  0x9b   :  { %v747_v29 = vsel %vm662_vm0, %v746_v21, %v5126_v5  ;;  %2714 = vst [vmem:[#allocation1 + $0x10] ss:$2 sm:$0xff] %v5244_v24  ;;  %v757_v34 = vperm.slane %v753_v33, %v5128_v10 }
  0x9c   :  { %v751_v30 = vperm.slane %v747_v29, %v5128_v10  ;;  %v1208_v39 = vrot.slane %v5252_v31, 4  ;;  %v1201_v41 = vsel %vm662_vm0, %v5138_v15, %v78_v28  ;;  %v110_v28 = vrot.slane %v5203_v57, 4 }
  0x9d   :  { %v758_v5 = vrot.slane %v757_v34, 4  ;;  %v5264_v43 = vperm.slane %v1201_v41, %v5128_v10 }
  0x9e   :  { %v760_v35 = vrot.slane %v751_v30, 4  ;;  %264 = vrot.lane.b32.xlu2 %v5030_v0, %s8284_s6  ;;  %260 = vrot.lane.b32.xlu1 %v5030_v0, %s8283_s7  ;;  %s5013_s7 = smov 4   ;;  %s5014_s6 = smov 6  }
  0x9f   :  { %256 = vrot.lane.b32.xlu0 %v5030_v0, %s8282_s5  ;;  %v759_v46 = vsel %vm662_vm0, %v758_v5, %v751_v30  ;;  %v5276_v47 = vsel %vm662_vm0, %v5264_v43, %v1208_v39  ;;  %s5012_s5 = smov 2   ;;  %v1206_v52 = vrot.slane %v5264_v43, 4 }
  0xa0   :  { %v5269_v44 = vsel %vm662_vm0, %v757_v34, %v760_v35  ;;  %v93_v15 = vpop.permute.xlu1 %92  ;;  %v5271_v45 = vpop.permute.xlu2 %132  ;;  %8337 = vst [vmem:[#allocation17_spill] sm:$0xff] %v5276_v47  ;;  %v5279_v50 = vperm.slane %v759_v46, %v5154_v32 }
  0xa1   :  { %8336 = vst [vmem:[#allocation16_spill] sm:$0xff] %v5269_v44  ;;  %v89_v49 = vpop.permute.xlu0 %88  ;;  %v94_v59 = vrot.slane %v93_v15, 4 }
  0xa2   :  { %v90_v53 = vrot.slane %v89_v49, 4  ;;  %2716 = vst [vmem:[#allocation1 + $0x11] ss:$2 sm:$0xff] %v5279_v50  ;;  %v775_v56 = vsel %vm662_vm0, %v774_v51, %v89_v49 }
  0xa3   :  { %v779_v61 = vperm.slane %v775_v56, %v5128_v10  ;;  %v836_v56 = vrot.slane %v5271_v45, 4 }
  0xa4   :  { %v1223_v54 = vsel %vm662_vm0, %v5174_v40, %v90_v53 }
  0xa5   :  { %v5291_v58 = vperm.slane %v1223_v54, %v5128_v10 }
  0xa6   :  { %276 = vrot.lane.b32.xlu2 %v5030_v0, %s5012_s5  ;;  %272 = vrot.lane.b32.xlu1 %v5030_v0, %s5013_s7 }
  0xa7   :  { %268 = vrot.lane.b32.xlu0 %v5030_v0, %s5014_s6  ;;  %v1236_v4 = vrot.slane %v5291_v58, 4  ;;  %v788_v0 = vrot.slane %v779_v61, 4 }
  0xa8   :  { %v105_v60 = vpop.permute.xlu1 %104  ;;  %v5295_v40 = vpop.permute.xlu2 %144 }
  0xa9   :  { %v101_v62 = vpop.permute.xlu0 %100  ;;  %v106_v20 = vrot.slane %v105_v60, 4 }
  0xaa   :  { %v780_v63 = vrot.slane %v101_v62, 4  ;;  %v1229_v2 = vsel %vm662_vm0, %v101_v62, %v94_v59 }
  0xab   :  { %v5301_v6 = vperm.slane %v1229_v2, %v5128_v10 }
  0xac   :  { %v781_v11 = vsel %vm662_vm0, %v780_v63, %v93_v15 }
  0xad   :  { %v785_v12 = vperm.slane %v781_v11, %v5128_v10  ;;  %v5309_v3 = vsel %vm662_vm0, %v5301_v6, %v1236_v4 }
  0xae   :  { %8338 = vst [vmem:[#allocation18_spill] sm:$0xff] %v5309_v3  ;;  %291 = vrot.lane.b32.xlu2 %v5303_v8, %s4951_s12  ;;  %287 = vrot.lane.b32.xlu1 %v5303_v8, %s4955_s15  ;;  %s8356_s12 = smov 76   ;;  %s8360_s15 = smov 70  }
  0xaf   :  { %v786_v13 = vrot.slane %v785_v12, 4  ;;  %v5316_v14 = vsel %vm662_vm0, %v785_v12, %v788_v0  ;;  %283 = vrot.lane.b32.xlu0 %v5303_v8, %s4952_s13  ;;  %s8358_s13 = smov 78  }
  0xb0   :  { %8339 = vst [vmem:[#allocation19_spill] sm:$0xff] %v5316_v14  ;;  %v117_v17 = vpop.permute.xlu1 %116  ;;  %v5320_v18 = vpop.permute.xlu2 %156 }
  0xb1   :  { %v787_v21 = vsel %vm662_vm0, %v786_v13, %v779_v61  ;;  %v808_v22 = vrot.slane %v117_v17, 4  ;;  %v113_v27 = vpop.permute.xlu0 %112  ;;  %v1257_v39 = vsel %vm662_vm0, %v117_v17, %v110_v28 }
  0xb2   :  { %v5325_v29 = vperm.slane %v787_v21, %v5154_v32  ;;  %v802_v33 = vrot.slane %v113_v27, 4  ;;  %v1251_v34 = vsel %vm662_vm0, %v113_v27, %v106_v20  ;;  %v5344_v49 = vperm.slane %v1257_v39, %v5128_v10 }
  0xb3   :  { %v809_v30 = vsel %vm662_vm0, %v808_v22, %v5203_v57  ;;  %v5335_v5 = vperm.slane %v1251_v34, %v5128_v10  ;;  %v122_v57 = vrot.slane %v5237_v19, 4 }
  0xb4   :  { %8340 = vst [vmem:[#allocation20_spill] sm:$0xff] %v5325_v29  ;;  %v813_v35 = vperm.slane %v809_v30, %v5128_v10  ;;  %v803_v41 = vsel %vm662_vm0, %v802_v33, %v105_v60  ;;  %v1262_v55 = vrot.slane %v5344_v49, 4 }
  0xb5   :  { %2718 = vst [vmem:[#allocation1 + $0x20] ss:$2 sm:$0xff] %v5325_v29  ;;  %v807_v46 = vperm.slane %v803_v41, %v5128_v10  ;;  %v1264_v51 = vrot.slane %v5335_v5, 4 }
  0xb6   :  { %v814_v15 = vrot.slane %v813_v35, 4  ;;  %303 = vrot.lane.b32.xlu2 %v5303_v8, %s4953_s0  ;;  %299 = vrot.lane.b32.xlu1 %v5303_v8, %s4950_s11  ;;  %s8355_s11 = smov 74   ;;  %s8359_s0 = smov 68  }
  0xb7   :  { %295 = vrot.lane.b32.xlu0 %v5303_v8, %s4954_s14  ;;  %v816_v54 = vrot.slane %v807_v46, 4  ;;  %v5358_v62 = vsel %vm662_vm0, %v5344_v49, %v1264_v51 }
  0xb8   :  { %v815_v53 = vsel %vm662_vm0, %v814_v15, %v807_v46  ;;  %v129_v59 = vpop.permute.xlu1 %128  ;;  %v5351_v60 = vpop.permute.xlu2 %168  ;;  %8342 = vst [vmem:[#allocation22_spill] sm:$0xff] %v5358_v62  ;;  %v858_v15 = vrot.slane %v5295_v40, 4 }
  0xb9   :  { %v5354_v61 = vperm.slane %v815_v53, %v5154_v32  ;;  %v830_v63 = vrot.slane %v129_v59, 4  ;;  %v1279_v2 = vsel %vm662_vm0, %v129_v59, %v122_v57  ;;  %v125_v4 = vpop.permute.xlu0 %124  ;;  %v5362_v11 = vsel %vm662_vm0, %v813_v35, %v816_v54 }
  0xba   :  { %8343 = vst [vmem:[#allocation23_spill] sm:$0xff] %v5362_v11  ;;  %v5365_v0 = vperm.slane %v1279_v2, %v5128_v10  ;;  %v126_v13 = vrot.slane %v125_v4, 4  ;;  %v837_v21 = vsel %vm662_vm0, %v836_v56, %v125_v4 }
  0xbb   :  { %8341 = vst [vmem:[#allocation21_spill] sm:$0xff] %v5354_v61  ;;  %v831_v12 = vsel %vm662_vm0, %v830_v63, %v5237_v19  ;;  %v841_v28 = vperm.slane %v837_v21, %v5128_v10 }
  0xbc   :  { %2720 = vst [vmem:[#allocation1 + $0x21] ss:$2 sm:$0xff] %v5354_v61  ;;  %v835_v17 = vperm.slane %v831_v12, %v5128_v10  ;;  %v1292_v20 = vrot.slane %v5365_v0, 4  ;;  %v1285_v22 = vsel %vm662_vm0, %v5271_v45, %v126_v13 }
  0xbd   :  { %v5377_v30 = vperm.slane %v1285_v22, %v5128_v10  ;;  %v842_v19 = vrot.slane %v841_v28, 4 }
  0xbe   :  { %v844_v27 = vrot.slane %v835_v17, 4  ;;  %315 = vrot.lane.b32.xlu2 %v5303_v8, %s4956_s16  ;;  %311 = vrot.lane.b32.xlu1 %v5303_v8, %s4957_s17  ;;  %s8361_s16 = smov 72  }
  0xbf   :  { %307 = vrot.lane.b32.xlu0 %v5303_v8, %s4958_s18  ;;  %v5390_v45 = vsel %vm662_vm0, %v5377_v30, %v1292_v20  ;;  %v843_v41 = vsel %vm662_vm0, %v842_v19, %v835_v17  ;;  %s8364_s18 = smov 62  }
  0xc0   :  { %v5386_v33 = vsel %vm662_vm0, %v841_v28, %v844_v27  ;;  %8345 = vst [vmem:[#allocation25_spill] sm:$0xff] %v5390_v45  ;;  %v141_v34 = vpop.permute.xlu1 %140  ;;  %v5392_v35 = vpop.permute.xlu2 %180  ;;  %v5397_v57 = vperm.slane %v843_v41, %v5154_v32 }
  0xc1   :  { %8344 = vst [vmem:[#allocation24_spill] sm:$0xff] %v5386_v33  ;;  %v137_v39 = vpop.permute.xlu0 %136  ;;  %v142_v56 = vrot.slane %v141_v34, 4 }
  0xc2   :  { %v138_v46 = vrot.slane %v137_v39, 4  ;;  %8346 = vst [vmem:[#allocation26_spill] sm:$0xff] %v5397_v57  ;;  %v859_v53 = vsel %vm662_vm0, %v858_v15, %v137_v39 }
  0xc3   :  { %2722 = vst [vmem:[#allocation1 + $0x30] ss:$2 sm:$0xff] %v5397_v57 }
  0xc4   :  { %v1307_v51 = vsel %vm662_vm0, %v5295_v40, %v138_v46  ;;  %v863_v40 = vperm.slane %v859_v53, %v5128_v10  ;;  %v158_v53 = vrot.slane %v5320_v18, 4 }
  0xc5   :  { %v5408_v54 = vperm.slane %v1307_v51, %v5128_v10 }
  0xc6   :  { %327 = vrot.lane.b32.xlu2 %v5303_v8, %s4959_s19  ;;  %323 = vrot.lane.b32.xlu1 %v5303_v8, %s4960_s20  ;;  %v872_v21 = vrot.slane %v863_v40, 4  ;;  %s8365_s20 = smov 64  }
  0xc7   :  { %319 = vrot.lane.b32.xlu0 %v5303_v8, %s4961_s21  ;;  %v1320_v13 = vrot.slane %v5408_v54, 4  ;;  %s8366_s21 = smov 66  }
  0xc8   :  { %v153_v59 = vpop.permute.xlu1 %152  ;;  %v5412_v63 = vpop.permute.xlu2 %192 }
  0xc9   :  { %v149_v2 = vpop.permute.xlu0 %148  ;;  %v154_v41 = vrot.slane %v153_v59, 4 }
  0xca   :  { %v864_v4 = vrot.slane %v149_v2, 4  ;;  %v1313_v12 = vsel %vm662_vm0, %v149_v2, %v142_v56 }
  0xcb   :  { %v5418_v17 = vperm.slane %v1313_v12, %v5128_v10 }
  0xcc   :  { %v865_v20 = vsel %vm662_vm0, %v864_v4, %v141_v34 }
  0xcd   :  { %v869_v22 = vperm.slane %v865_v20, %v5128_v10  ;;  %v5424_v27 = vsel %vm662_vm0, %v5418_v17, %v1320_v13 }
  0xce   :  { %8347 = vst [vmem:[#allocation27_spill] sm:$0xff] %v5424_v27  ;;  %339 = vrot.lane.b32.xlu2 %v5303_v8, %s4962_s22  ;;  %335 = vrot.lane.b32.xlu1 %v5303_v8, %s4963_s23  ;;  %v5476_v27 = vld.sshfl [vmem:[#allocation1] sm:$0xff pattern:$0x75316420]  ;;  %s8371_s22 = smov 56   ;;  %s8372_s23 = smov 58  }
  0xcf   :  { %v870_v28 = vrot.slane %v869_v22, 4  ;;  %v5431_v19 = vsel %vm662_vm0, %v869_v22, %v872_v21  ;;  %331 = vrot.lane.b32.xlu0 %v5303_v8, %s4964_s24  ;;  %s8373_s24 = smov 60  }
  0xd0   :  { %8348 = vst [vmem:[#allocation28_spill] sm:$0xff] %v5431_v19  ;;  %v165_v34 = vpop.permute.xlu1 %164  ;;  %v5435_v39 = vpop.permute.xlu2 %204 }
  0xd1   :  { %v871_v15 = vsel %vm662_vm0, %v870_v28, %v863_v40  ;;  %v892_v46 = vrot.slane %v165_v34, 4  ;;  %v161_v51 = vpop.permute.xlu0 %160  ;;  %v1341_v20 = vsel %vm662_vm0, %v165_v34, %v158_v53 }
  0xd2   :  { %v5440_v56 = vperm.slane %v871_v15, %v5154_v32  ;;  %v886_v4 = vrot.slane %v161_v51, 4  ;;  %v1335_v12 = vsel %vm662_vm0, %v161_v51, %v154_v41  ;;  %v5459_v41 = vperm.slane %v1341_v20, %v5128_v10 }
  0xd3   :  { %v893_v2 = vsel %vm662_vm0, %v892_v46, %v5320_v18  ;;  %v5450_v21 = vperm.slane %v1335_v12, %v5128_v10  ;;  %v170_v18 = vrot.slane %v5351_v60, 4 }
  0xd4   :  { %8349 = vst [vmem:[#allocation29_spill] sm:$0xff] %v5440_v56  ;;  %v897_v13 = vperm.slane %v893_v2, %v5128_v10  ;;  %v887_v40 = vsel %vm662_vm0, %v886_v4, %v153_v59  ;;  %v920_v59 = vrot.slane %v5392_v35, 4  ;;  %v1346_v33 = vrot.slane %v5459_v41, 4 }
  0xd5   :  { %2724 = vst [vmem:[#allocation1 + $0x31] ss:$2 sm:$0xff] %v5440_v56  ;;  %v891_v28 = vperm.slane %v887_v40, %v5128_v10  ;;  %v1348_v34 = vrot.slane %v5450_v21, 4 }
  0xd6   :  { %v898_v22 = vrot.slane %v897_v13, 4  ;;  %351 = vrot.lane.b32.xlu2 %v5303_v8, %s4965_s25  ;;  %347 = vrot.lane.b32.xlu1 %v5303_v8, %s4966_s26  ;;  %s8377_s25 = smov 50   ;;  %s8378_s26 = smov 52  }
  0xd7   :  { %343 = vrot.lane.b32.xlu0 %v5303_v8, %s4967_s27  ;;  %v900_v46 = vrot.slane %v891_v28, 4  ;;  %v5473_v4 = vsel %vm662_vm0, %v5459_v41, %v1348_v34 }
  0xd8   :  { %v899_v15 = vsel %vm662_vm0, %v898_v22, %v891_v28  ;;  %v177_v51 = vpop.permute.xlu1 %176  ;;  %v5466_v53 = vpop.permute.xlu2 %216  ;;  %8350 = vst [vmem:[#allocation30_spill] sm:$0xff] %v5473_v4 }
  0xd9   :  { %v5469_v2 = vperm.slane %v899_v15, %v5154_v32  ;;  %v914_v12 = vrot.slane %v177_v51, 4  ;;  %v1363_v20 = vsel %vm662_vm0, %v177_v51, %v170_v18  ;;  %v173_v40 = vpop.permute.xlu0 %172  ;;  %v5479_v45 = vsel %vm662_vm0, %v897_v13, %v900_v46 }
  0xda   :  { %8351 = vst [vmem:[#allocation31_spill] sm:$0xff] %v5479_v45  ;;  %v5482_v22 = vperm.slane %v1363_v20, %v5128_v10  ;;  %v921_v34 = vsel %vm662_vm0, %v920_v59, %v173_v40  ;;  %v174_v62 = vrot.slane %v173_v40, 4  ;;  %v1234_v45 = vrot.slane %v5301_v6, 4 }
  0xdb   :  { %2729 = vst [vmem:[#allocation1] ss:$2 sm:$0xff] %v5469_v2  ;;  %v915_v28 = vsel %vm662_vm0, %v914_v12, %v5351_v60  ;;  %v925_v18 = vperm.slane %v921_v34, %v5128_v10 }
  0xdc   :  { %v919_v15 = vperm.slane %v915_v28, %v5128_v10  ;;  %v1376_v3 = vrot.slane %v5482_v22, 4  ;;  %v1369_v60 = vsel %vm662_vm0, %v5392_v35, %v174_v62  ;;  %v942_v62 = vrot.slane %v5412_v63, 4 }
  0xdd   :  { %v926_v13 = vrot.slane %v925_v18, 4  ;;  %v1373_v46 = vperm.slane %v1369_v60, %v5128_v10  ;;  %v1122_v60 = vrot.slane %v5147_v26, 4  ;;  %v1235_v49 = vsel %vm662_vm0, %v1234_v45, %v5291_v58 }
  0xde   :  { %v928_v51 = vrot.slane %v919_v15, 4  ;;  %363 = vrot.lane.b32.xlu2 %v5303_v8, %s4968_s28  ;;  %359 = vrot.lane.b32.xlu1 %v5303_v8, %s4969_s29  ;;  %s8380_s28 = smov 54  }
  0xdf   :  { %355 = vrot.lane.b32.xlu0 %v5303_v8, %s4970_s30  ;;  %v927_v40 = vsel %vm662_vm0, %v926_v13, %v919_v15  ;;  %v5510_v19 = vsel %vm662_vm0, %v1373_v46, %v1376_v3  ;;  %v1123_v3 = vsel %vm662_vm0, %v1122_v60, %v5144_v25  ;;  %s8387_s30 = smov 38  }
  0xe0   :  { %v5500_v59 = vsel %vm662_vm0, %v925_v18, %v928_v51  ;;  %v189_v12 = vpop.permute.xlu1 %188  ;;  %v5503_v20 = vpop.permute.xlu2 %228  ;;  %v5507_v34 = vperm.slane %v927_v40, %v5154_v32  ;;  %8353 = vst [vmem:[#allocation33_spill] sm:$0xff] %v5510_v19  ;;  %v1150_v18 = vrot.slane %v5185_v48, 4 }
  0xe1   :  { %8352 = vst [vmem:[#allocation32_spill] sm:$0xff] %v5500_v59  ;;  %v185_v28 = vpop.permute.xlu0 %184 }
  0xe2   :  { %v186_v35 = vrot.slane %v185_v28, 4  ;;  %2730 = vst [vmem:[#allocation1 + $0x1] ss:$2 sm:$0xff] %v5507_v34  ;;  %v943_v15 = vsel %vm662_vm0, %v942_v62, %v185_v28  ;;  %v1151_v26 = vsel %vm662_vm0, %v1150_v18, %v5169_v37 }
  0xe3   :  { %v947_v28 = vperm.slane %v943_v15, %v5128_v10  ;;  %v5540_v60 = vperm.slane %v1151_v26, %v5154_v32 }
  0xe4   :  { %v1391_v51 = vsel %vm662_vm0, %v5412_v63, %v186_v35  ;;  %v190_v63 = vrot.slane %v189_v12, 4  ;;  %v5536_v35 = vperm.slane %v1123_v3, %v5154_v32  ;;  %v1374_v3 = vrot.slane %v1373_v46, 4 }
  0xe5   :  { %v5526_v48 = vperm.slane %v1391_v51, %v5128_v10 }
  0xe6   :  { %375 = vrot.lane.b32.xlu2 %v5303_v8, %s4971_s2  ;;  %371 = vrot.lane.b32.xlu1 %v5303_v8, %s4972_s3  ;;  %s8388_s3 = smov 40  }
  0xe7   :  { %367 = vrot.lane.b32.xlu0 %v5303_v8, %s4973_s4  ;;  %v1404_v37 = vrot.slane %v5526_v48, 4  ;;  %s8389_s4 = smov 42  }
  0xe8   :  { %v201_v13 = vpop.permute.xlu1 %200  ;;  %v5532_v40 = vpop.permute.xlu2 %240 }
  0xe9   :  { %v197_v62 = vpop.permute.xlu0 %196  ;;  %v5543_v11 = vld.sshfl [vmem:[#allocation1] sm:$0xff pattern:$0x75316420] }
  0xea   :  { %v948_v25 = vrot.slane %v197_v62, 4  ;;  %v1397_v51 = vsel %vm662_vm0, %v197_v62, %v190_v63  ;;  %2741 = vst [vmem:[#allocation1] ss:$2 sm:$0xff] %v5536_v35  ;;  %v956_v63 = vrot.slane %v947_v28, 4  ;;  %v1347_v62 = vsel %vm662_vm0, %v1346_v33, %v5450_v21 }
  0xeb   :  { %v5547_v18 = vperm.slane %v1397_v51, %v5128_v10  ;;  %2742 = vst [vmem:[#allocation1 + $0x1] ss:$2 sm:$0xff] %v5540_v60  ;;  %v5574_v33 = vperm.slane %v1347_v62, %v5154_v32  ;;  %v206_v21 = vrot.slane %v5435_v39, 4 }
  0xec   :  { %v949_v15 = vsel %vm662_vm0, %v948_v25, %v189_v12 }
  0xed   :  { %v953_v26 = vperm.slane %v949_v15, %v5128_v10  ;;  %v5555_v41 = vsel %vm662_vm0, %v5547_v18, %v1404_v37  ;;  %v1375_v37 = vsel %vm662_vm0, %v1374_v3, %v5482_v22  ;;  %v202_v15 = vrot.slane %v201_v13, 4 }
  0xee   :  { %8354 = vst [vmem:[#allocation34_spill] sm:$0xff] %v5555_v41  ;;  %387 = vrot.lane.b32.xlu2 %v5303_v8, %s8355_s11  ;;  %383 = vrot.lane.b32.xlu1 %v5303_v8, %s8356_s12  ;;  %v5584_v22 = vperm.slane %v1375_v37, %v5154_v32  ;;  %s8397_s11 = smov 36   ;;  %s8401_s12 = smov 26  }
  0xef   :  { %v954_v12 = vrot.slane %v953_v26, 4  ;;  %v5564_v46 = vsel %vm662_vm0, %v953_v26, %v956_v63  ;;  %379 = vrot.lane.b32.xlu0 %v5303_v8, %s8358_s13  ;;  %s8402_s13 = smov 28  }
  0xf0   :  { %8357 = vst [vmem:[#allocation35_spill] sm:$0xff] %v5564_v46  ;;  %v213_v25 = vpop.permute.xlu1 %212  ;;  %v5568_v51 = vpop.permute.xlu2 %252 }
  0xf1   :  { %v955_v14 = vsel %vm662_vm0, %v954_v12, %v947_v28  ;;  %v976_v41 = vrot.slane %v213_v25, 4  ;;  %v209_v47 = vpop.permute.xlu0 %208  ;;  %v1425_v62 = vsel %vm662_vm0, %v213_v25, %v206_v21  ;;  %v254_v36 = vrot.slane %v5568_v51, 4 }
  0xf2   :  { %v5578_v63 = vperm.slane %v955_v14, %v5154_v32  ;;  %v970_v16 = vrot.slane %v209_v47, 4  ;;  %v1419_v46 = vsel %vm662_vm0, %v209_v47, %v202_v15  ;;  %v5586_v28 = vld.sshfl [vmem:[#allocation1] sm:$0xff pattern:$0x75316420]  ;;  %v1004_v15 = vrot.slane %v5503_v20, 4 }
  0xf3   :  { %v977_v26 = vsel %vm662_vm0, %v976_v41, %v5435_v39  ;;  %2753 = vst [vmem:[#allocation1] ss:$2 sm:$0xff] %v5574_v33  ;;  %v5593_v12 = vperm.slane %v1419_v46, %v5128_v10  ;;  %v5595_v39 = vld.sshfl [vmem:[#allocation1 + $0x10] sm:$0xff pattern:$0x75316420] }
  0xf4   :  { %v981_v3 = vperm.slane %v977_v26, %v5128_v10  ;;  %v971_v14 = vsel %vm662_vm0, %v970_v16, %v201_v13  ;;  %2754 = vst [vmem:[#allocation1 + $0x1] ss:$2 sm:$0xff] %v5584_v22  ;;  %v218_v16 = vrot.slane %v5466_v53, 4  ;;  %v1429_v13 = vperm.slane %v1425_v62, %v5128_v10 }
  0xf5   :  { %v975_v41 = vperm.slane %v971_v14, %v5128_v10  ;;  %2731 = vst [vmem:[#allocation1 + $0x10] ss:$2 sm:$0xff] %v5578_v63  ;;  %v1432_v46 = vrot.slane %v5593_v12, 4 }
  0xf6   :  { %v982_v47 = vrot.slane %v981_v3, 4  ;;  %399 = vrot.lane.b32.xlu2 %v5303_v8, %s8359_s0  ;;  %395 = vrot.lane.b32.xlu1 %v5303_v8, %s8360_s15  ;;  %s8404_s0 = smov 30   ;;  %s8406_s15 = smov 20  }
  0xf7   :  { %391 = vrot.lane.b32.xlu0 %v5303_v8, %s8361_s16  ;;  %v984_v37 = vrot.slane %v975_v41, 4  ;;  %v5617_v19 = vsel %vm662_vm0, %v1429_v13, %v1432_v46 }
  0xf8   :  { %v983_v25 = vsel %vm662_vm0, %v982_v47, %v975_v41  ;;  %v225_v21 = vpop.permute.xlu1 %224  ;;  %v5611_v26 = vpop.permute.xlu2 %264  ;;  %8362 = vst [vmem:[#allocation36_spill] sm:$0xff] %v5617_v19 }
  0xf9   :  { %v5614_v14 = vperm.slane %v983_v25, %v5154_v32  ;;  %v998_v62 = vrot.slane %v225_v21, 4  ;;  %v1447_v4 = vsel %vm662_vm0, %v225_v21, %v218_v16  ;;  %v221_v44 = vpop.permute.xlu0 %220  ;;  %v5622_v47 = vsel %vm662_vm0, %v981_v3, %v984_v37 }
  0xfa   :  { %8363 = vst [vmem:[#allocation37_spill] sm:$0xff] %v5622_v47  ;;  %v5625_v41 = vperm.slane %v1447_v4, %v5128_v10  ;;  %v222_v25 = vrot.slane %v221_v44, 4  ;;  %v1005_v9 = vsel %vm662_vm0, %v1004_v15, %v221_v44  ;;  %v1179_v4 = vsel %vm662_vm0, %v1178_v23, %v5216_v7 }
  0xfb   :  { %2732 = vst [vmem:[#allocation1 + $0x11] ss:$2 sm:$0xff] %v5614_v14  ;;  %v999_v46 = vsel %vm662_vm0, %v998_v62, %v5466_v53  ;;  %v1009_v43 = vperm.slane %v1005_v9, %v5128_v10  ;;  %v1207_v44 = vsel %vm662_vm0, %v1206_v52, %v5252_v31  ;;  %v5660_v62 = vperm.slane %v1179_v4, %v5154_v32  ;;  %v5674_v4 = vld.sshfl [vmem:[#allocation1 + $0x20] sm:$0xff pattern:$0x75316420] }
  0xfc   :  { %v1003_v19 = vperm.slane %v999_v46, %v5128_v10  ;;  %v1460_v16 = vrot.slane %v5625_v41, 4  ;;  %v1453_v3 = vsel %vm662_vm0, %v5503_v20, %v222_v25  ;;  %v5663_v52 = vperm.slane %v1207_v44, %v5154_v32 }
  0xfd   :  { %v5640_v21 = vperm.slane %v1453_v3, %v5128_v10  ;;  %v1010_v53 = vrot.slane %v1009_v43, 4  ;;  %v1026_v9 = vrot.slane %v5532_v40, 4 }
  0xfe   :  { %v1012_v37 = vrot.slane %v1003_v19, 4  ;;  %411 = vrot.lane.b32.xlu2 %v5303_v8, %s8364_s18  ;;  %407 = vrot.lane.b32.xlu1 %v5303_v8, %s8365_s20  ;;  %8369 = vst [vmem:[#allocation40_spill] sm:$0xff] %v5663_v52  ;;  %s8407_s18 = smov 22  }
  0xff   :  { %403 = vrot.lane.b32.xlu0 %v5303_v8, %s8366_s21  ;;  %v5655_v23 = vsel %vm662_vm0, %v5640_v21, %v1460_v16  ;;  %v1011_v25 = vsel %vm662_vm0, %v1010_v53, %v1003_v19  ;;  %v1402_v16 = vrot.slane %v5547_v18, 4  ;;  %s8410_s21 = smov 24  }
 0x100   :  { %v5651_v7 = vsel %vm662_vm0, %v1009_v43, %v1012_v37  ;;  %8368 = vst [vmem:[#allocation39_spill] sm:$0xff] %v5655_v23  ;;  %v237_v20 = vpop.permute.xlu1 %236  ;;  %v5657_v15 = vpop.permute.xlu2 %276  ;;  %v5672_v37 = vperm.slane %v1011_v25, %v5154_v32  ;;  %v1430_v43 = vrot.slane %v1429_v13, 4 }
 0x101   :  { %8367 = vst [vmem:[#allocation38_spill] sm:$0xff] %v5651_v7  ;;  %v233_v46 = vpop.permute.xlu0 %232  ;;  %v1403_v18 = vsel %vm662_vm0, %v1402_v16, %v5526_v48  ;;  %v238_v53 = vrot.slane %v237_v20, 4 }
 0x102   :  { %v5665_v31 = vld.sshfl [vmem:[#allocation1 + $0x10] sm:$0xff pattern:$0x75316420]  ;;  %v234_v3 = vrot.slane %v233_v46, 4  ;;  %8370 = vst [vmem:[#allocation41_spill] sm:$0xff] %v5672_v37  ;;  %v1027_v19 = vsel %vm662_vm0, %v1026_v9, %v233_v46  ;;  %v5698_v23 = vperm.slane %v1403_v18, %v5154_v32 }
 0x103   :  { %2743 = vst [vmem:[#allocation1 + $0x10] ss:$2 sm:$0xff] %v5660_v62  ;;  %v1031_v9 = vperm.slane %v1027_v19, %v5128_v10 }
 0x104   :  { %2744 = vst [vmem:[#allocation1 + $0x11] ss:$2 sm:$0xff] %v5663_v52  ;;  %v1475_v44 = vsel %vm662_vm0, %v5532_v40, %v234_v3  ;;  %v1431_v40 = vsel %vm662_vm0, %v1430_v43, %v5593_v12 }
 0x105   :  { %2733 = vst [vmem:[#allocation1 + $0x20] ss:$2 sm:$0xff] %v5672_v37  ;;  %v5688_v13 = vperm.slane %v1475_v44, %v5128_v10  ;;  %v5702_v44 = vperm.slane %v1431_v40, %v5154_v32  ;;  %v1040_v18 = vrot.slane %v1031_v9, 4 }
 0x106   :  { %423 = vrot.lane.b32.xlu2 %v5303_v8, %s8371_s22  ;;  %419 = vrot.lane.b32.xlu1 %v5303_v8, %s8372_s23  ;;  %8374 = vst [vmem:[#allocation42_spill] sm:$0xff] %v5698_v23  ;;  %s8412_s23 = smov 14  }
 0x107   :  { %415 = vrot.lane.b32.xlu0 %v5303_v8, %s8373_s24  ;;  %8375 = vst [vmem:[#allocation43_spill] sm:$0xff] %v5702_v44  ;;  %v1488_v12 = vrot.slane %v5688_v13, 4  ;;  %s8413_s24 = smov 16  }
 0x108   :  { %v249_v46 = vpop.permute.xlu1 %248  ;;  %v5694_v25 = vpop.permute.xlu2 %291 }
 0x109   :  { %v245_v3 = vpop.permute.xlu0 %244 }
 0x10a   :  { %v1032_v48 = vrot.slane %v245_v3, 4  ;;  %v1481_v16 = vsel %vm662_vm0, %v245_v3, %v238_v53 }
 0x10b   :  { %v5704_v7 = vld.sshfl [vmem:[#allocation1 + $0x10] sm:$0xff pattern:$0x75316420]  ;;  %v5708_v43 = vperm.slane %v1481_v16, %v5128_v10  ;;  %v250_v16 = vrot.slane %v249_v46, 4 }
 0x10c   :  { %2755 = vst [vmem:[#allocation1 + $0x10] ss:$2 sm:$0xff] %v5698_v23  ;;  %v1033_v19 = vsel %vm662_vm0, %v1032_v48, %v237_v20 }
 0x10d   :  { %2756 = vst [vmem:[#allocation1 + $0x11] ss:$2 sm:$0xff] %v5702_v44  ;;  %v1037_v47 = vperm.slane %v1033_v19, %v5128_v10  ;;  %v5716_v40 = vsel %vm662_vm0, %v5708_v43, %v1488_v12 }
 0x10e   :  { %8376 = vst [vmem:[#allocation44_spill] sm:$0xff] %v5716_v40  ;;  %435 = vrot.lane.b32.xlu2 %v5303_v8, %s8377_s25  ;;  %431 = vrot.lane.b32.xlu1 %v5303_v8, %s8378_s26  ;;  %s8414_s25 = smov 18   ;;  %s8418_s26 = smov 8  }
 0x10f   :  { %v1038_v53 = vrot.slane %v1037_v47, 4  ;;  %v5723_v3 = vsel %vm662_vm0, %v1037_v47, %v1040_v18  ;;  %427 = vrot.lane.b32.xlu0 %v5303_v8, %s8380_s28  ;;  %s8419_s28 = smov 10  }
 0x110   :  { %8379 = vst [vmem:[#allocation45_spill] sm:$0xff] %v5723_v3  ;;  %v261_v20 = vpop.permute.xlu1 %260  ;;  %v5727_v48 = vpop.permute.xlu2 %303 }
 0x111   :  { %v1039_v12 = vsel %vm662_vm0, %v1038_v53, %v1031_v9  ;;  %v1060_v19 = vrot.slane %v261_v20, 4  ;;  %v257_v40 = vpop.permute.xlu0 %256  ;;  %v1509_v9 = vsel %vm662_vm0, %v261_v20, %v254_v36  ;;  %v266_v36 = vrot.slane %v5611_v26, 4 }
 0x112   :  { %v5732_v59 = vperm.slane %v1039_v12, %v5154_v32  ;;  %v1054_v18 = vrot.slane %v257_v40, 4  ;;  %v1503_v3 = vsel %vm662_vm0, %v257_v40, %v250_v16  ;;  %v1263_v40 = vsel %vm662_vm0, %v1262_v55, %v5335_v5  ;;  %v5774_v55 = vld.sshfl [vmem:[#allocation1 + $0x30] sm:$0xff pattern:$0x75316420] }
 0x113   :  { %v1061_v47 = vsel %vm662_vm0, %v1060_v19, %v5568_v51  ;;  %v5744_v12 = vperm.slane %v1503_v3, %v5128_v10  ;;  %v5755_v51 = vperm.slane %v1509_v9, %v5128_v10  ;;  %v1088_v16 = vrot.slane %v5657_v15, 4 }
 0x114   :  { %8381 = vst [vmem:[#allocation46_spill] sm:$0xff] %v5732_v59  ;;  %v1065_v42 = vperm.slane %v1061_v47, %v5128_v10  ;;  %v1055_v53 = vsel %vm662_vm0, %v1054_v18, %v249_v46 }
 0x115   :  { %2734 = vst [vmem:[#allocation1 + $0x21] ss:$2 sm:$0xff] %v5732_v59  ;;  %v1059_v56 = vperm.slane %v1055_v53, %v5128_v10  ;;  %v1516_v46 = vrot.slane %v5744_v12, 4  ;;  %v5988_v59 = vld.sshfl [vmem:[#allocation1 + $0x10] sm:$0xff pattern:$0x75316420] }
 0x116   :  { %v1066_v6 = vrot.slane %v1065_v42, 4  ;;  %447 = vrot.lane.b32.xlu2 %v5303_v8, %s4989_s9  ;;  %443 = vrot.lane.b32.xlu1 %v5303_v8, %s4990_s10  ;;  %s8395_s9 = smov 32   ;;  %s8396_s10 = smov 34  }
 0x117   :  { %439 = vrot.lane.b32.xlu0 %v5303_v8, %s4991_s8  ;;  %v1068_v20 = vrot.slane %v1059_v56, 4  ;;  %v5771_v47 = vsel %vm662_vm0, %v5755_v51, %v1516_v46 }
 0x118   :  { %v1067_v3 = vsel %vm662_vm0, %v1066_v6, %v1059_v56  ;;  %v273_v19 = vpop.permute.xlu1 %272  ;;  %v5764_v58 = vpop.permute.xlu2 %315  ;;  %8383 = vst [vmem:[#allocation48_spill] sm:$0xff] %v5771_v47  ;;  %v5783_v6 = vperm.slane %v1235_v49, %v5154_v32 }
 0x119   :  { %v5767_v45 = vperm.slane %v1067_v3, %v5154_v32  ;;  %v1082_v18 = vrot.slane %v273_v19, 4  ;;  %v1531_v9 = vsel %vm662_vm0, %v273_v19, %v266_v36  ;;  %v269_v53 = vpop.permute.xlu0 %268  ;;  %v5777_v5 = vsel %vm662_vm0, %v1065_v42, %v1068_v20 }
 0x11a   :  { %8384 = vst [vmem:[#allocation49_spill] sm:$0xff] %v5777_v5  ;;  %v5780_v56 = vperm.slane %v1531_v9, %v5128_v10  ;;  %v1458_v3 = vrot.slane %v5640_v21, 4  ;;  %v270_v36 = vrot.slane %v269_v53, 4  ;;  %v5790_v19 = vperm.slane %v1263_v40, %v5154_v32 }
 0x11b   :  { %8382 = vst [vmem:[#allocation47_spill] sm:$0xff] %v5767_v45  ;;  %v1083_v46 = vsel %vm662_vm0, %v1082_v18, %v5611_v26  ;;  %v1089_v49 = vsel %vm662_vm0, %v1088_v16, %v269_v53  ;;  %v281_v9 = vrot.slane %v5303_v8, 4  ;;  %v1486_v26 = vrot.slane %v5708_v43, 4 }
 0x11c   :  { %8385 = vst [vmem:[#allocation50_spill] sm:$0xff] %v5783_v6  ;;  %v5792_v47 = vld.sshfl [vmem:[#allocation1 + $0x20] sm:$0xff pattern:$0x75316420]  ;;  %v1087_v42 = vperm.slane %v1083_v46, %v5128_v10  ;;  %v1544_v20 = vrot.slane %v5780_v56, 4  ;;  %v1537_v21 = vsel %vm662_vm0, %v5657_v15, %v270_v36  ;;  %v1093_v18 = vperm.slane %v1089_v49, %v5128_v10 }
 0x11d   :  { %2735 = vst [vmem:[#allocation1 + $0x30] ss:$2 sm:$0xff] %v5767_v45  ;;  %v5805_v46 = vperm.slane %v1537_v21, %v5128_v10  ;;  %v1459_v15 = vsel %vm662_vm0, %v1458_v3, %v5625_v41  ;;  %v1564_v36 = vrot.slane %v5694_v25, 4  ;;  %v1487_v3 = vsel %vm662_vm0, %v1486_v26, %v5688_v13 }
 0x11e   :  { %8386 = vst [vmem:[#allocation51_spill] sm:$0xff] %v5790_v19  ;;  %v1096_v40 = vrot.slane %v1087_v42, 4  ;;  %459 = vrot.lane.b32.xlu2 %v5303_v8, %s8387_s30  ;;  %455 = vrot.lane.b32.xlu1 %v5303_v8, %s8388_s3  ;;  %v1094_v43 = vrot.slane %v1093_v18, 4  ;;  %s8420_s30 = smov 12  }
 0x11f   :  { %2745 = vst [vmem:[#allocation1 + $0x20] ss:$2 sm:$0xff] %v5783_v6  ;;  %451 = vrot.lane.b32.xlu0 %v5303_v8, %s8389_s4  ;;  %v5820_v53 = vsel %vm662_vm0, %v5805_v46, %v1544_v20  ;;  %v5833_v20 = vperm.slane %v1459_v15, %v5154_v32 }
 0x120   :  { %2746 = vst [vmem:[#allocation1 + $0x21] ss:$2 sm:$0xff] %v5790_v19  ;;  %v5816_v16 = vsel %vm662_vm0, %v1093_v18, %v1096_v40  ;;  %v288_v49 = vpop.permute.xlu1 %287  ;;  %v5823_v21 = vpop.permute.xlu2 %327  ;;  %v1095_v19 = vsel %vm662_vm0, %v1094_v43, %v1087_v42  ;;  %v1318_v43 = vrot.slane %v5418_v17, 4 }
 0x121   :  { %8390 = vst [vmem:[#allocation52_spill] sm:$0xff] %v5816_v16  ;;  %v1558_v5 = vrot.slane %v288_v49, 4  ;;  %v2007_v45 = vsel %vm662_vm0, %v288_v49, %v281_v9  ;;  %v284_v41 = vpop.permute.xlu0 %283 }
 0x122   :  { %8391 = vst [vmem:[#allocation53_spill] sm:$0xff] %v5820_v53  ;;  %v5830_v40 = vperm.slane %v2007_v45, %v5128_v10  ;;  %v285_v18 = vrot.slane %v284_v41, 4  ;;  %v5836_v53 = vperm.slane %v1095_v19, %v5154_v32  ;;  %v1565_v49 = vsel %vm662_vm0, %v1564_v36, %v284_v41 }
 0x123   :  { %8392 = vst [vmem:[#allocation54_spill] sm:$0xff] %v5833_v20  ;;  %v1559_v16 = vsel %vm662_vm0, %v1558_v5, %v5303_v8  ;;  %v5845_v45 = vperm.slane %v1487_v3, %v5154_v32  ;;  %v1569_v19 = vperm.slane %v1565_v49, %v5128_v10 }
 0x124   :  { %8393 = vst [vmem:[#allocation55_spill] sm:$0xff] %v5836_v53  ;;  %v2020_v9 = vrot.slane %v5830_v40, 4  ;;  %v2013_v13 = vsel %vm662_vm0, %v5694_v25, %v285_v18  ;;  %v1563_v26 = vperm.slane %v1559_v16, %v5128_v10  ;;  %v1290_v25 = vrot.slane %v5377_v30, 4 }
 0x125   :  { %8394 = vst [vmem:[#allocation56_spill] sm:$0xff] %v5845_v45  ;;  %v5853_v5 = vperm.slane %v2013_v13, %v5128_v10  ;;  %v1570_v16 = vrot.slane %v1569_v19, 4  ;;  %v1586_v13 = vrot.slane %v5727_v48, 4 }
 0x126   :  { %471 = vrot.lane.b32.xlu2 %v5303_v8, %s8395_s9  ;;  %467 = vrot.lane.b32.xlu1 %v5303_v8, %s8396_s10  ;;  %v1572_v15 = vrot.slane %v1563_v26, 4  ;;  %2736 = vst [vmem:[#allocation1 + $0x31] ss:$2 sm:$0xff] %v5836_v53  ;;  %v1291_v17 = vsel %vm662_vm0, %v1290_v25, %v5365_v0 }
 0x127   :  { %v5847_v42 = vld.sshfl [vmem:[#allocation1 + $0x20] sm:$0xff pattern:$0x75316420]  ;;  %463 = vrot.lane.b32.xlu0 %v5303_v8, %s8397_s11  ;;  %v5867_v36 = vsel %vm662_vm0, %v5853_v5, %v2020_v9  ;;  %v1571_v49 = vsel %vm662_vm0, %v1570_v16, %v1563_v26  ;;  %v1319_v9 = vsel %vm662_vm0, %v1318_v43, %v5408_v54  ;;  %v5889_v26 = vperm.slane %v1291_v17, %v5154_v32 }
 0x128   :  { %2757 = vst [vmem:[#allocation1 + $0x20] ss:$2 sm:$0xff] %v5833_v20  ;;  %v300_v41 = vpop.permute.xlu1 %299  ;;  %v5869_v3 = vpop.permute.xlu2 %339  ;;  %v5872_v30 = vsel %vm662_vm0, %v1569_v19, %v1572_v15  ;;  %v5879_v20 = vperm.slane %v1571_v49, %v5154_v32  ;;  %v5897_v0 = vperm.slane %v1319_v9, %v5154_v32 }
 0x129   :  { %2758 = vst [vmem:[#allocation1 + $0x21] ss:$2 sm:$0xff] %v5845_v45  ;;  %v296_v18 = vpop.permute.xlu0 %295  ;;  %v301_v25 = vrot.slane %v300_v41, 4 }
 0x12a   :  { %8398 = vst [vmem:[#allocation57_spill] sm:$0xff] %v5867_v36  ;;  %v297_v45 = vrot.slane %v296_v18, 4  ;;  %v5883_v36 = vld.sshfl [vmem:[#allocation1] sm:$0xff pattern:$0x75316420]  ;;  %v1587_v15 = vsel %vm662_vm0, %v1586_v13, %v296_v18  ;;  %v1542_v18 = vrot.slane %v5805_v46, 4 }
 0x12b   :  { %8399 = vst [vmem:[#allocation58_spill] sm:$0xff] %v5872_v30  ;;  %v1591_v49 = vperm.slane %v1587_v15, %v5128_v10 }
 0x12c   :  { %v2035_v19 = vsel %vm662_vm0, %v5727_v48, %v297_v45  ;;  %2765 = vst [vmem:[#allocation1] ss:$2 sm:$0xff] %v5879_v20  ;;  %v1514_v45 = vrot.slane %v5755_v51, 4  ;;  %v1543_v46 = vsel %vm662_vm0, %v1542_v18, %v5780_v56 }
 0x12d   :  { %8400 = vst [vmem:[#allocation59_spill] sm:$0xff] %v5889_v26  ;;  %v5899_v54 = vld.sshfl [vmem:[#allocation1 + $0x30] sm:$0xff pattern:$0x75316420]  ;;  %v5902_v48 = vperm.slane %v2035_v19, %v5128_v10  ;;  %v5941_v56 = vperm.slane %v1543_v46, %v5154_v32 }
 0x12e   :  { %483 = vrot.lane.b32.xlu2 %v5303_v8, %s8401_s12  ;;  %479 = vrot.lane.b32.xlu1 %v5303_v8, %s8402_s13  ;;  %8403 = vst [vmem:[#allocation60_spill] sm:$0xff] %v5897_v0  ;;  %v1515_v30 = vsel %vm662_vm0, %v1514_v45, %v5744_v12 }
 0x12f   :  { %475 = vrot.lane.b32.xlu0 %v5303_v8, %s8404_s0  ;;  %2747 = vst [vmem:[#allocation1 + $0x30] ss:$2 sm:$0xff] %v5889_v26  ;;  %v2048_v19 = vrot.slane %v5902_v48, 4  ;;  %v5933_v12 = vperm.slane %v1515_v30, %v5154_v32 }
 0x130   :  { %v312_v43 = vpop.permute.xlu1 %311  ;;  %v5908_v16 = vpop.permute.xlu2 %351  ;;  %2748 = vst [vmem:[#allocation1 + $0x31] ss:$2 sm:$0xff] %v5897_v0  ;;  %v1600_v0 = vrot.slane %v1591_v49, 4 }
 0x131   :  { %v308_v13 = vpop.permute.xlu0 %307  ;;  %8408 = vst [vmem:[#allocation62_spill] sm:$0xff] %v5933_v12 }
 0x132   :  { %v1592_v17 = vrot.slane %v308_v13, 4  ;;  %v2041_v9 = vsel %vm662_vm0, %v308_v13, %v301_v25  ;;  %8411 = vst [vmem:[#allocation64_spill] sm:$0xff] %v5941_v56  ;;  %v313_v13 = vrot.slane %v312_v43, 4 }
 0x133   :  { %v5916_v51 = vperm.slane %v2041_v9, %v5128_v10 }
 0x134   :  { %v1593_v26 = vsel %vm662_vm0, %v1592_v17, %v300_v41 }
 0x135   :  { %v1597_v15 = vperm.slane %v1593_v26, %v5128_v10  ;;  %v5926_v53 = vsel %vm662_vm0, %v5916_v51, %v2048_v19 }
 0x136   :  { %8405 = vst [vmem:[#allocation61_spill] sm:$0xff] %v5926_v53  ;;  %495 = vrot.lane.b32.xlu2 %v5303_v8, %s8406_s15  ;;  %491 = vrot.lane.b32.xlu1 %v5303_v8, %s8407_s18 }
 0x137   :  { %v1598_v41 = vrot.slane %v1597_v15, 4  ;;  %v5936_v45 = vsel %vm662_vm0, %v1597_v15, %v1600_v0  ;;  %487 = vrot.lane.b32.xlu0 %v5303_v8, %s8410_s21  ;;  %v5943_v26 = vld.sshfl [vmem:[#allocation1 + $0x30] sm:$0xff pattern:$0x75316420]  ;;  %v317_v0 = vrot.slane %v5764_v58, 4 }
 0x138   :  { %8409 = vst [vmem:[#allocation63_spill] sm:$0xff] %v5936_v45  ;;  %v324_v25 = vpop.permute.xlu1 %323  ;;  %v5945_v18 = vpop.permute.xlu2 %363 }
 0x139   :  { %2759 = vst [vmem:[#allocation1 + $0x30] ss:$2 sm:$0xff] %v5933_v12  ;;  %v1599_v30 = vsel %vm662_vm0, %v1598_v41, %v1591_v49  ;;  %v1620_v17 = vrot.slane %v324_v25, 4  ;;  %v320_v9 = vpop.permute.xlu0 %319  ;;  %v2069_v49 = vsel %vm662_vm0, %v324_v25, %v317_v0 }
 0x13a   :  { %2760 = vst [vmem:[#allocation1 + $0x31] ss:$2 sm:$0xff] %v5941_v56  ;;  %v5952_v19 = vperm.slane %v1599_v30, %v5154_v32  ;;  %v1614_v15 = vrot.slane %v320_v9, 4  ;;  %v2063_v53 = vsel %vm662_vm0, %v320_v9, %v313_v13  ;;  %v5971_v13 = vperm.slane %v2069_v49, %v5128_v10 }
 0x13b   :  { %v1621_v46 = vsel %vm662_vm0, %v1620_v17, %v5764_v58  ;;  %v5962_v56 = vperm.slane %v2063_v53, %v5128_v10  ;;  %v329_v58 = vrot.slane %v5823_v21, 4 }
 0x13c   :  { %2766 = vst [vmem:[#allocation1 + $0x1] ss:$2 sm:$0xff] %v5952_v19  ;;  %v1625_v45 = vperm.slane %v1621_v46, %v5128_v10  ;;  %v1615_v41 = vsel %vm662_vm0, %v1614_v15, %v312_v43  ;;  %v1648_v43 = vrot.slane %v5869_v3, 4 }
 0x13d   :  { %v1619_v30 = vperm.slane %v1615_v41, %v5128_v10  ;;  %v2076_v25 = vrot.slane %v5962_v56, 4 }
 0x13e   :  { %v1626_v12 = vrot.slane %v1625_v45, 4  ;;  %507 = vrot.lane.b32.xlu2 %v5303_v8, %s8412_s23  ;;  %503 = vrot.lane.b32.xlu1 %v5303_v8, %s8413_s24 }
 0x13f   :  { %499 = vrot.lane.b32.xlu0 %v5303_v8, %s8414_s25  ;;  %v1628_v17 = vrot.slane %v1619_v30, 4  ;;  %v5985_v15 = vsel %vm662_vm0, %v5971_v13, %v2076_v25 }
 0x140   :  { %v1627_v53 = vsel %vm662_vm0, %v1626_v12, %v1619_v30  ;;  %v336_v9 = vpop.permute.xlu1 %335  ;;  %v5978_v0 = vpop.permute.xlu2 %375  ;;  %8416 = vst [vmem:[#allocation66_spill] sm:$0xff] %v5985_v15 }
 0x141   :  { %v5981_v46 = vperm.slane %v1627_v53, %v5154_v32  ;;  %v1642_v49 = vrot.slane %v336_v9, 4  ;;  %v2091_v41 = vsel %vm662_vm0, %v336_v9, %v329_v58  ;;  %v332_v6 = vpop.permute.xlu0 %331  ;;  %v5991_v57 = vsel %vm662_vm0, %v1625_v45, %v1628_v17 }
 0x142   :  { %8417 = vst [vmem:[#allocation67_spill] sm:$0xff] %v5991_v57  ;;  %v5994_v12 = vperm.slane %v2091_v41, %v5128_v10  ;;  %v1649_v25 = vsel %vm662_vm0, %v1648_v43, %v332_v6  ;;  %v333_v15 = vrot.slane %v332_v6, 4  ;;  %v377_v52 = vrot.slane %v5978_v0, 4 }
 0x143   :  { %8415 = vst [vmem:[#allocation65_spill] sm:$0xff] %v5981_v46  ;;  %v1643_v30 = vsel %vm662_vm0, %v1642_v49, %v5823_v21  ;;  %v1653_v58 = vperm.slane %v1649_v25, %v5128_v10 }
 0x144   :  { %2767 = vst [vmem:[#allocation1 + $0x10] ss:$2 sm:$0xff] %v5981_v46  ;;  %v1647_v53 = vperm.slane %v1643_v30, %v5128_v10  ;;  %v2104_v37 = vrot.slane %v5994_v12, 4  ;;  %v2097_v21 = vsel %vm662_vm0, %v5869_v3, %v333_v15 }
 0x145   :  { %v1654_v45 = vrot.slane %v1653_v58, 4  ;;  %v6015_v43 = vperm.slane %v2097_v21, %v5128_v10  ;;  %v4896_v21 = vld [vmem:[#allocation2 + $0x8] sm:$0xff] }
 0x146   :  { %v1656_v9 = vrot.slane %v1647_v53, 4  ;;  %519 = vrot.lane.b32.xlu2 %v5303_v8, %s8418_s26  ;;  %515 = vrot.lane.b32.xlu1 %v5303_v8, %s8419_s28 }
 0x147   :  { %511 = vrot.lane.b32.xlu0 %v5303_v8, %s8420_s30  ;;  %v1655_v41 = vsel %vm662_vm0, %v1654_v45, %v1647_v53  ;;  %v6025_v3 = vsel %vm662_vm0, %v6015_v43, %v2104_v37  ;;  %v1670_v8 = vrot.slane %v5908_v16, 4 }
 0x148   :  { %v6012_v6 = vsel %vm662_vm0, %v1653_v58, %v1656_v9  ;;  %v348_v17 = vpop.permute.xlu1 %347  ;;  %v6017_v49 = vpop.permute.xlu2 %387  ;;  %v6021_v25 = vperm.slane %v1655_v41, %v5154_v32  ;;  %8423 = vst [vmem:[#allocation70_spill] sm:$0xff] %v6025_v3 }
 0x149   :  { %8421 = vst [vmem:[#allocation68_spill] sm:$0xff] %v6012_v6  ;;  %v344_v30 = vpop.permute.xlu0 %343  ;;  %v349_v37 = vrot.slane %v348_v17, 4 }
 0x14a   :  { %8422 = vst [vmem:[#allocation69_spill] sm:$0xff] %v6021_v25  ;;  %v345_v15 = vrot.slane %v344_v30, 4  ;;  %v1671_v9 = vsel %vm662_vm0, %v1670_v8, %v344_v30 }
 0x14b   :  { %2768 = vst [vmem:[#allocation1 + $0x11] ss:$2 sm:$0xff] %v6021_v25  ;;  %v1675_v3 = vperm.slane %v1671_v9, %v5128_v10 }
 0x14c   :  { %v2119_v58 = vsel %vm662_vm0, %v5908_v16, %v345_v15 }
 0x14d   :  { %v6035_v53 = vperm.slane %v2119_v58, %v5128_v10  ;;  %v1684_v57 = vrot.slane %v1675_v3, 4 }
 0x14e   :  { %531 = vrot.lane.b32.xlu2 %v4896_v21, %s5012_s5  ;;  %527 = vrot.lane.b32.xlu1 %v4896_v21, %s5013_s7 }
 0x14f   :  { %523 = vrot.lane.b32.xlu0 %v4896_v21, %s5014_s6  ;;  %v2132_v8 = vrot.slane %v6035_v53, 4 }
 0x150   :  { %v360_v45 = vpop.permute.xlu1 %359  ;;  %v6038_v41 = vpop.permute.xlu2 %399 }
 0x151   :  { %v356_v6 = vpop.permute.xlu0 %355 }
 0x152   :  { %v1676_v16 = vrot.slane %v356_v6, 4  ;;  %v2125_v30 = vsel %vm662_vm0, %v356_v6, %v349_v37  ;;  %v361_v6 = vrot.slane %v360_v45, 4 }
 0x153   :  { %v6044_v15 = vperm.slane %v2125_v30, %v5128_v10 }
 0x154   :  { %v1677_v58 = vsel %vm662_vm0, %v1676_v16, %v348_v17  ;;  %v365_v17 = vrot.slane %v5945_v18, 4 }
 0x155   :  { %v1681_v21 = vperm.slane %v1677_v58, %v5128_v10  ;;  %v6050_v25 = vsel %vm662_vm0, %v6044_v15, %v2132_v8  ;;  %v6062_v58 = vld.sshfl [vmem:[#allocation1 + $0x20] sm:$0xff pattern:$0x75316420] }
 0x156   :  { %8424 = vst [vmem:[#allocation71_spill] sm:$0xff] %v6050_v25 }
 0x157   :  { %v1682_v46 = vrot.slane %v1681_v21, 4  ;;  %v6053_v9 = vsel %vm662_vm0, %v1681_v21, %v1684_v57 }
 0x158   :  { %8425 = vst [vmem:[#allocation72_spill] sm:$0xff] %v6053_v9  ;;  %v372_v61 = vpop.permute.xlu1 %371  ;;  %v6056_v44 = vpop.permute.xlu2 %411 }
 0x159   :  { %v1683_v37 = vsel %vm662_vm0, %v1682_v46, %v1675_v3  ;;  %v1704_v29 = vrot.slane %v372_v61, 4  ;;  %v368_v30 = vpop.permute.xlu0 %367  ;;  %v2153_v3 = vsel %vm662_vm0, %v372_v61, %v365_v17  ;;  %v1732_v61 = vrot.slane %v6017_v49, 4 }
 0x15a   :  { %v6060_v16 = vperm.slane %v1683_v37, %v5154_v32  ;;  %v1698_v57 = vrot.slane %v368_v30, 4  ;;  %v2147_v21 = vsel %vm662_vm0, %v368_v30, %v361_v6 }
 0x15b   :  { %v1705_v8 = vsel %vm662_vm0, %v1704_v29, %v5945_v18  ;;  %v6072_v9 = vperm.slane %v2147_v21, %v5128_v10  ;;  %v6077_v29 = vperm.slane %v2153_v3, %v5128_v10 }
 0x15c   :  { %8426 = vst [vmem:[#allocation73_spill] sm:$0xff] %v6060_v16  ;;  %v1709_v46 = vperm.slane %v1705_v8, %v5128_v10  ;;  %v1699_v25 = vsel %vm662_vm0, %v1698_v57, %v360_v45 }
 0x15d   :  { %2769 = vst [vmem:[#allocation1 + $0x20] ss:$2 sm:$0xff] %v6060_v16  ;;  %v1703_v23 = vperm.slane %v1699_v25, %v5128_v10  ;;  %v2160_v18 = vrot.slane %v6072_v9, 4 }
 0x15e   :  { %v1710_v37 = vrot.slane %v1709_v46, 4 }
 0x15f   :  { %v1712_v30 = vrot.slane %v1703_v23, 4  ;;  %v6087_v8 = vsel %vm662_vm0, %v6077_v29, %v2160_v18 }
 0x160   :  { %v1711_v6 = vsel %vm662_vm0, %v1710_v37, %v1703_v23  ;;  %v384_v17 = vpop.permute.xlu1 %383  ;;  %8428 = vst [vmem:[#allocation75_spill] sm:$0xff] %v6087_v8  ;;  %v6099_v16 = vpop.permute.xlu2 %423 }
 0x161   :  { %v6083_v45 = vperm.slane %v1711_v6, %v5154_v32  ;;  %v1726_v25 = vrot.slane %v384_v17, 4  ;;  %v2175_v57 = vsel %vm662_vm0, %v384_v17, %v377_v52  ;;  %v380_v21 = vpop.permute.xlu0 %379  ;;  %v6091_v3 = vsel %vm662_vm0, %v1709_v46, %v1712_v30 }
 0x162   :  { %8429 = vst [vmem:[#allocation76_spill] sm:$0xff] %v6091_v3  ;;  %v6094_v37 = vperm.slane %v2175_v57, %v5128_v10  ;;  %v381_v6 = vrot.slane %v380_v21, 4  ;;  %v1733_v52 = vsel %vm662_vm0, %v1732_v61, %v380_v21 }
 0x163   :  { %8427 = vst [vmem:[#allocation74_spill] sm:$0xff] %v6083_v45  ;;  %v1727_v23 = vsel %vm662_vm0, %v1726_v25, %v5978_v0  ;;  %v1737_v17 = vperm.slane %v1733_v52, %v5128_v10  ;;  %v6122_v52 = vld.sshfl [vmem:[#allocation1 + $0x30] sm:$0xff pattern:$0x75316420] }
 0x164   :  { %8430 = vst [vmem:[#allocation77_spill] sm:$0xff] %v6094_v37  ;;  %v1731_v18 = vperm.slane %v1727_v23, %v5128_v10  ;;  %v2188_v8 = vrot.slane %v6094_v37, 4  ;;  %v2181_v46 = vsel %vm662_vm0, %v6017_v49, %v381_v6  ;;  %v1754_v49 = vrot.slane %v6038_v41, 4 }
 0x165   :  { %2770 = vst [vmem:[#allocation1 + $0x21] ss:$2 sm:$0xff] %v6083_v45  ;;  %v6108_v57 = vperm.slane %v2181_v46, %v5128_v10  ;;  %v1738_v3 = vrot.slane %v1737_v17, 4 }
 0x166   :  { %v1740_v30 = vrot.slane %v1731_v18, 4 }
 0x167   :  { %8431 = vst [vmem:[#allocation78_spill] sm:$0xff] %v6108_v57  ;;  %v6115_v25 = vsel %vm662_vm0, %v6108_v57, %v2188_v8  ;;  %v1739_v61 = vsel %vm662_vm0, %v1738_v3, %v1731_v18 }
 0x168   :  { %v6111_v0 = vsel %vm662_vm0, %v1737_v17, %v1740_v30  ;;  %8433 = vst [vmem:[#allocation80_spill] sm:$0xff] %v6115_v25  ;;  %v396_v23 = vpop.permute.xlu1 %395  ;;  %v6120_v6 = vperm.slane %v1739_v61, %v5154_v32  ;;  %v6127_v30 = vpop.permute.xlu2 %435 }
 0x169   :  { %8432 = vst [vmem:[#allocation79_spill] sm:$0xff] %v6111_v0  ;;  %v392_v45 = vpop.permute.xlu0 %391  ;;  %v397_v3 = vrot.slane %v396_v23, 4 }
 0x16a   :  { %v393_v21 = vrot.slane %v392_v45, 4  ;;  %8434 = vst [vmem:[#allocation81_spill] sm:$0xff] %v6120_v6  ;;  %v1755_v8 = vsel %vm662_vm0, %v1754_v49, %v392_v45 }
 0x16b   :  { %2771 = vst [vmem:[#allocation1 + $0x30] ss:$2 sm:$0xff] %v6120_v6  ;;  %v1759_v25 = vperm.slane %v1755_v8, %v5128_v10 }
 0x16c   :  { %v2203_v46 = vsel %vm662_vm0, %v6038_v41, %v393_v21 }
 0x16d   :  { %v6131_v17 = vperm.slane %v2203_v46, %v5128_v10  ;;  %v1768_v6 = vrot.slane %v1759_v25, 4  ;;  %v3236_v46 = vsel %vm3229_vm1, %v5674_v4, -inf }
 0x16f   :  { %v2216_v57 = vrot.slane %v6131_v17, 4 }
 0x170   :  { %v408_v18 = vpop.permute.xlu1 %407 }
 0x171   :  { %v404_v61 = vpop.permute.xlu0 %403 }
 0x172   :  { %v1760_v0 = vrot.slane %v404_v61, 4  ;;  %v2209_v37 = vsel %vm662_vm0, %v404_v61, %v397_v3  ;;  %v3230_v61 = vsel %vm3229_vm1, %v5476_v27, -inf }
 0x173   :  { %v6137_v41 = vperm.slane %v2209_v37, %v5128_v10  ;;  %v3233_v37 = vsel %vm3229_vm1, %v5595_v39, -inf }
 0x174   :  { %v1761_v21 = vsel %vm662_vm0, %v1760_v0, %v396_v23  ;;  %v6152_v0 = vpop.permute.xlu2 %447 }
 0x175   :  { %v1765_v45 = vperm.slane %v1761_v21, %v5128_v10  ;;  %v6143_v49 = vsel %vm662_vm0, %v6137_v41, %v2216_v57  ;;  %v409_v57 = vrot.slane %v408_v18, 4 }
 0x176   :  { %8435 = vst [vmem:[#allocation82_spill] sm:$0xff] %v6143_v49 }
 0x177   :  { %v1766_v8 = vrot.slane %v1765_v45, 4  ;;  %v6148_v3 = vsel %vm662_vm0, %v1765_v45, %v1768_v6  ;;  %3237 = vmax.xlane.f32.xlu2 %v3236_v46  ;;  %v413_v6 = vrot.slane %v6056_v44, 4 }
 0x178   :  { %8436 = vst [vmem:[#allocation83_spill] sm:$0xff] %v6148_v3  ;;  %v420_v23 = vpop.permute.xlu1 %419  ;;  %3234 = vmax.xlane.f32.xlu1 %v3233_v37 }
 0x179   :  { %v1767_v21 = vsel %vm662_vm0, %v1766_v8, %v1759_v25  ;;  %v1788_v49 = vrot.slane %v420_v23, 4  ;;  %3231 = vmax.xlane.f32.xlu0 %v3230_v61  ;;  %v416_v4 = vpop.permute.xlu0 %415  ;;  %v2237_v25 = vsel %vm662_vm0, %v420_v23, %v413_v6 }
 0x17a   :  { %v6159_v45 = vperm.slane %v1767_v21, %v5154_v32  ;;  %v1782_v46 = vrot.slane %v416_v4, 4  ;;  %v2231_v3 = vsel %vm662_vm0, %v416_v4, %v409_v57  ;;  %v425_v57 = vrot.slane %v6099_v16, 4 }
 0x17b   :  { %v1789_v39 = vsel %vm662_vm0, %v1788_v49, %v6056_v44  ;;  %v6169_v37 = vperm.slane %v2231_v3, %v5128_v10  ;;  %v3239_v44 = vsel %vm3229_vm1, %v5774_v55, -inf  ;;  %v3245_v49 = vsel %vm3229_vm1, %v5665_v31, -inf }
 0x17c   :  { %8437 = vst [vmem:[#allocation84_spill] sm:$0xff] %v6159_v45  ;;  %v1793_v27 = vperm.slane %v1789_v39, %v5128_v10  ;;  %v1783_v8 = vsel %vm662_vm0, %v1782_v46, %v408_v18  ;;  %v6178_v4 = vperm.slane %v2237_v25, %v5128_v10  ;;  %v1816_v18 = vrot.slane %v6127_v30, 4 }
 0x17d   :  { %2772 = vst [vmem:[#allocation1 + $0x31] ss:$2 sm:$0xff] %v6159_v45  ;;  %v1787_v21 = vperm.slane %v1783_v8, %v5128_v10  ;;  %v2244_v23 = vrot.slane %v6169_v37, 4  ;;  %v3242_v55 = vsel %vm3229_vm1, %v5543_v11, -inf  ;;  %v6193_v45 = vpop.permute.xlu2 %459 }
 0x17e   :  { %v1794_v61 = vrot.slane %v1793_v27, 4 }
 0x17f   :  { %3240 = vmax.xlane.f32.xlu2 %v3239_v44  ;;  %v1796_v6 = vrot.slane %v1787_v21, 4  ;;  %v6190_v46 = vsel %vm662_vm0, %v6178_v4, %v2244_v23 }
 0x180   :  { %v1795_v3 = vsel %vm662_vm0, %v1794_v61, %v1787_v21  ;;  %v432_v39 = vpop.permute.xlu1 %431  ;;  %3246 = vmax.xlane.f32.xlu1 %v3245_v49  ;;  %8438 = vst [vmem:[#allocation85_spill] sm:$0xff] %v6190_v46  ;;  %v6195_v61 = vld.sshfl [vmem:[#allocation1] sm:$0xff pattern:$0x75316420] }
 0x181   :  { %v6186_v31 = vperm.slane %v1795_v3, %v5154_v32  ;;  %v1810_v25 = vrot.slane %v432_v39, 4  ;;  %v2259_v8 = vsel %vm662_vm0, %v432_v39, %v425_v57  ;;  %3243 = vmax.xlane.f32.xlu0 %v3242_v55  ;;  %v428_v44 = vpop.permute.xlu0 %427  ;;  %v6198_v21 = vsel %vm662_vm0, %v1793_v27, %v1796_v6 }
 0x182   :  { %v6201_v11 = vperm.slane %v2259_v8, %v5128_v10  ;;  %v1817_v23 = vsel %vm662_vm0, %v1816_v18, %v428_v44  ;;  %v429_v3 = vrot.slane %v428_v44, 4  ;;  %v3248_v27 = vsel %vm3229_vm1, %v5792_v47, -inf }
 0x183   :  { %2777 = vst [vmem:[#allocation1] ss:$2 sm:$0xff] %v6186_v31  ;;  %v1811_v49 = vsel %vm662_vm0, %v1810_v25, %v6099_v16  ;;  %v1821_v39 = vperm.slane %v1817_v23, %v5128_v10  ;;  %v3254_v16 = vsel %vm3229_vm1, %v5586_v28, -inf  ;;  %v1838_v28 = vrot.slane %v6152_v0, 4 }
 0x184   :  { %v1815_v57 = vperm.slane %v1811_v49, %v5128_v10  ;;  %v2272_v46 = vrot.slane %v6201_v11, 4  ;;  %v2265_v8 = vsel %vm662_vm0, %v6127_v30, %v429_v3  ;;  %v3251_v49 = vsel %vm3229_vm1, %v5899_v54, -inf }
 0x185   :  { %v1822_v6 = vrot.slane %v1821_v39, 4  ;;  %v2269_v25 = vperm.slane %v2265_v8, %v5128_v10  ;;  %v2046_v54 = vrot.slane %v5916_v51, 4 }
 0x186   :  { %v1824_v55 = vrot.slane %v1815_v57, 4 }
 0x187   :  { %3249 = vmax.xlane.f32.xlu2 %v3248_v27  ;;  %v1823_v47 = vsel %vm662_vm0, %v1822_v6, %v1815_v57  ;;  %v6227_v3 = vsel %vm662_vm0, %v2269_v25, %v2272_v46  ;;  %v6231_v27 = vpop.permute.xlu2 %471  ;;  %v3257_v46 = vsel %vm3229_vm1, %v5704_v7, -inf  ;;  %v2047_v51 = vsel %vm662_vm0, %v2046_v54, %v5902_v48 }
 0x188   :  { %v6217_v18 = vsel %vm662_vm0, %v1821_v39, %v1824_v55  ;;  %v444_v44 = vpop.permute.xlu1 %443  ;;  %3255 = vmax.xlane.f32.xlu1 %v3254_v16  ;;  %v6224_v30 = vperm.slane %v1823_v47, %v5154_v32  ;;  %v2018_v55 = vrot.slane %v5853_v5, 4  ;;  %v3263_v5 = vsel %vm3229_vm1, %v5943_v26, -inf }
 0x189   :  { %3252 = vmax.xlane.f32.xlu0 %v3251_v49  ;;  %v440_v23 = vpop.permute.xlu0 %439  ;;  %v445_v49 = vrot.slane %v444_v44, 4  ;;  %v3260_v47 = vsel %vm3229_vm1, %v5847_v42, -inf  ;;  %v6257_v26 = vperm.slane %v2047_v51, %v5154_v32  ;;  %v2242_v48 = vrot.slane %v6178_v4, 4 }
 0x18a   :  { %v441_v39 = vrot.slane %v440_v23, 4  ;;  %2778 = vst [vmem:[#allocation1 + $0x1] ss:$2 sm:$0xff] %v6224_v30  ;;  %v1839_v6 = vsel %vm662_vm0, %v1838_v28, %v440_v23  ;;  %v2019_v8 = vsel %vm662_vm0, %v2018_v55, %v5830_v40  ;;  %v3266_v51 = vsel %vm3229_vm1, %v5883_v36, -inf }
 0x18b   :  { %v1843_v7 = vperm.slane %v1839_v6, %v5128_v10  ;;  %v6253_v23 = vperm.slane %v2019_v8, %v5154_v32  ;;  %v2270_v6 = vrot.slane %v2269_v25, 4 }
 0x18c   :  { %v2287_v57 = vsel %vm662_vm0, %v6152_v0, %v441_v39 }
 0x18d   :  { %v6243_v16 = vperm.slane %v2287_v57, %v5128_v10 }
 0x18f   :  { %3258 = vmax.xlane.f32.xlu2 %v3257_v46  ;;  %v2300_v42 = vrot.slane %v6243_v16, 4  ;;  %v1852_v46 = vrot.slane %v1843_v7, 4 }
 0x190   :  { %v456_v0 = vpop.permute.xlu1 %455  ;;  %3264 = vmax.xlane.f32.xlu1 %v3263_v5  ;;  %v6274_v5 = vpop.permute.xlu2 %483 }
 0x191   :  { %3261 = vmax.xlane.f32.xlu0 %v3260_v47  ;;  %v452_v40 = vpop.permute.xlu0 %451  ;;  %v6260_v55 = vld.sshfl [vmem:[#allocation1] sm:$0xff pattern:$0x75316420]  ;;  %v457_v36 = vrot.slane %v456_v0, 4 }
 0x192   :  { %v1844_v28 = vrot.slane %v452_v40, 4  ;;  %v2293_v39 = vsel %vm662_vm0, %v452_v40, %v445_v49  ;;  %2789 = vst [vmem:[#allocation1] ss:$2 sm:$0xff] %v6253_v23  ;;  %v2243_v49 = vsel %vm662_vm0, %v2242_v48, %v6169_v37 }
 0x193   :  { %v6264_v54 = vperm.slane %v2293_v39, %v5128_v10  ;;  %2790 = vst [vmem:[#allocation1 + $0x1] ss:$2 sm:$0xff] %v6257_v26  ;;  %v2271_v39 = vsel %vm662_vm0, %v2270_v6, %v6201_v11  ;;  %v2774_v6 = vld.sshfl [vmem:[#allocation1 + $0x10] sm:$0xff pattern:$0x75316420] }
 0x194   :  { %v1845_v57 = vsel %vm662_vm0, %v1844_v28, %v444_v44  ;;  %v3272_v44 = vsel %vm3229_vm1, %v6062_v58, -inf  ;;  %v3269_v28 = vsel %vm3229_vm1, %v5988_v59, -inf }
 0x195   :  { %v1849_v8 = vperm.slane %v1845_v57, %v5128_v10  ;;  %v6272_v4 = vsel %vm662_vm0, %v6264_v54, %v2300_v42  ;;  %v6291_v57 = vperm.slane %v2243_v49, %v5154_v32 }
 0x196   :  { %8439 = vst [vmem:[#allocation86_spill] sm:$0xff] %v6272_v4 }
 0x197   :  { %v1850_v47 = vrot.slane %v1849_v8, 4  ;;  %v6281_v25 = vsel %vm662_vm0, %v1849_v8, %v1852_v46  ;;  %3267 = vmax.xlane.f32.xlu2 %v3266_v51  ;;  %v461_v46 = vrot.slane %v6193_v45, 4 }
 0x198   :  { %v468_v40 = vpop.permute.xlu1 %467  ;;  %3273 = vmax.xlane.f32.xlu1 %v3272_v44  ;;  %v686_v44 = vrot.slane %v5172_v38, 4  ;;  %v473_v38 = vrot.slane %v6231_v27, 4 }
 0x199   :  { %v1851_v42 = vsel %vm662_vm0, %v1850_v47, %v1843_v7  ;;  %v1872_v37 = vrot.slane %v468_v40, 4  ;;  %3270 = vmax.xlane.f32.xlu0 %v3269_v28  ;;  %v464_v48 = vpop.permute.xlu0 %463  ;;  %v6301_v7 = vperm.slane %v2271_v39, %v5154_v32  ;;  %v2321_v47 = vsel %vm662_vm0, %v468_v40, %v461_v46 }
 0x19a   :  { %v6295_v58 = vperm.slane %v1851_v42, %v5154_v32  ;;  %v1866_v8 = vrot.slane %v464_v48, 4  ;;  %v2315_v11 = vsel %vm662_vm0, %v464_v48, %v457_v36  ;;  %v6303_v51 = vld.sshfl [vmem:[#allocation1] sm:$0xff pattern:$0x75316420]  ;;  %v714_v28 = vrot.slane %v5209_v1, 4  ;;  %v6326_v48 = vpop.permute.xlu2 %495 }
 0x19b   :  { %v1873_v59 = vsel %vm662_vm0, %v1872_v37, %v6193_v45  ;;  %2801 = vst [vmem:[#allocation1] ss:$2 sm:$0xff] %v6291_v57  ;;  %v6312_v36 = vperm.slane %v2315_v11, %v5128_v10  ;;  %v2074_v39 = vrot.slane %v5971_v13, 4  ;;  %v3275_v40 = vsel %vm3229_vm1, %v6122_v52, -inf }
 0x19c   :  { %v1877_v49 = vperm.slane %v1873_v59, %v5128_v10  ;;  %v1867_v45 = vsel %vm662_vm0, %v1866_v8, %v456_v0  ;;  %2802 = vst [vmem:[#allocation1 + $0x1] ss:$2 sm:$0xff] %v6301_v7  ;;  %v6322_v1 = vperm.slane %v2321_v47, %v5128_v10  ;;  %v3281_v13 = vsel %vm3229_vm1, %v2774_v6, -inf }
 0x19d   :  { %v1871_v37 = vperm.slane %v1867_v45, %v5128_v10  ;;  %2779 = vst [vmem:[#allocation1 + $0x10] ss:$2 sm:$0xff] %v6295_v58  ;;  %v2328_v0 = vrot.slane %v6312_v36, 4  ;;  %v1900_v8 = vrot.slane %v6274_v5, 4  ;;  %v3278_v11 = vsel %vm3229_vm1, %v6195_v61, -inf }
 0x19e   :  { %v1878_v42 = vrot.slane %v1877_v49, 4  ;;  %v2775_v61 = vld.sshfl [vmem:[#allocation1 + $0x20] sm:$0xff pattern:$0x75316420] }
 0x19f   :  { %3276 = vmax.xlane.f32.xlu2 %v3275_v40  ;;  %v1880_v59 = vrot.slane %v1871_v37, 4  ;;  %v6337_v45 = vsel %vm662_vm0, %v6322_v1, %v2328_v0 }
 0x1a0   :  { %v1879_v46 = vsel %vm662_vm0, %v1878_v42, %v1871_v37  ;;  %v480_v52 = vpop.permute.xlu1 %479  ;;  %3282 = vmax.xlane.f32.xlu1 %v3281_v13  ;;  %8440 = vst [vmem:[#allocation87_spill] sm:$0xff] %v6337_v45  ;;  %v2102_v42 = vrot.slane %v6015_v43, 4  ;;  %v687_v45 = vsel %vm662_vm0, 0.0, %v686_v44 }
 0x1a1   :  { %v6333_v47 = vperm.slane %v1879_v46, %v5154_v32  ;;  %v1894_v6 = vrot.slane %v480_v52, 4  ;;  %v2343_v40 = vsel %vm662_vm0, %v480_v52, %v473_v38  ;;  %v476_v4 = vpop.permute.xlu0 %475  ;;  %3279 = vmax.xlane.f32.xlu0 %v3278_v11  ;;  %v6342_v37 = vsel %vm662_vm0, %v1877_v49, %v1880_v59  ;;  %v2776_v59 = vld.sshfl [vmem:[#allocation1 + $0x30] sm:$0xff pattern:$0x75316420] }
 0x1a2   :  { %v6345_v13 = vperm.slane %v2343_v40, %v5128_v10  ;;  %v477_v46 = vrot.slane %v476_v4, 4  ;;  %v715_v38 = vsel %vm662_vm0, 0.0, %v714_v28  ;;  %v2075_v49 = vsel %vm662_vm0, %v2074_v39, %v5962_v56 }
 0x1a3   :  { %2780 = vst [vmem:[#allocation1 + $0x11] ss:$2 sm:$0xff] %v6333_v47  ;;  %v1895_v0 = vsel %vm662_vm0, %v1894_v6, %v6231_v27  ;;  %v6356_v11 = vld.sshfl [vmem:[#allocation1] sm:$0xff pattern:$0x75316420]  ;;  %v1901_v40 = vsel %vm662_vm0, %v1900_v8, %v476_v4  ;;  %v2103_v56 = vsel %vm662_vm0, %v2102_v42, %v5994_v12  ;;  %v3290_v4 = vsel %vm3229_vm1, %v6260_v55, -inf  ;;  %v6382_v55 = vpop.permute.xlu2 %507 }
 0x1a4   :  { %v1899_v52 = vperm.slane %v1895_v0, %v5128_v10  ;;  %v2356_v43 = vrot.slane %v6345_v13, 4  ;;  %v2349_v27 = vsel %vm662_vm0, %v6274_v5, %v477_v46  ;;  %2813 = vst [vmem:[#allocation1] ss:$2 sm:$0xff] %v687_v45  ;;  %v1905_v44 = vperm.slane %v1901_v40, %v5128_v10 }
 0x1a5   :  { %v6363_v28 = vperm.slane %v2349_v27, %v5128_v10  ;;  %v3284_v0 = vsel %vm3229_vm1, %v2775_v61, -inf  ;;  %2814 = vst [vmem:[#allocation1 + $0x1] ss:$2 sm:$0xff] %v715_v38  ;;  %v3287_v46 = vsel %vm3229_vm1, %v2776_v59, -inf  ;;  %v910_v61 = vrot.slane %v5469_v2, 4 }
 0x1a6   :  { %v1908_v6 = vrot.slane %v1899_v52, 4  ;;  %v1906_v39 = vrot.slane %v1905_v44, 4  ;;  %v6380_v12 = vperm.slane %v2075_v49, %v5154_v32  ;;  %v6385_v38 = vperm.slane %v2103_v56, %v5154_v32 }
 0x1a7   :  { %3285 = vmax.xlane.f32.xlu2 %v3284_v0  ;;  %v6375_v8 = vsel %vm662_vm0, %v6363_v28, %v2356_v43  ;;  %v1922_v27 = vrot.slane %v6326_v48, 4  ;;  %v938_v59 = vrot.slane %v5507_v34, 4  ;;  %v2298_v2 = vrot.slane %v6264_v54, 4 }
 0x1a8   :  { %v6371_v5 = vsel %vm662_vm0, %v1905_v44, %v1908_v6  ;;  %8441 = vst [vmem:[#allocation88_spill] sm:$0xff] %v6375_v8  ;;  %v492_v45 = vpop.permute.xlu1 %491  ;;  %3291 = vmax.xlane.f32.xlu1 %v3290_v4  ;;  %v1907_v43 = vsel %vm662_vm0, %v1906_v39, %v1899_v52  ;;  %v2326_v44 = vrot.slane %v6322_v1, 4  ;;  %v911_v52 = vsel %vm662_vm0, 0.0, %v910_v61 }
 0x1a9   :  { %v488_v42 = vpop.permute.xlu0 %487  ;;  %3288 = vmax.xlane.f32.xlu0 %v3287_v46  ;;  %v6393_v49 = vperm.slane %v1907_v43, %v5154_v32  ;;  %v939_v4 = vsel %vm662_vm0, 0.0, %v938_v59  ;;  %v2299_v1 = vsel %vm662_vm0, %v2298_v2, %v6243_v16  ;;  %v493_v46 = vrot.slane %v492_v45, 4 }
 0x1aa   :  { %v2786_v40 = vld.sshfl [vmem:[#allocation1 + $0x10] sm:$0xff pattern:$0x75316420]  ;;  %v489_v6 = vrot.slane %v488_v42, 4  ;;  %v1923_v34 = vsel %vm662_vm0, %v1922_v27, %v488_v42  ;;  %v1134_v16 = vrot.slane %v5536_v35, 4 }
 0x1ab   :  { %2791 = vst [vmem:[#allocation1 + $0x10] ss:$2 sm:$0xff] %v6380_v12  ;;  %v3293_v54 = vsel %vm3229_vm1, %v2786_v40, -inf  ;;  %v1927_v42 = vperm.slane %v1923_v34, %v5128_v10  ;;  %v6415_v40 = vperm.slane %v2299_v1, %v5154_v32  ;;  %v3302_v1 = vsel %vm3229_vm1, %v6303_v51, -inf }
 0x1ac   :  { %2792 = vst [vmem:[#allocation1 + $0x11] ss:$2 sm:$0xff] %v6385_v38  ;;  %v2371_v0 = vsel %vm662_vm0, %v6326_v48, %v489_v6  ;;  %v6401_v56 = vld.sshfl [vmem:[#allocation1] sm:$0xff pattern:$0x75316420]  ;;  %v2327_v48 = vsel %vm662_vm0, %v2326_v44, %v6312_v36  ;;  %v1386_v51 = vrot.slane %v5584_v22, 4 }
 0x1ad   :  { %2781 = vst [vmem:[#allocation1 + $0x20] ss:$2 sm:$0xff] %v6393_v49  ;;  %v6409_v39 = vperm.slane %v2371_v0, %v5128_v10  ;;  %v6420_v59 = vperm.slane %v2327_v48, %v5154_v32  ;;  %v6428_v0 = vpop.permute.xlu2 %519  ;;  %v1936_v35 = vrot.slane %v1927_v42, 4  ;;  %v1135_v48 = vsel %vm662_vm0, 0.0, %v1134_v16 }
 0x1ae   :  { %2825 = vst [vmem:[#allocation1] ss:$2 sm:$0xff] %v911_v52  ;;  %v1162_v52 = vrot.slane %v5540_v60, 4 }
 0x1af   :  { %3294 = vmax.xlane.f32.xlu2 %v3293_v54  ;;  %2826 = vst [vmem:[#allocation1 + $0x1] ss:$2 sm:$0xff] %v939_v4  ;;  %v2384_v36 = vrot.slane %v6409_v39, 4 }
 0x1b0   :  { %v504_v61 = vpop.permute.xlu1 %503 }
 0x1b1   :  { %v500_v43 = vpop.permute.xlu0 %499  ;;  %v505_v16 = vrot.slane %v504_v61, 4 }
 0x1b2   :  { %v1928_v27 = vrot.slane %v500_v43, 4  ;;  %v2377_v6 = vsel %vm662_vm0, %v500_v43, %v493_v46 }
 0x1b3   :  { %v6422_v2 = vld.sshfl [vmem:[#allocation1 + $0x10] sm:$0xff pattern:$0x75316420]  ;;  %v6426_v44 = vperm.slane %v2377_v6, %v5128_v10  ;;  %v770_v6 = vrot.slane %v5279_v50, 4 }
 0x1b4   :  { %2803 = vst [vmem:[#allocation1 + $0x10] ss:$2 sm:$0xff] %v6415_v40  ;;  %v1929_v34 = vsel %vm662_vm0, %v1928_v27, %v492_v45  ;;  %v1163_v45 = vsel %vm662_vm0, 0.0, %v1162_v52  ;;  %v742_v27 = vrot.slane %v5244_v24, 4 }
 0x1b5   :  { %2804 = vst [vmem:[#allocation1 + $0x11] ss:$2 sm:$0xff] %v6420_v59  ;;  %v1933_v54 = vperm.slane %v1929_v34, %v5128_v10  ;;  %v6437_v4 = vsel %vm662_vm0, %v6426_v44, %v2384_v36  ;;  %v1358_v36 = vrot.slane %v5574_v33, 4  ;;  %v771_v22 = vsel %vm662_vm0, 0.0, %v770_v6 }
 0x1b6   :  { %8442 = vst [vmem:[#allocation89_spill] sm:$0xff] %v6437_v4  ;;  %v6442_v46 = vld.sshfl [vmem:[#allocation1] sm:$0xff pattern:$0x75316420]  ;;  %v994_v6 = vrot.slane %v5614_v14, 4 }
 0x1b7   :  { %v1934_v60 = vrot.slane %v1933_v54, 4  ;;  %v6445_v43 = vsel %vm662_vm0, %v1933_v54, %v1936_v35  ;;  %3303 = vmax.xlane.f32.xlu2 %v3302_v1  ;;  %2837 = vst [vmem:[#allocation1] ss:$2 sm:$0xff] %v1135_v48  ;;  %v509_v54 = vrot.slane %v6382_v55, 4  ;;  %v743_v1 = vsel %vm662_vm0, 0.0, %v742_v27 }
 0x1b8   :  { %8443 = vst [vmem:[#allocation90_spill] sm:$0xff] %v6445_v43  ;;  %v516_v34 = vpop.permute.xlu1 %515  ;;  %v966_v27 = vrot.slane %v5578_v63, 4 }
 0x1b9   :  { %2838 = vst [vmem:[#allocation1 + $0x1] ss:$2 sm:$0xff] %v1163_v45  ;;  %v1935_v4 = vsel %vm662_vm0, %v1934_v60, %v1927_v42  ;;  %v1956_v8 = vrot.slane %v516_v34, 4  ;;  %v512_v35 = vpop.permute.xlu0 %511  ;;  %v2405_v60 = vsel %vm662_vm0, %v516_v34, %v509_v54  ;;  %v1359_v45 = vsel %vm662_vm0, 0.0, %v1358_v36 }
 0x1ba   :  { %v6455_v52 = vperm.slane %v1935_v4, %v5154_v32  ;;  %v1950_v50 = vrot.slane %v512_v35, 4  ;;  %v2399_v33 = vsel %vm662_vm0, %v512_v35, %v505_v16  ;;  %v1387_v4 = vsel %vm662_vm0, 0.0, %v1386_v51  ;;  %v532_v16 = vpop.permute.xlu2 %531 }
 0x1bb   :  { %v1957_v24 = vsel %vm662_vm0, %v1956_v8, %v6382_v55  ;;  %v6470_v55 = vperm.slane %v2399_v33, %v5128_v10  ;;  %v2130_v34 = vrot.slane %v6044_v15, 4  ;;  %v521_v36 = vrot.slane %v6428_v0, 4 }
 0x1bc   :  { %v6462_v48 = vld.sshfl [vmem:[#allocation1 + $0x10] sm:$0xff pattern:$0x75316420]  ;;  %v1961_v42 = vperm.slane %v1957_v24, %v5128_v10  ;;  %v1951_v8 = vsel %vm662_vm0, %v1950_v50, %v504_v61  ;;  %2782 = vst [vmem:[#allocation1 + $0x21] ss:$2 sm:$0xff] %v6455_v52  ;;  %v6479_v61 = vperm.slane %v2405_v60, %v5128_v10  ;;  %v2158_v54 = vrot.slane %v6077_v29, 4 }
 0x1bd   :  { %2815 = vst [vmem:[#allocation1 + $0x10] ss:$2 sm:$0xff] %v743_v1  ;;  %v1955_v24 = vperm.slane %v1951_v8, %v5128_v10  ;;  %v2412_v51 = vrot.slane %v6470_v55, 4  ;;  %v1984_v33 = vrot.slane %v532_v16, 4 }
 0x1be   :  { %2816 = vst [vmem:[#allocation1 + $0x11] ss:$2 sm:$0xff] %v771_v22  ;;  %v1962_v35 = vrot.slane %v1961_v42, 4 }
 0x1bf   :  { %v1964_v50 = vrot.slane %v1955_v24, 4  ;;  %v6491_v22 = vsel %vm662_vm0, %v6479_v61, %v2412_v51 }
 0x1c0   :  { %v6483_v63 = vld.sshfl [vmem:[#allocation1] sm:$0xff pattern:$0x75316420]  ;;  %v1963_v14 = vsel %vm662_vm0, %v1962_v35, %v1955_v24  ;;  %v528_v1 = vpop.permute.xlu1 %527 }
 0x1c1   :  { %2849 = vst [vmem:[#allocation1] ss:$2 sm:$0xff] %v1359_v45  ;;  %v6487_v15 = vperm.slane %v1963_v14, %v5154_v32  ;;  %v1978_v60 = vrot.slane %v528_v1, 4  ;;  %v2427_v8 = vsel %vm662_vm0, %v528_v1, %v521_v36  ;;  %v524_v43 = vpop.permute.xlu0 %523  ;;  %v6495_v29 = vsel %vm662_vm0, %v1961_v42, %v1964_v50 }
 0x1c2   :  { %2850 = vst [vmem:[#allocation1 + $0x1] ss:$2 sm:$0xff] %v1387_v4  ;;  %v6498_v35 = vperm.slane %v2427_v8, %v5128_v10  ;;  %v2131_v45 = vsel %vm662_vm0, %v2130_v34, %v6035_v53  ;;  %v525_v51 = vrot.slane %v524_v43, 4  ;;  %v1582_v14 = vrot.slane %v5879_v20, 4 }
 0x1c3   :  { %2783 = vst [vmem:[#allocation1 + $0x30] ss:$2 sm:$0xff] %v6487_v15  ;;  %v1979_v24 = vsel %vm662_vm0, %v1978_v60, %v6428_v0  ;;  %v2159_v4 = vsel %vm662_vm0, %v2158_v54, %v6072_v9  ;;  %v967_v50 = vsel %vm662_vm0, 0.0, %v966_v27  ;;  %v995_v1 = vsel %vm662_vm0, 0.0, %v994_v6 }
 0x1c4   :  { %v1983_v42 = vperm.slane %v1979_v24, %v5128_v10  ;;  %v2440_v36 = vrot.slane %v6498_v35, 4  ;;  %v1985_v34 = vsel %vm662_vm0, %v1984_v33, %v524_v43  ;;  %v2433_v0 = vsel %vm662_vm0, %v532_v16, %v525_v51  ;;  %v2787_v9 = vld.sshfl [vmem:[#allocation1 + $0x20] sm:$0xff pattern:$0x75316420] }
 0x1c5   :  { %v6512_v53 = vld.sshfl [vmem:[#allocation1 + $0x10] sm:$0xff pattern:$0x75316420]  ;;  %v1610_v60 = vrot.slane %v5952_v19, 4  ;;  %v6518_v20 = vperm.slane %v2131_v45, %v5154_v32  ;;  %v1989_v54 = vperm.slane %v1985_v34, %v5128_v10  ;;  %v6522_v8 = vperm.slane %v2433_v0, %v5128_v10 }
 0x1c6   :  { %2827 = vst [vmem:[#allocation1 + $0x10] ss:$2 sm:$0xff] %v967_v50  ;;  %v6525_v27 = vperm.slane %v2159_v4, %v5154_v32  ;;  %v1992_v6 = vrot.slane %v1983_v42, 4  ;;  %v3296_v43 = vsel %vm3229_vm1, %v2787_v9, -inf  ;;  %v1583_v16 = vsel %vm662_vm0, 0.0, %v1582_v14  ;;  %v8445_v0 = vld [vmem:[#allocation78_spill] sm:$0xff] }
 0x1c7   :  { %2828 = vst [vmem:[#allocation1 + $0x11] ss:$2 sm:$0xff] %v995_v1  ;;  %v2354_v19 = vrot.slane %v6363_v28, 4  ;;  %v1990_v33 = vrot.slane %v1989_v54, 4  ;;  %v6533_v45 = vsel %vm662_vm0, %v6522_v8, %v2440_v36  ;;  %3297 = vmax.xlane.f32.xlu0 %v3296_v43  ;;  %v2382_v51 = vrot.slane %v6426_v44, 4  ;;  %v8444_v1 = vld [vmem:[#allocation40_spill] sm:$0xff] }
 0x1c8   :  { %2793 = vst [vmem:[#allocation1 + $0x20] ss:$2 sm:$0xff] %v6518_v20  ;;  %v6540_v4 = vsel %vm662_vm0, %v1989_v54, %v1992_v6  ;;  %v1190_v14 = vrot.slane %v5660_v62, 4  ;;  %v1611_v28 = vsel %vm662_vm0, 0.0, %v1610_v60  ;;  %v1218_v36 = vrot.slane %v8444_v1, 4 }
 0x1c9   :  { %v6535_v24 = vld.sshfl [vmem:[#allocation1] sm:$0xff pattern:$0x75316420]  ;;  %2794 = vst [vmem:[#allocation1 + $0x21] ss:$2 sm:$0xff] %v6525_v27  ;;  %v1991_v50 = vsel %vm662_vm0, %v1990_v33, %v1983_v42  ;;  %v2186_v44 = vrot.slane %v8445_v0, 4  ;;  %v2355_v9 = vsel %vm662_vm0, %v2354_v19, %v6345_v13  ;;  %v2383_v62 = vsel %vm662_vm0, %v2382_v51, %v6409_v39 }
 0x1ca   :  { %2861 = vst [vmem:[#allocation1] ss:$2 sm:$0xff] %v1583_v16  ;;  %v6547_v34 = vperm.slane %v1991_v50, %v5154_v32  ;;  %v2214_v54 = vrot.slane %v6137_v41, 4  ;;  %v1191_v42 = vsel %vm662_vm0, 0.0, %v1190_v14  ;;  %v1806_v60 = vrot.slane %v6186_v31, 4  ;;  %v8446_v39 = vld [vmem:[#allocation77_spill] sm:$0xff] }
 0x1cb   :  { %2862 = vst [vmem:[#allocation1 + $0x1] ss:$2 sm:$0xff] %v1611_v28  ;;  %v1219_v43 = vsel %vm662_vm0, 0.0, %v1218_v36  ;;  %v1834_v16 = vrot.slane %v6224_v30, 4  ;;  %v6563_v13 = vperm.slane %v2355_v9, %v5154_v32  ;;  %v3305_v41 = vsel %vm3229_vm1, %v6422_v2, -inf  ;;  %v8447_v2 = vld [vmem:[#allocation42_spill] sm:$0xff] }
 0x1cc   :  { %2784 = vst [vmem:[#allocation1 + $0x31] ss:$2 sm:$0xff] %v6547_v34  ;;  %v2187_v19 = vsel %vm662_vm0, %v2186_v44, %v8446_v39  ;;  %v6570_v33 = vperm.slane %v2383_v62, %v5154_v32  ;;  %v2215_v51 = vsel %vm662_vm0, %v2214_v54, %v6131_v17  ;;  %v1807_v30 = vsel %vm662_vm0, 0.0, %v1806_v60  ;;  %v8448_v36 = vld [vmem:[#allocation43_spill] sm:$0xff]  ;;  %v8449_v9 = vld [vmem:[#allocation20_spill] sm:$0xff]  ;;  %v8450_v60 = vld [vmem:[#allocation21_spill] sm:$0xff] }
 0x1cd   :  { %v1414_v28 = vrot.slane %v8447_v2, 4  ;;  %v6581_v50 = vperm.slane %v2187_v19, %v5154_v32  ;;  %v1835_v1 = vsel %vm662_vm0, 0.0, %v1834_v16  ;;  %v1442_v0 = vrot.slane %v8448_v36, 4 }
 0x1ce   :  { %v6558_v6 = vld.sshfl [vmem:[#allocation1 + $0x10] sm:$0xff pattern:$0x75316420]  ;;  %v6586_v17 = vperm.slane %v2215_v51, %v5154_v32  ;;  %v798_v54 = vrot.slane %v8449_v9, 4  ;;  %v2410_v62 = vrot.slane %v6479_v61, 4  ;;  %v2438_v16 = vrot.slane %v6522_v8, 4 }
 0x1cf   :  { %2839 = vst [vmem:[#allocation1 + $0x10] ss:$2 sm:$0xff] %v1191_v42  ;;  %3306 = vmax.xlane.f32.xlu0 %v3305_v41  ;;  %v1415_v41 = vsel %vm662_vm0, 0.0, %v1414_v28  ;;  %v2030_v39 = vrot.slane %v6253_v23, 4  ;;  %v3314_v61 = vsel %vm3229_vm1, %v6356_v11, -inf  ;;  %v1443_v51 = vsel %vm662_vm0, 0.0, %v1442_v0 }
 0x1d0   :  { %2840 = vst [vmem:[#allocation1 + $0x11] ss:$2 sm:$0xff] %v1219_v43  ;;  %v2799_v31 = vld.sshfl [vmem:[#allocation1 + $0x20] sm:$0xff pattern:$0x75316420]  ;;  %v826_v43 = vrot.slane %v8450_v60, 4  ;;  %v2411_v28 = vsel %vm662_vm0, %v2410_v62, %v6470_v55 }
 0x1d1   :  { %2805 = vst [vmem:[#allocation1 + $0x20] ss:$2 sm:$0xff] %v6563_v13  ;;  %v799_v8 = vsel %vm662_vm0, 0.0, %v798_v54  ;;  %v2031_v11 = vsel %vm662_vm0, 0.0, %v2030_v39  ;;  %v8451_v0 = vld [vmem:[#allocation65_spill] sm:$0xff]  ;;  %v6616_v55 = vperm.slane %v2411_v28, %v5154_v32 }
 0x1d2   :  { %v6576_v14 = vld.sshfl [vmem:[#allocation1] sm:$0xff pattern:$0x75316420]  ;;  %2806 = vst [vmem:[#allocation1 + $0x21] ss:$2 sm:$0xff] %v6570_v33  ;;  %v827_v23 = vsel %vm662_vm0, 0.0, %v826_v43 }
 0x1d3   :  { %2873 = vst [vmem:[#allocation1] ss:$2 sm:$0xff] %v1807_v30  ;;  %v2788_v44 = vld.sshfl [vmem:[#allocation1 + $0x30] sm:$0xff pattern:$0x75316420]  ;;  %v2058_v30 = vrot.slane %v6257_v26, 4 }
 0x1d4   :  { %2874 = vst [vmem:[#allocation1 + $0x1] ss:$2 sm:$0xff] %v1835_v1  ;;  %v3299_v42 = vsel %vm3229_vm1, %v2788_v44, -inf  ;;  %v2439_v1 = vsel %vm662_vm0, %v2438_v16, %v6498_v35  ;;  %v1638_v44 = vrot.slane %v8451_v0, 4  ;;  %v8452_v9 = vld [vmem:[#allocation69_spill] sm:$0xff] }
 0x1d5   :  { %2795 = vst [vmem:[#allocation1 + $0x30] ss:$2 sm:$0xff] %v6581_v50  ;;  %3300 = vmax.xlane.f32.xlu1 %v3299_v42  ;;  %v2059_v26 = vsel %vm662_vm0, 0.0, %v2058_v30  ;;  %v1666_v54 = vrot.slane %v8452_v9, 4  ;;  %v6619_v62 = vperm.slane %v2439_v1, %v5154_v32  ;;  %v3308_v42 = vsel %vm3229_vm1, %v2799_v31, -inf  ;;  %v8453_v60 = vld [vmem:[#allocation41_spill] sm:$0xff] }
 0x1d6   :  { %2796 = vst [vmem:[#allocation1 + $0x31] ss:$2 sm:$0xff] %v6586_v17  ;;  %v1022_v43 = vrot.slane %v8453_v60, 4  ;;  %v1639_v30 = vsel %vm662_vm0, 0.0, %v1638_v44  ;;  %v8456_v0 = vld [vmem:[#allocation29_spill] sm:$0xff]  ;;  %v3317_v60 = vsel %vm3229_vm1, %v6462_v48, -inf }
 0x1d7   :  { %v6597_v19 = vld.sshfl [vmem:[#allocation1 + $0x10] sm:$0xff pattern:$0x75316420]  ;;  %3315 = vmax.xlane.f32.xlu0 %v3314_v61  ;;  %v1667_v31 = vsel %vm662_vm0, 0.0, %v1666_v54  ;;  %v882_v9 = vrot.slane %v8456_v0, 4 }
 0x1d8   :  { %2851 = vst [vmem:[#allocation1 + $0x10] ss:$2 sm:$0xff] %v1415_v41  ;;  %v8454_v41 = vld [vmem:[#allocation26_spill] sm:$0xff]  ;;  %v1023_v1 = vsel %vm662_vm0, 0.0, %v1022_v43 }
 0x1d9   :  { %2852 = vst [vmem:[#allocation1 + $0x11] ss:$2 sm:$0xff] %v1443_v51  ;;  %v2811_v2 = vld.sshfl [vmem:[#allocation1 + $0x20] sm:$0xff pattern:$0x75316420]  ;;  %v854_v39 = vrot.slane %v8454_v41, 4 }
 0x1da   :  { %2817 = vst [vmem:[#allocation1 + $0x20] ss:$2 sm:$0xff] %v799_v8  ;;  %v8455_v61 = vld [vmem:[#allocation46_spill] sm:$0xff]  ;;  %v2254_v8 = vrot.slane %v6291_v57, 4 }
 0x1db   :  { %v6610_v36 = vld.sshfl [vmem:[#allocation1] sm:$0xff pattern:$0x75316420]  ;;  %2818 = vst [vmem:[#allocation1 + $0x21] ss:$2 sm:$0xff] %v827_v23  ;;  %v1050_v51 = vrot.slane %v8455_v61, 4 }
 0x1dc   :  { %2885 = vst [vmem:[#allocation1] ss:$2 sm:$0xff] %v2031_v11  ;;  %v2282_v23 = vrot.slane %v6301_v7, 4  ;;  %v2255_v57 = vsel %vm662_vm0, 0.0, %v2254_v8  ;;  %v1862_v7 = vrot.slane %v6295_v58, 4  ;;  %v8457_v41 = vld [vmem:[#allocation50_spill] sm:$0xff] }
 0x1dd   :  { %2886 = vst [vmem:[#allocation1 + $0x1] ss:$2 sm:$0xff] %v2059_v26  ;;  %v2800_v35 = vld.sshfl [vmem:[#allocation1 + $0x30] sm:$0xff pattern:$0x75316420]  ;;  %3309 = vmax.xlane.f32.xlu1 %v3308_v42  ;;  %v855_v26 = vsel %vm662_vm0, 0.0, %v854_v39 }
 0x1de   :  { %2807 = vst [vmem:[#allocation1 + $0x30] ss:$2 sm:$0xff] %v6616_v55  ;;  %v3311_v16 = vsel %vm3229_vm1, %v2800_v35, -inf  ;;  %v1051_v35 = vsel %vm662_vm0, 0.0, %v1050_v51  ;;  %v2283_v54 = vsel %vm662_vm0, 0.0, %v2282_v23  ;;  %v1890_v42 = vrot.slane %v6333_v47, 4 }
 0x1df   :  { %2808 = vst [vmem:[#allocation1 + $0x31] ss:$2 sm:$0xff] %v6619_v62  ;;  %3312 = vmax.xlane.f32.xlu2 %v3311_v16  ;;  %v3320_v16 = vsel %vm3229_vm1, %v2811_v2, -inf  ;;  %v1246_v39 = vrot.slane %v8457_v41, 4  ;;  %v883_v61 = vsel %vm662_vm0, 0.0, %v882_v9  ;;  %v1863_v47 = vsel %vm662_vm0, 0.0, %v1862_v7 }
 0x1e0   :  { %v6630_v28 = vld.sshfl [vmem:[#allocation1 + $0x10] sm:$0xff pattern:$0x75316420]  ;;  %v1891_v2 = vsel %vm662_vm0, 0.0, %v1890_v42  ;;  %v2114_v41 = vrot.slane %v6385_v38, 4 }
 0x1e1   :  { %2863 = vst [vmem:[#allocation1 + $0x10] ss:$2 sm:$0xff] %v1639_v30  ;;  %v8458_v30 = vld [vmem:[#allocation51_spill] sm:$0xff]  ;;  %v1247_v23 = vsel %vm662_vm0, 0.0, %v1246_v39  ;;  %v3329_v39 = vsel %vm3229_vm1, %v6512_v53, -inf }
 0x1e2   :  { %2864 = vst [vmem:[#allocation1 + $0x11] ss:$2 sm:$0xff] %v1667_v31  ;;  %v2823_v11 = vld.sshfl [vmem:[#allocation1 + $0x20] sm:$0xff pattern:$0x75316420]  ;;  %v1274_v58 = vrot.slane %v8458_v30, 4 }
 0x1e3   :  { %2829 = vst [vmem:[#allocation1 + $0x20] ss:$2 sm:$0xff] %v1023_v1  ;;  %v8459_v8 = vld [vmem:[#allocation47_spill] sm:$0xff]  ;;  %v8463_v30 = vld [vmem:[#allocation54_spill] sm:$0xff] }
 0x1e4   :  { %v6639_v44 = vld.sshfl [vmem:[#allocation1] sm:$0xff pattern:$0x75316420]  ;;  %2830 = vst [vmem:[#allocation1 + $0x21] ss:$2 sm:$0xff] %v1051_v35  ;;  %v1078_v31 = vrot.slane %v8459_v8, 4 }
 0x1e5   :  { %2897 = vst [vmem:[#allocation1] ss:$2 sm:$0xff] %v2255_v57  ;;  %3318 = vmax.xlane.f32.xlu1 %v3317_v60  ;;  %v1275_v9 = vsel %vm662_vm0, 0.0, %v1274_v58  ;;  %v8461_v35 = vld [vmem:[#allocation55_spill] sm:$0xff]  ;;  %v3326_v60 = vsel %vm3229_vm1, %v6401_v56, -inf  ;;  %v1470_v56 = vrot.slane %v8463_v30, 4 }
 0x1e6   :  { %2898 = vst [vmem:[#allocation1 + $0x1] ss:$2 sm:$0xff] %v2283_v54  ;;  %v2812_v43 = vld.sshfl [vmem:[#allocation1 + $0x30] sm:$0xff pattern:$0x75316420]  ;;  %v1106_v57 = vrot.slane %v8461_v35, 4 }
 0x1e7   :  { %2819 = vst [vmem:[#allocation1 + $0x30] ss:$2 sm:$0xff] %v855_v26  ;;  %3321 = vmax.xlane.f32.xlu2 %v3320_v16  ;;  %v3323_v51 = vsel %vm3229_vm1, %v2812_v43, -inf  ;;  %v8460_v26 = vld [vmem:[#allocation11_spill] sm:$0xff]  ;;  %v8462_v54 = vld [vmem:[#allocation13_spill] sm:$0xff]  ;;  %v1079_v43 = vsel %vm662_vm0, 0.0, %v1078_v31 }
 0x1e8   :  { %2820 = vst [vmem:[#allocation1 + $0x31] ss:$2 sm:$0xff] %v883_v61  ;;  %3324 = vmax.xlane.f32.xlu0 %v3323_v51  ;;  %v6661_v0 = vperm.slane %v8460_v26, %v5154_v32  ;;  %v6667_v7 = vperm.slane %v8462_v54, %v5154_v32  ;;  %v2086_v16 = vrot.slane %v6380_v12, 4  ;;  %v3332_v51 = vsel %vm3229_vm1, %v2823_v11, -inf  ;;  %v8464_v12 = vld [vmem:[#allocation56_spill] sm:$0xff]  ;;  %v8465_v53 = vld [vmem:[#allocation59_spill] sm:$0xff] }
 0x1e9   :  { %v6652_v48 = vld.sshfl [vmem:[#allocation1 + $0x10] sm:$0xff pattern:$0x75316420]  ;;  %v1107_v58 = vsel %vm662_vm0, 0.0, %v1106_v57  ;;  %v1498_v38 = vrot.slane %v8464_v12, 4  ;;  %v1302_v31 = vrot.slane %v8465_v53, 4 }
 0x1ea   :  { %2875 = vst [vmem:[#allocation1 + $0x10] ss:$2 sm:$0xff] %v1863_v47  ;;  %v2087_v47 = vsel %vm662_vm0, 0.0, %v2086_v16  ;;  %v1471_v11 = vsel %vm662_vm0, 0.0, %v1470_v56  ;;  %v8466_v26 = vld [vmem:[#allocation60_spill] sm:$0xff]  ;;  %v8467_v35 = vld [vmem:[#allocation31_spill] sm:$0xff] }
 0x1eb   :  { %2876 = vst [vmem:[#allocation1 + $0x11] ss:$2 sm:$0xff] %v1891_v2  ;;  %v6657_v1 = vld.sshfl [vmem:[#allocation1 + $0x20] sm:$0xff pattern:$0x75316420]  ;;  %v2115_v2 = vsel %vm662_vm0, 0.0, %v2114_v41  ;;  %v6695_v57 = vperm.slane %v8467_v35, %v5154_v32 }
 0x1ec   :  { %2841 = vst [vmem:[#allocation1 + $0x20] ss:$2 sm:$0xff] %v1247_v23  ;;  %v1499_v54 = vsel %vm662_vm0, 0.0, %v1498_v38  ;;  %v8469_v30 = vld [vmem:[#allocation73_spill] sm:$0xff]  ;;  %v2338_v12 = vrot.slane %v6420_v59, 4 }
 0x1ed   :  { %v6669_v42 = vld.sshfl [vmem:[#allocation1] sm:$0xff pattern:$0x75316420]  ;;  %2842 = vst [vmem:[#allocation1 + $0x21] ss:$2 sm:$0xff] %v1275_v9  ;;  %3327 = vmax.xlane.f32.xlu1 %v3326_v60  ;;  %v1330_v9 = vrot.slane %v8466_v26, 4 }
 0x1ee   :  { %2909 = vst [vmem:[#allocation1] ss:$2 sm:$0xff] %v6661_v0  ;;  %v1694_v56 = vrot.slane %v8469_v30, 4  ;;  %v2339_v35 = vsel %vm662_vm0, 0.0, %v2338_v12 }
 0x1ef   :  { %2910 = vst [vmem:[#allocation1 + $0x1] ss:$2 sm:$0xff] %v6667_v7  ;;  %v2824_v61 = vld.sshfl [vmem:[#allocation1 + $0x30] sm:$0xff pattern:$0x75316420]  ;;  %3330 = vmax.xlane.f32.xlu2 %v3329_v39  ;;  %v3338_v39 = vsel %vm3229_vm1, %v6442_v46, -inf }
 0x1f0   :  { %2831 = vst [vmem:[#allocation1 + $0x30] ss:$2 sm:$0xff] %v1079_v43  ;;  %3333 = vmax.xlane.f32.xlu0 %v3332_v51  ;;  %v3335_v60 = vsel %vm3229_vm1, %v2824_v61, -inf  ;;  %v8468_v43 = vld [vmem:[#allocation32_spill] sm:$0xff]  ;;  %v1303_v51 = vsel %vm662_vm0, 0.0, %v1302_v31  ;;  %v3341_v61 = vsel %vm3229_vm1, %v6558_v6, -inf  ;;  %v6717_v31 = vpop.xlane.xlu2 %3237  ;;  %v6722_v6 = vpop.xlane.xlu0 %3231 }
 0x1f1   :  { %2832 = vst [vmem:[#allocation1 + $0x31] ss:$2 sm:$0xff] %v1107_v58  ;;  %v6701_v16 = vperm.slane %v8468_v43, %v5154_v32  ;;  %v2310_v58 = vrot.slane %v6415_v40, 4  ;;  %v1331_v46 = vsel %vm662_vm0, 0.0, %v1330_v9  ;;  %v1695_v59 = vsel %vm662_vm0, 0.0, %v1694_v56 }
 0x1f2   :  { %v6685_v8 = vld.sshfl [vmem:[#allocation1 + $0x10] sm:$0xff pattern:$0x75316420]  ;;  %8471 = vst [vmem:[#allocation40_spill] sm:$0xff] %v6717_v31  ;;  %v8509_v31 = vld [vmem:[#allocation68_spill] sm:$0xff] }
 0x1f3   :  { %2887 = vst [vmem:[#allocation1 + $0x10] ss:$2 sm:$0xff] %v2087_v47  ;;  %v8470_v47 = vld [vmem:[#allocation74_spill] sm:$0xff]  ;;  %v2311_v40 = vsel %vm662_vm0, 0.0, %v2310_v58  ;;  %v8476_v58 = vld [vmem:[#allocation12_spill] sm:$0xff] }
 0x1f4   :  { %2888 = vst [vmem:[#allocation1 + $0x11] ss:$2 sm:$0xff] %v2115_v2  ;;  %v6690_v23 = vld.sshfl [vmem:[#allocation1 + $0x20] sm:$0xff pattern:$0x75316420]  ;;  %v1722_v53 = vrot.slane %v8470_v47, 4 }
 0x1f5   :  { %2853 = vst [vmem:[#allocation1 + $0x20] ss:$2 sm:$0xff] %v1471_v11  ;;  %3336 = vmax.xlane.f32.xlu1 %v3335_v60  ;;  %v8473_v11 = vld [vmem:[#allocation62_spill] sm:$0xff]  ;;  %v1918_v47 = vrot.slane %v6393_v49, 4 }
 0x1f6   :  { %v6703_v41 = vld.sshfl [vmem:[#allocation1] sm:$0xff pattern:$0x75316420]  ;;  %2854 = vst [vmem:[#allocation1 + $0x21] ss:$2 sm:$0xff] %v1499_v54  ;;  %v1526_v26 = vrot.slane %v8473_v11, 4 }
 0x1f7   :  { %2921 = vst [vmem:[#allocation1] ss:$2 sm:$0xff] %v6695_v57  ;;  %3339 = vmax.xlane.f32.xlu2 %v3338_v39  ;;  %v3344_v54 = vsel %vm3229_vm1, %v6657_v1, -inf  ;;  %v8474_v60 = vld [vmem:[#allocation10_spill] sm:$0xff]  ;;  %v8475_v39 = vld [vmem:[#allocation64_spill] sm:$0xff]  ;;  %v1723_v30 = vsel %vm662_vm0, 0.0, %v1722_v53 }
 0x1f8   :  { %2922 = vst [vmem:[#allocation1 + $0x1] ss:$2 sm:$0xff] %v6701_v16  ;;  %v2836_v38 = vld.sshfl [vmem:[#allocation1 + $0x30] sm:$0xff pattern:$0x75316420]  ;;  %3342 = vmax.xlane.f32.xlu0 %v3341_v61  ;;  %v6733_v43 = vperm.slane %v8474_v60, %v5154_v32  ;;  %v6740_v61 = vperm.slane %v8476_v58, %v5154_v32  ;;  %v3350_v1 = vsel %vm3229_vm1, %v6483_v63, -inf  ;;  %v6762_v49 = vpop.xlane.xlu2 %3240 }
 0x1f9   :  { %2843 = vst [vmem:[#allocation1 + $0x30] ss:$2 sm:$0xff] %v1303_v51  ;;  %v1554_v51 = vrot.slane %v8475_v39, 4  ;;  %v3347_v56 = vsel %vm3229_vm1, %v2836_v38, -inf  ;;  %v1946_v63 = vrot.slane %v6455_v52, 4  ;;  %v1919_v39 = vsel %vm662_vm0, 0.0, %v1918_v47 }
 0x1fa   :  { %2844 = vst [vmem:[#allocation1 + $0x31] ss:$2 sm:$0xff] %v1331_v46  ;;  %v1527_v46 = vsel %vm662_vm0, 0.0, %v1526_v26  ;;  %v8478_v26 = vld [vmem:[#allocation16_spill] sm:$0xff]  ;;  %v3353_v52 = vsel %vm3229_vm1, %v6597_v19, -inf  ;;  %v3356_v58 = vsel %vm3229_vm1, %v6690_v23, -inf }
 0x1fb   :  { %v6720_v2 = vld.sshfl [vmem:[#allocation1 + $0x10] sm:$0xff pattern:$0x75316420]  ;;  %8472 = vst [vmem:[#allocation78_spill] sm:$0xff] %v6722_v6  ;;  %v1555_v38 = vsel %vm662_vm0, 0.0, %v1554_v51  ;;  %v6767_v51 = vpop.xlane.xlu1 %3234  ;;  %v8484_v47 = vld [vmem:[#allocation84_spill] sm:$0xff] }
 0x1fc   :  { %2899 = vst [vmem:[#allocation1 + $0x10] ss:$2 sm:$0xff] %v2311_v40  ;;  %v8477_v40 = vld [vmem:[#allocation15_spill] sm:$0xff]  ;;  %v2142_v23 = vrot.slane %v6518_v20, 4 }
 0x1fd   :  { %2900 = vst [vmem:[#allocation1 + $0x11] ss:$2 sm:$0xff] %v2339_v35  ;;  %v6727_v9 = vld.sshfl [vmem:[#allocation1 + $0x20] sm:$0xff pattern:$0x75316420]  ;;  %3345 = vmax.xlane.f32.xlu1 %v3344_v54  ;;  %v6753_v11 = vperm.slane %v8477_v40, %v5154_v32  ;;  %v1947_v40 = vsel %vm662_vm0, 0.0, %v1946_v63 }
 0x1fe   :  { %2865 = vst [vmem:[#allocation1 + $0x20] ss:$2 sm:$0xff] %v1695_v59  ;;  %v6758_v59 = vperm.slane %v8478_v26, %v5154_v32  ;;  %v8480_v54 = vld [vmem:[#allocation81_spill] sm:$0xff] }
 0x1ff   :  { %2866 = vst [vmem:[#allocation1 + $0x21] ss:$2 sm:$0xff] %v1723_v30  ;;  %3348 = vmax.xlane.f32.xlu2 %v3347_v56  ;;  %v6744_v12 = vld.sshfl [vmem:[#allocation1] sm:$0xff pattern:$0x75316420]  ;;  %v1750_v60 = vrot.slane %v8480_v54, 4  ;;  %v6769_v30 = vpop.xlane.xlu0 %3243 }
 0x200   :  { %3351 = vmax.xlane.f32.xlu0 %v3350_v1  ;;  %2933 = vst [vmem:[#allocation1] ss:$2 sm:$0xff] %v6733_v43  ;;  %v8483_v1 = vld [vmem:[#allocation30_spill] sm:$0xff]  ;;  %v8485_v26 = vld [vmem:[#allocation33_spill] sm:$0xff] }
 0x201   :  { %v2848_v53 = vld.sshfl [vmem:[#allocation1 + $0x30] sm:$0xff pattern:$0x75316420]  ;;  %2934 = vst [vmem:[#allocation1 + $0x1] ss:$2 sm:$0xff] %v6740_v61  ;;  %v6787_v54 = vperm.slane %v8485_v26, %v5154_v32  ;;  %v2143_v26 = vsel %vm662_vm0, 0.0, %v2142_v23 }
 0x202   :  { %2855 = vst [vmem:[#allocation1 + $0x30] ss:$2 sm:$0xff] %v1527_v46  ;;  %v6780_v46 = vperm.slane %v8483_v1, %v5154_v32  ;;  %v3359_v19 = vsel %vm3229_vm1, %v2848_v53, -inf  ;;  %v1751_v1 = vsel %vm662_vm0, 0.0, %v1750_v60  ;;  %v8486_v53 = vld [vmem:[#allocation35_spill] sm:$0xff]  ;;  %v3362_v60 = vsel %vm3229_vm1, %v6535_v24, -inf }
 0x203   :  { %2856 = vst [vmem:[#allocation1 + $0x31] ss:$2 sm:$0xff] %v1555_v38  ;;  %v1778_v38 = vrot.slane %v8484_v47, 4  ;;  %v3368_v24 = vsel %vm3229_vm1, %v6727_v9, -inf }
 0x204   :  { %v6760_v35 = vld.sshfl [vmem:[#allocation1 + $0x10] sm:$0xff pattern:$0x75316420]  ;;  %8479 = vst [vmem:[#allocation77_spill] sm:$0xff] %v6762_v49 }
 0x205   :  { %2911 = vst [vmem:[#allocation1 + $0x10] ss:$2 sm:$0xff] %v6753_v11  ;;  %3354 = vmax.xlane.f32.xlu1 %v3353_v52  ;;  %v1779_v63 = vsel %vm662_vm0, 0.0, %v1778_v38  ;;  %v1974_v38 = vrot.slane %v6487_v15, 4  ;;  %v8491_v15 = vld [vmem:[#allocation58_spill] sm:$0xff] }
 0x206   :  { %8481 = vst [vmem:[#allocation42_spill] sm:$0xff] %v6767_v51  ;;  %v6774_v56 = vld.sshfl [vmem:[#allocation1 + $0x20] sm:$0xff pattern:$0x75316420]  ;;  %v6827_v23 = vperm.slane %v8491_v15, %v5154_v32  ;;  %v3398_v51 = vsel %vm3229_vm1, %v6639_v44, -inf  ;;  %v688_v44 = vrot.slane %v6661_v0, 4 }
 0x207   :  { %8482 = vst [vmem:[#allocation43_spill] sm:$0xff] %v6769_v30  ;;  %3357 = vmax.xlane.f32.xlu2 %v3356_v58  ;;  %v2170_v58 = vrot.slane %v6525_v27, 4  ;;  %v3365_v27 = vsel %vm3229_vm1, %v6630_v28, -inf  ;;  %v2002_v28 = vrot.slane %v6547_v34, 4  ;;  %v1975_v9 = vsel %vm662_vm0, 0.0, %v1974_v38  ;;  %v8493_v34 = vld [vmem:[#allocation14_spill] sm:$0xff] }
 0x208   :  { %2912 = vst [vmem:[#allocation1 + $0x11] ss:$2 sm:$0xff] %v6758_v59  ;;  %3360 = vmax.xlane.f32.xlu0 %v3359_v19  ;;  %v6789_v52 = vld.sshfl [vmem:[#allocation1] sm:$0xff pattern:$0x75316420] }
 0x209   :  { %2877 = vst [vmem:[#allocation1 + $0x20] ss:$2 sm:$0xff] %v1919_v39  ;;  %v6798_v39 = vperm.slane %v8486_v53, %v5154_v32  ;;  %v6819_v53 = vpop.xlane.xlu1 %3246  ;;  %v2171_v10 = vsel %vm662_vm0, 0.0, %v2170_v58  ;;  %v2366_v58 = vrot.slane %v6563_v13, 4  ;;  %v3374_v13 = vsel %vm3229_vm1, %v6576_v14, -inf }
 0x20a   :  { %2878 = vst [vmem:[#allocation1 + $0x21] ss:$2 sm:$0xff] %v1947_v40  ;;  %v2860_v47 = vld.sshfl [vmem:[#allocation1 + $0x30] sm:$0xff pattern:$0x75316420]  ;;  %v8487_v40 = vld [vmem:[#allocation37_spill] sm:$0xff] }
 0x20b   :  { %2945 = vst [vmem:[#allocation1] ss:$2 sm:$0xff] %v6780_v46  ;;  %v6803_v20 = vperm.slane %v8487_v40, %v5154_v32  ;;  %v6821_v40 = vpop.xlane.xlu0 %3252  ;;  %v3371_v15 = vsel %vm3229_vm1, %v2860_v47, -inf  ;;  %v2226_v14 = vrot.slane %v6586_v17, 4 }
 0x20c   :  { %2946 = vst [vmem:[#allocation1 + $0x1] ss:$2 sm:$0xff] %v6787_v54 }
 0x20d   :  { %2867 = vst [vmem:[#allocation1 + $0x30] ss:$2 sm:$0xff] %v1751_v1  ;;  %v6812_v1 = vpop.xlane.xlu2 %3249  ;;  %3363 = vmax.xlane.f32.xlu1 %v3362_v60  ;;  %v8492_v60 = vld [vmem:[#allocation63_spill] sm:$0xff] }
 0x20e   :  { %2868 = vst [vmem:[#allocation1 + $0x31] ss:$2 sm:$0xff] %v1779_v63  ;;  %v6833_v30 = vperm.slane %v8492_v60, %v5154_v32  ;;  %v8494_v60 = vld [vmem:[#allocation17_spill] sm:$0xff] }
 0x20f   :  { %v6805_v19 = vld.sshfl [vmem:[#allocation1 + $0x10] sm:$0xff pattern:$0x75316420]  ;;  %8488 = vst [vmem:[#allocation20_spill] sm:$0xff] %v6812_v1  ;;  %3366 = vmax.xlane.f32.xlu2 %v3365_v27  ;;  %v6850_v38 = vperm.slane %v8494_v60, %v5154_v32 }
 0x210   :  { %2923 = vst [vmem:[#allocation1 + $0x10] ss:$2 sm:$0xff] %v6798_v39  ;;  %3369 = vmax.xlane.f32.xlu0 %v3368_v24  ;;  %v6844_v24 = vperm.slane %v8493_v34, %v5154_v32 }
 0x211   :  { %2924 = vst [vmem:[#allocation1 + $0x11] ss:$2 sm:$0xff] %v6803_v20  ;;  %v6817_v63 = vld.sshfl [vmem:[#allocation1 + $0x20] sm:$0xff pattern:$0x75316420]  ;;  %v6872_v34 = vpop.xlane.xlu1 %3255 }
 0x212   :  { %8489 = vst [vmem:[#allocation21_spill] sm:$0xff] %v6819_v53 }
 0x213   :  { %8490 = vst [vmem:[#allocation65_spill] sm:$0xff] %v6821_v40  ;;  %v6835_v40 = vld.sshfl [vmem:[#allocation1] sm:$0xff pattern:$0x75316420] }
 0x214   :  { %2889 = vst [vmem:[#allocation1 + $0x20] ss:$2 sm:$0xff] %v2143_v26  ;;  %v2003_v26 = vsel %vm662_vm0, 0.0, %v2002_v28  ;;  %v2198_v28 = vrot.slane %v6581_v50, 4  ;;  %v6869_v50 = vperm.slane %v6198_v21, %v5154_v32 }
 0x215   :  { %2890 = vst [vmem:[#allocation1 + $0x21] ss:$2 sm:$0xff] %v2171_v10  ;;  %v2872_v27 = vld.sshfl [vmem:[#allocation1 + $0x30] sm:$0xff pattern:$0x75316420]  ;;  %v2394_v10 = vrot.slane %v6570_v33, 4  ;;  %3372 = vmax.xlane.f32.xlu1 %v3371_v15  ;;  %v6874_v15 = vpop.xlane.xlu0 %3261 }
 0x216   :  { %2957 = vst [vmem:[#allocation1] ss:$2 sm:$0xff] %v6827_v23  ;;  %v2367_v33 = vsel %vm662_vm0, 0.0, %v2366_v58  ;;  %v6878_v58 = vperm.slane %v6217_v18, %v5154_v32  ;;  %v2199_v17 = vsel %vm662_vm0, 0.0, %v2198_v28 }
 0x217   :  { %2958 = vst [vmem:[#allocation1 + $0x1] ss:$2 sm:$0xff] %v6833_v30  ;;  %3375 = vmax.xlane.f32.xlu2 %v3374_v13  ;;  %v3380_v13 = vsel %vm3229_vm1, %v6774_v56, -inf  ;;  %v8500_v56 = vld [vmem:[#allocation19_spill] sm:$0xff] }
 0x218   :  { %2879 = vst [vmem:[#allocation1 + $0x30] ss:$2 sm:$0xff] %v1975_v9  ;;  %v6854_v53 = vld.sshfl [vmem:[#allocation1 + $0x10] sm:$0xff pattern:$0x75316420]  ;;  %v3377_v9 = vsel %vm3229_vm1, %v6652_v48, -inf }
 0x219   :  { %2880 = vst [vmem:[#allocation1 + $0x31] ss:$2 sm:$0xff] %v2003_v26  ;;  %v6863_v26 = vpop.xlane.xlu2 %3258  ;;  %3378 = vmax.xlane.f32.xlu0 %v3377_v9  ;;  %v2395_v48 = vsel %vm662_vm0, 0.0, %v2394_v10  ;;  %v2227_v10 = vsel %vm662_vm0, 0.0, %v2226_v14  ;;  %v8498_v9 = vld [vmem:[#allocation34_spill] sm:$0xff]  ;;  %v3386_v14 = vsel %vm3229_vm1, %v6610_v36, -inf }
 0x21a   :  { %2935 = vst [vmem:[#allocation1 + $0x10] ss:$2 sm:$0xff] %v6844_v24  ;;  %v6890_v18 = vperm.slane %v8498_v9, %v5154_v32  ;;  %v2422_v9 = vrot.slane %v6616_v55, 4  ;;  %v8502_v36 = vld [vmem:[#allocation57_spill] sm:$0xff] }
 0x21b   :  { %8495 = vst [vmem:[#allocation69_spill] sm:$0xff] %v6863_v26 }
 0x21c   :  { %v6861_v47 = vld.sshfl [vmem:[#allocation1 + $0x20] sm:$0xff pattern:$0x75316420]  ;;  %2936 = vst [vmem:[#allocation1 + $0x11] ss:$2 sm:$0xff] %v6850_v38 }
 0x21d   :  { %2901 = vst [vmem:[#allocation1 + $0x20] ss:$2 sm:$0xff] %v2367_v33  ;;  %3381 = vmax.xlane.f32.xlu1 %v3380_v13  ;;  %v3383_v33 = vsel %vm3229_vm1, %v2872_v27, -inf  ;;  %v8501_v27 = vld [vmem:[#allocation23_spill] sm:$0xff] }
 0x21e   :  { %8496 = vst [vmem:[#allocation41_spill] sm:$0xff] %v6872_v34  ;;  %v6880_v60 = vld.sshfl [vmem:[#allocation1] sm:$0xff pattern:$0x75316420]  ;;  %v6929_v34 = vpop.xlane.xlu0 %3270 }
 0x21f   :  { %8497 = vst [vmem:[#allocation26_spill] sm:$0xff] %v6874_v15  ;;  %3384 = vmax.xlane.f32.xlu2 %v3383_v33  ;;  %v6903_v15 = vperm.slane %v8500_v56, %v5154_v32  ;;  %v6916_v33 = vperm.slane %v8502_v36, %v5154_v32  ;;  %v2423_v36 = vsel %vm662_vm0, 0.0, %v2422_v9 }
 0x220   :  { %2902 = vst [vmem:[#allocation1 + $0x21] ss:$2 sm:$0xff] %v2395_v48  ;;  %v2884_v21 = vld.sshfl [vmem:[#allocation1 + $0x30] sm:$0xff pattern:$0x75316420]  ;;  %v8499_v48 = vld [vmem:[#allocation36_spill] sm:$0xff] }
 0x221   :  { %2969 = vst [vmem:[#allocation1] ss:$2 sm:$0xff] %v6869_v50  ;;  %v6895_v28 = vperm.slane %v8499_v48, %v5154_v32  ;;  %3387 = vmax.xlane.f32.xlu0 %v3386_v14  ;;  %v2450_v48 = vrot.slane %v6619_v62, 4  ;;  %v6920_v55 = vpop.xlane.xlu2 %3267  ;;  %v8504_v14 = vld [vmem:[#allocation61_spill] sm:$0xff]  ;;  %v3389_v62 = vsel %vm3229_vm1, %v6685_v8, -inf  ;;  %v3395_v9 = vsel %vm3229_vm1, %v2884_v21, -inf }
 0x222   :  { %2970 = vst [vmem:[#allocation1 + $0x1] ss:$2 sm:$0xff] %v6878_v58  ;;  %v6924_v56 = vperm.slane %v8504_v14, %v5154_v32  ;;  %v6948_v8 = vperm.slane %v8509_v31, %v5154_v32  ;;  %v8512_v31 = vld [vmem:[#allocation85_spill] sm:$0xff] }
 0x223   :  { %2891 = vst [vmem:[#allocation1 + $0x30] ss:$2 sm:$0xff] %v2199_v17  ;;  %v6899_v17 = vld.sshfl [vmem:[#allocation1 + $0x10] sm:$0xff pattern:$0x75316420]  ;;  %v2451_v14 = vsel %vm662_vm0, 0.0, %v2450_v48  ;;  %v6966_v21 = vperm.slane %v8512_v31, %v5154_v32 }
 0x224   :  { %2892 = vst [vmem:[#allocation1 + $0x31] ss:$2 sm:$0xff] %v2227_v10  ;;  %v6909_v10 = vperm.slane %v8501_v27, %v5154_v32  ;;  %v6927_v27 = vpop.xlane.xlu1 %3264  ;;  %v8510_v48 = vld [vmem:[#allocation38_spill] sm:$0xff] }
 0x225   :  { %2947 = vst [vmem:[#allocation1 + $0x10] ss:$2 sm:$0xff] %v6890_v18  ;;  %3390 = vmax.xlane.f32.xlu1 %v3389_v62  ;;  %v6971_v62 = vperm.slane %v6227_v3, %v5154_v32  ;;  %v8518_v3 = vld [vmem:[#allocation28_spill] sm:$0xff] }
 0x226   :  { %2948 = vst [vmem:[#allocation1 + $0x11] ss:$2 sm:$0xff] %v6895_v28  ;;  %v6984_v31 = vpop.xlane.xlu0 %3279 }
 0x227   :  { %v6911_v13 = vld.sshfl [vmem:[#allocation1 + $0x20] sm:$0xff pattern:$0x75316420]  ;;  %8503 = vst [vmem:[#allocation46_spill] sm:$0xff] %v6920_v55 }
 0x228   :  { %2913 = vst [vmem:[#allocation1 + $0x20] ss:$2 sm:$0xff] %v6903_v15 }
 0x229   :  { %2914 = vst [vmem:[#allocation1 + $0x21] ss:$2 sm:$0xff] %v6909_v10  ;;  %v6931_v26 = vld.sshfl [vmem:[#allocation1] sm:$0xff pattern:$0x75316420]  ;;  %3396 = vmax.xlane.f32.xlu0 %v3395_v9 }
 0x22a   :  { %8505 = vst [vmem:[#allocation29_spill] sm:$0xff] %v6927_v27  ;;  %v3392_v27 = vsel %vm3229_vm1, %v6817_v63, -inf  ;;  %v8511_v63 = vld [vmem:[#allocation45_spill] sm:$0xff] }
 0x22b   :  { %8506 = vst [vmem:[#allocation50_spill] sm:$0xff] %v6929_v34  ;;  %v2896_v1 = vld.sshfl [vmem:[#allocation1 + $0x30] sm:$0xff pattern:$0x75316420]  ;;  %3393 = vmax.xlane.f32.xlu2 %v3392_v27 }
 0x22c   :  { %8507 = vst [vmem:[#allocation51_spill] sm:$0xff] %v6931_v26  ;;  %v8508_v34 = vld [vmem:[#allocation67_spill] sm:$0xff]  ;;  %v6982_v6 = vpop.xlane.xlu1 %3273  ;;  %v6991_v26 = vperm.slane %v8518_v3, %v5154_v32  ;;  %v8522_v3 = vld [vmem:[#allocation18_spill] sm:$0xff] }
 0x22d   :  { %2981 = vst [vmem:[#allocation1] ss:$2 sm:$0xff] %v6916_v33  ;;  %v6943_v55 = vperm.slane %v8508_v34, %v5154_v32  ;;  %v6950_v49 = vld.sshfl [vmem:[#allocation1 + $0x10] sm:$0xff pattern:$0x75316420]  ;;  %v6959_v34 = vperm.slane %v8511_v63, %v5154_v32  ;;  %3399 = vmax.xlane.f32.xlu1 %v3398_v51 }
 0x22e   :  { %2982 = vst [vmem:[#allocation1 + $0x1] ss:$2 sm:$0xff] %v6924_v56 }
 0x22f   :  { %2903 = vst [vmem:[#allocation1 + $0x30] ss:$2 sm:$0xff] %v2423_v36  ;;  %v6954_v36 = vperm.slane %v8510_v48, %v5154_v32  ;;  %v8515_v48 = vld [vmem:[#allocation24_spill] sm:$0xff] }
 0x230   :  { %2904 = vst [vmem:[#allocation1 + $0x31] ss:$2 sm:$0xff] %v2451_v14  ;;  %v6961_v27 = vld.sshfl [vmem:[#allocation1 + $0x20] sm:$0xff pattern:$0x75316420]  ;;  %v6974_v14 = vpop.xlane.xlu2 %3276  ;;  %v6980_v63 = vperm.slane %v8515_v48, %v5154_v32  ;;  %v3404_v48 = vsel %vm3229_vm1, %v6861_v47, -inf  ;;  %v7014_v47 = vperm.slane %v8522_v3, %v5154_v32 }
 0x231   :  { %2959 = vst [vmem:[#allocation1 + $0x10] ss:$2 sm:$0xff] %v6943_v55  ;;  %3405 = vmax.xlane.f32.xlu0 %v3404_v48 }
 0x232   :  { %2960 = vst [vmem:[#allocation1 + $0x11] ss:$2 sm:$0xff] %v6948_v8 }
 0x233   :  { %2925 = vst [vmem:[#allocation1 + $0x20] ss:$2 sm:$0xff] %v6954_v36 }
 0x234   :  { %2926 = vst [vmem:[#allocation1 + $0x21] ss:$2 sm:$0xff] %v6959_v34 }
 0x235   :  { %8513 = vst [vmem:[#allocation47_spill] sm:$0xff] %v6974_v14  ;;  %v6976_v9 = vld.sshfl [vmem:[#allocation1] sm:$0xff pattern:$0x75316420] }
 0x236   :  { %8514 = vst [vmem:[#allocation11_spill] sm:$0xff] %v6976_v9  ;;  %v3401_v9 = vsel %vm3229_vm1, %v6720_v2, -inf  ;;  %v7007_v2 = vperm.slane %v6342_v37, %v5154_v32  ;;  %v689_v37 = vsel %vm662_vm0, 0.0, %v688_v44  ;;  %v3410_v44 = vsel %vm3229_vm1, %v6669_v42, -inf }
 0x237   :  { %8516 = vst [vmem:[#allocation55_spill] sm:$0xff] %v6982_v6  ;;  %v2908_v14 = vld.sshfl [vmem:[#allocation1 + $0x30] sm:$0xff pattern:$0x75316420]  ;;  %3402 = vmax.xlane.f32.xlu2 %v3401_v9  ;;  %v716_v9 = vrot.slane %v6667_v7, 4  ;;  %v3407_v7 = vsel %vm3229_vm1, %v2896_v1, -inf }
 0x238   :  { %8517 = vst [vmem:[#allocation13_spill] sm:$0xff] %v6984_v31  ;;  %v7002_v31 = vperm.slane %v6281_v25, %v5154_v32  ;;  %v8524_v25 = vld [vmem:[#allocation22_spill] sm:$0xff]  ;;  %3408 = vmax.xlane.f32.xlu1 %v3407_v7  ;;  %v912_v42 = vrot.slane %v6695_v57, 4  ;;  %v8537_v57 = vld [vmem:[#allocation44_spill] sm:$0xff] }
 0x239   :  { %2993 = vst [vmem:[#allocation1] ss:$2 sm:$0xff] %v6966_v21  ;;  %v7009_v51 = vld.sshfl [vmem:[#allocation1 + $0x10] sm:$0xff pattern:$0x75316420]  ;;  %v7019_v0 = vperm.slane %v8524_v25, %v5154_v32  ;;  %v717_v3 = vsel %vm662_vm0, 0.0, %v716_v9 }
 0x23a   :  { %8519 = vst [vmem:[#allocation54_spill] sm:$0xff] %v6991_v26  ;;  %v8532_v9 = vld [vmem:[#allocation66_spill] sm:$0xff] }
 0x23b   :  { %2994 = vst [vmem:[#allocation1 + $0x1] ss:$2 sm:$0xff] %v6971_v62  ;;  %v7021_v6 = vld.sshfl [vmem:[#allocation1 + $0x20] sm:$0xff pattern:$0x75316420] }
 0x23c   :  { %2915 = vst [vmem:[#allocation1 + $0x30] ss:$2 sm:$0xff] %v6980_v63 }
 0x23d   :  { %8520 = vst [vmem:[#allocation56_spill] sm:$0xff] %v7002_v31 }
 0x23e   :  { %2916 = vst [vmem:[#allocation1 + $0x31] ss:$2 sm:$0xff] %v6991_v26  ;;  %v7035_v26 = vpop.xlane.xlu2 %3285 }
 0x23f   :  { %8521 = vst [vmem:[#allocation59_spill] sm:$0xff] %v7007_v2  ;;  %3411 = vmax.xlane.f32.xlu2 %v3410_v44 }
 0x240   :  { %8523 = vst [vmem:[#allocation60_spill] sm:$0xff] %v7014_v47 }
 0x241   :  { %2971 = vst [vmem:[#allocation1 + $0x10] ss:$2 sm:$0xff] %v7002_v31  ;;  %v8527_v31 = vld [vmem:[#allocation49_spill] sm:$0xff] }
 0x242   :  { %8525 = vst [vmem:[#allocation31_spill] sm:$0xff] %v7019_v0  ;;  %v7028_v48 = vld.sshfl [vmem:[#allocation1] sm:$0xff pattern:$0x75316420]  ;;  %v7033_v25 = vperm.slane %v8527_v31, %v5154_v32  ;;  %v3413_v31 = vsel %vm3229_vm1, %v6760_v35, -inf  ;;  %v940_v35 = vrot.slane %v6701_v16, 4 }
 0x243   :  { %2972 = vst [vmem:[#allocation1 + $0x11] ss:$2 sm:$0xff] %v7007_v2  ;;  %v8529_v2 = vld [vmem:[#allocation52_spill] sm:$0xff]  ;;  %3414 = vmax.xlane.f32.xlu0 %v3413_v31  ;;  %v7070_v31 = vperm.slane %v8537_v57, %v5154_v32  ;;  %v3419_v16 = vsel %vm3229_vm1, %v2908_v14, -inf  ;;  %v8539_v57 = vld [vmem:[#allocation25_spill] sm:$0xff] }
 0x244   :  { %2937 = vst [vmem:[#allocation1 + $0x20] ss:$2 sm:$0xff] %v7014_v47  ;;  %v7041_v1 = vperm.slane %v8529_v2, %v5154_v32  ;;  %v7043_v47 = vpop.xlane.xlu1 %3282  ;;  %v8534_v2 = vld [vmem:[#allocation70_spill] sm:$0xff] }
 0x245   :  { %2938 = vst [vmem:[#allocation1 + $0x21] ss:$2 sm:$0xff] %v7019_v0  ;;  %v2920_v0 = vld.sshfl [vmem:[#allocation1 + $0x30] sm:$0xff pattern:$0x75316420]  ;;  %v7058_v7 = vperm.slane %v8534_v2, %v5154_v32  ;;  %v913_v2 = vsel %vm662_vm0, 0.0, %v912_v42 }
 0x246   :  { %8526 = vst [vmem:[#allocation32_spill] sm:$0xff] %v7028_v48  ;;  %v7045_v48 = vpop.xlane.xlu0 %3288  ;;  %v7096_v42 = vpop.xlane.xlu2 %3294 }
 0x247   :  { %8528 = vst [vmem:[#allocation73_spill] sm:$0xff] %v7035_v26  ;;  %v7085_v26 = vperm.slane %v8539_v57, %v5154_v32  ;;  %3420 = vmax.xlane.f32.xlu2 %v3419_v16  ;;  %v8545_v16 = vld [vmem:[#allocation86_spill] sm:$0xff] }
 0x248   :  { %3005 = vst [vmem:[#allocation1] ss:$2 sm:$0xff] %v689_v37  ;;  %v7053_v37 = vperm.slane %v8532_v9, %v5154_v32 }
 0x249   :  { %8530 = vst [vmem:[#allocation74_spill] sm:$0xff] %v7043_v47  ;;  %v3416_v47 = vsel %vm3229_vm1, %v6911_v13, -inf  ;;  %v3422_v13 = vsel %vm3229_vm1, %v6703_v41, -inf  ;;  %v7106_v41 = vperm.slane %v8545_v16, %v5154_v32 }
 0x24a   :  { %8531 = vst [vmem:[#allocation62_spill] sm:$0xff] %v7045_v48  ;;  %v7060_v48 = vld.sshfl [vmem:[#allocation1 + $0x10] sm:$0xff pattern:$0x75316420]  ;;  %3417 = vmax.xlane.f32.xlu1 %v3416_v47 }
 0x24b   :  { %3006 = vst [vmem:[#allocation1 + $0x1] ss:$2 sm:$0xff] %v717_v3  ;;  %v8536_v3 = vld [vmem:[#allocation39_spill] sm:$0xff]  ;;  %3423 = vmax.xlane.f32.xlu0 %v3422_v13 }
 0x24c   :  { %2927 = vst [vmem:[#allocation1 + $0x30] ss:$2 sm:$0xff] %v7033_v25  ;;  %v7065_v44 = vperm.slane %v8536_v3, %v5154_v32  ;;  %v7072_v9 = vld.sshfl [vmem:[#allocation1 + $0x20] sm:$0xff pattern:$0x75316420]  ;;  %v8541_v47 = vld [vmem:[#allocation27_spill] sm:$0xff]  ;;  %v7100_v57 = vpop.xlane.xlu1 %3291 }
 0x24d   :  { %8533 = vst [vmem:[#allocation10_spill] sm:$0xff] %v7053_v37  ;;  %v7094_v14 = vperm.slane %v8541_v47, %v5154_v32 }
 0x24e   :  { %2928 = vst [vmem:[#allocation1 + $0x31] ss:$2 sm:$0xff] %v7041_v1 }
 0x24f   :  { %8535 = vst [vmem:[#allocation64_spill] sm:$0xff] %v7058_v7 }
 0x250   :  { %2983 = vst [vmem:[#allocation1 + $0x10] ss:$2 sm:$0xff] %v7053_v37  ;;  %v7088_v37 = vpop.xlane.xlu0 %3297 }
 0x251   :  { %2984 = vst [vmem:[#allocation1 + $0x11] ss:$2 sm:$0xff] %v7058_v7  ;;  %v941_v7 = vsel %vm662_vm0, 0.0, %v940_v35  ;;  %v1136_v35 = vrot.slane %v6733_v43, 4  ;;  %v8550_v43 = vld [vmem:[#allocation76_spill] sm:$0xff] }
 0x252   :  { %2949 = vst [vmem:[#allocation1 + $0x20] ss:$2 sm:$0xff] %v7065_v44  ;;  %v7081_v3 = vld.sshfl [vmem:[#allocation1] sm:$0xff pattern:$0x75316420]  ;;  %v7123_v16 = vperm.slane %v8550_v43, %v5154_v32 }
 0x253   :  { %2950 = vst [vmem:[#allocation1 + $0x21] ss:$2 sm:$0xff] %v7070_v31 }
 0x254   :  { %8538 = vst [vmem:[#allocation12_spill] sm:$0xff] %v7081_v3 }
 0x255   :  { %8540 = vst [vmem:[#allocation15_spill] sm:$0xff] %v7088_v37  ;;  %v7098_v3 = vld.sshfl [vmem:[#allocation1 + $0x30] sm:$0xff pattern:$0x75316420]  ;;  %v8549_v37 = vld [vmem:[#allocation72_spill] sm:$0xff] }
 0x256   :  { %3017 = vst [vmem:[#allocation1] ss:$2 sm:$0xff] %v913_v2  ;;  %v8547_v2 = vld [vmem:[#allocation87_spill] sm:$0xff] }
 0x257   :  { %8542 = vst [vmem:[#allocation16_spill] sm:$0xff] %v7094_v14  ;;  %v7111_v47 = vperm.slane %v8547_v2, %v5154_v32  ;;  %v1137_v2 = vsel %vm662_vm0, 0.0, %v1136_v35 }
 0x258   :  { %8543 = vst [vmem:[#allocation81_spill] sm:$0xff] %v7096_v42  ;;  %v7113_v13 = vld.sshfl [vmem:[#allocation1 + $0x10] sm:$0xff pattern:$0x75316420]  ;;  %v3425_v42 = vsel %vm3229_vm1, %v6805_v19, -inf }
 0x259   :  { %3018 = vst [vmem:[#allocation1 + $0x1] ss:$2 sm:$0xff] %v941_v7  ;;  %v1164_v7 = vrot.slane %v6740_v61, 4  ;;  %3426 = vmax.xlane.f32.xlu1 %v3425_v42  ;;  %v3428_v61 = vsel %vm3229_vm1, %v6961_v27, -inf  ;;  %v772_v27 = vrot.slane %v6758_v59, 4  ;;  %v8554_v42 = vld [vmem:[#allocation53_spill] sm:$0xff] }
 0x25a   :  { %8544 = vst [vmem:[#allocation30_spill] sm:$0xff] %v7100_v57  ;;  %v7118_v57 = vperm.slane %v8549_v37, %v5154_v32  ;;  %3429 = vmax.xlane.f32.xlu2 %v3428_v61  ;;  %v3431_v37 = vsel %vm3229_vm1, %v2920_v0, -inf  ;;  %v7147_v61 = vperm.slane %v8554_v42, %v5154_v32  ;;  %v7149_v0 = vpop.xlane.xlu0 %3306  ;;  %v1360_v59 = vrot.slane %v6780_v46, 4 }
 0x25b   :  { %2939 = vst [vmem:[#allocation1 + $0x30] ss:$2 sm:$0xff] %v7085_v26  ;;  %v1165_v19 = vsel %vm662_vm0, 0.0, %v1164_v7  ;;  %3432 = vmax.xlane.f32.xlu0 %v3431_v37  ;;  %v1388_v37 = vrot.slane %v6787_v54, 4  ;;  %v7167_v42 = vperm.slane %v6371_v5, %v5154_v32  ;;  %v3437_v46 = vsel %vm3229_vm1, %v6854_v53, -inf }
 0x25c   :  { %8546 = vst [vmem:[#allocation84_spill] sm:$0xff] %v7106_v41  ;;  %v3440_v5 = vsel %vm3229_vm1, %v7021_v6, -inf  ;;  %v968_v53 = vrot.slane %v6798_v39, 4  ;;  %v996_v6 = vrot.slane %v6803_v20, 4  ;;  %v3443_v20 = vsel %vm3229_vm1, %v7098_v3, -inf }
 0x25d   :  { %2940 = vst [vmem:[#allocation1 + $0x31] ss:$2 sm:$0xff] %v7094_v14  ;;  %v7127_v14 = vld.sshfl [vmem:[#allocation1 + $0x20] sm:$0xff pattern:$0x75316420]  ;;  %v3449_v3 = vsel %vm3229_vm1, %v6899_v17, -inf  ;;  %v7240_v17 = vperm.slane %v6495_v29, %v5154_v32 }
 0x25e   :  { %8548 = vst [vmem:[#allocation33_spill] sm:$0xff] %v7111_v47  ;;  %v969_v39 = vsel %vm662_vm0, 0.0, %v968_v53  ;;  %v3452_v29 = vsel %vm3229_vm1, %v7072_v9, -inf  ;;  %v3458_v9 = vsel %vm3229_vm1, %v6835_v40, -inf }
 0x25f   :  { %2995 = vst [vmem:[#allocation1 + $0x10] ss:$2 sm:$0xff] %v7106_v41  ;;  %v744_v41 = vrot.slane %v6753_v11, 4  ;;  %v7155_v11 = vpop.xlane.xlu2 %3303 }
 0x260   :  { %8551 = vst [vmem:[#allocation35_spill] sm:$0xff] %v7123_v16  ;;  %v7136_v43 = vld.sshfl [vmem:[#allocation1] sm:$0xff pattern:$0x75316420] }
 0x261   :  { %2996 = vst [vmem:[#allocation1 + $0x11] ss:$2 sm:$0xff] %v7111_v47  ;;  %v8553_v47 = vld [vmem:[#allocation48_spill] sm:$0xff] }
 0x262   :  { %2961 = vst [vmem:[#allocation1 + $0x20] ss:$2 sm:$0xff] %v7118_v57  ;;  %v7142_v35 = vperm.slane %v8553_v47, %v5154_v32  ;;  %v745_v47 = vsel %vm662_vm0, 0.0, %v744_v41  ;;  %3438 = vmax.xlane.f32.xlu2 %v3437_v46 }
 0x263   :  { %2962 = vst [vmem:[#allocation1 + $0x21] ss:$2 sm:$0xff] %v7123_v16  ;;  %v7151_v16 = vpop.xlane.xlu1 %3300  ;;  %3441 = vmax.xlane.f32.xlu0 %v3440_v5 }
 0x264   :  { %8552 = vst [vmem:[#allocation37_spill] sm:$0xff] %v7136_v43  ;;  %v7153_v43 = vld.sshfl [vmem:[#allocation1 + $0x30] sm:$0xff pattern:$0x75316420] }
 0x265   :  { %3029 = vst [vmem:[#allocation1] ss:$2 sm:$0xff] %v1137_v2  ;;  %v773_v2 = vsel %vm662_vm0, 0.0, %v772_v27  ;;  %v1389_v27 = vsel %vm662_vm0, 0.0, %v1388_v37  ;;  %v7203_v37 = vpop.xlane.xlu0 %3315 }
 0x266   :  { %8555 = vst [vmem:[#allocation58_spill] sm:$0xff] %v7149_v0  ;;  %v8558_v0 = vld [vmem:[#allocation90_spill] sm:$0xff] }
 0x267   :  { %8556 = vst [vmem:[#allocation63_spill] sm:$0xff] %v7151_v16  ;;  %v7173_v16 = vperm.slane %v8558_v0, %v5154_v32  ;;  %v8559_v0 = vld [vmem:[#allocation79_spill] sm:$0xff]  ;;  %v7199_v46 = vpop.xlane.xlu2 %3312 }
 0x268   :  { %3030 = vst [vmem:[#allocation1 + $0x1] ss:$2 sm:$0xff] %v1165_v19  ;;  %v7161_v7 = vld.sshfl [vmem:[#allocation1 + $0x10] sm:$0xff pattern:$0x75316420]  ;;  %v3434_v19 = vsel %vm3229_vm1, %v6744_v12, -inf }
 0x269   :  { %8557 = vst [vmem:[#allocation14_spill] sm:$0xff] %v7155_v11  ;;  %3435 = vmax.xlane.f32.xlu1 %v3434_v19  ;;  %v1361_v12 = vsel %vm662_vm0, 0.0, %v1360_v59  ;;  %v8561_v59 = vld [vmem:[#allocation83_spill] sm:$0xff] }
 0x26a   :  { %2951 = vst [vmem:[#allocation1 + $0x30] ss:$2 sm:$0xff] %v7142_v35  ;;  %v7177_v41 = vld.sshfl [vmem:[#allocation1 + $0x20] sm:$0xff pattern:$0x75316420]  ;;  %v7197_v19 = vperm.slane %v8561_v59, %v5154_v32  ;;  %v997_v59 = vsel %vm662_vm0, 0.0, %v996_v6 }
 0x26b   :  { %2952 = vst [vmem:[#allocation1 + $0x31] ss:$2 sm:$0xff] %v7147_v61  ;;  %3450 = vmax.xlane.f32.xlu0 %v3449_v3 }
 0x26c   :  { %3007 = vst [vmem:[#allocation1 + $0x10] ss:$2 sm:$0xff] %v745_v47  ;;  %v7190_v47 = vperm.slane %v8559_v0, %v5154_v32 }
 0x26d   :  { %3008 = vst [vmem:[#allocation1 + $0x11] ss:$2 sm:$0xff] %v773_v2  ;;  %v7192_v2 = vpop.xlane.xlu1 %3309 }
 0x26e   :  { %2973 = vst [vmem:[#allocation1 + $0x20] ss:$2 sm:$0xff] %v7167_v42 }
 0x26f   :  { %2974 = vst [vmem:[#allocation1 + $0x21] ss:$2 sm:$0xff] %v7173_v16  ;;  %v7184_v54 = vld.sshfl [vmem:[#allocation1] sm:$0xff pattern:$0x75316420] }
 0x270   :  { %8560 = vst [vmem:[#allocation17_spill] sm:$0xff] %v7192_v2  ;;  %v1612_v2 = vrot.slane %v6833_v30, 4 }
 0x271   :  { %3041 = vst [vmem:[#allocation1] ss:$2 sm:$0xff] %v1361_v12  ;;  %v1584_v12 = vrot.slane %v6827_v23, 4  ;;  %3444 = vmax.xlane.f32.xlu1 %v3443_v20  ;;  %v8565_v23 = vld [vmem:[#allocation75_spill] sm:$0xff] }
 0x272   :  { %8562 = vst [vmem:[#allocation34_spill] sm:$0xff] %v7199_v46  ;;  %v7201_v5 = vld.sshfl [vmem:[#allocation1 + $0x30] sm:$0xff pattern:$0x75316420]  ;;  %v3446_v46 = vsel %vm3229_vm1, %v6789_v52, -inf  ;;  %v7223_v53 = vperm.slane %v8565_v23, %v5154_v32  ;;  %v7249_v23 = vpop.xlane.xlu0 %3324 }
 0x273   :  { %3042 = vst [vmem:[#allocation1 + $0x1] ss:$2 sm:$0xff] %v1389_v27  ;;  %v8564_v27 = vld [vmem:[#allocation71_spill] sm:$0xff]  ;;  %3447 = vmax.xlane.f32.xlu2 %v3446_v46  ;;  %v1585_v30 = vsel %vm662_vm0, 0.0, %v1584_v12  ;;  %v7242_v46 = vpop.xlane.xlu2 %3321  ;;  %v7247_v12 = vperm.slane %v6540_v4, %v5154_v32  ;;  %v3455_v4 = vsel %vm3229_vm1, %v7153_v43, -inf  ;;  %3459 = vmax.xlane.f32.xlu0 %v3458_v9 }
 0x274   :  { %8563 = vst [vmem:[#allocation36_spill] sm:$0xff] %v7203_v37  ;;  %v7211_v0 = vld.sshfl [vmem:[#allocation1 + $0x10] sm:$0xff pattern:$0x75316420]  ;;  %v7217_v37 = vperm.slane %v8564_v27, %v5154_v32  ;;  %v1613_v27 = vsel %vm662_vm0, 0.0, %v1612_v2 }
 0x275   :  { %2963 = vst [vmem:[#allocation1 + $0x30] ss:$2 sm:$0xff] %v7190_v47  ;;  %v7231_v20 = vpop.xlane.xlu1 %3318 }
 0x276   :  { %2964 = vst [vmem:[#allocation1 + $0x31] ss:$2 sm:$0xff] %v7197_v19  ;;  %v7227_v6 = vld.sshfl [vmem:[#allocation1 + $0x20] sm:$0xff pattern:$0x75316420] }
 0x277   :  { %3019 = vst [vmem:[#allocation1 + $0x10] ss:$2 sm:$0xff] %v969_v39  ;;  %v1192_v39 = vrot.slane %v6844_v24, 4 }
 0x278   :  { %3020 = vst [vmem:[#allocation1 + $0x11] ss:$2 sm:$0xff] %v997_v59  ;;  %v1220_v59 = vrot.slane %v6850_v38, 4  ;;  %v1808_v38 = vrot.slane %v6869_v50, 4  ;;  %v8570_v50 = vld [vmem:[#allocation89_spill] sm:$0xff] }
 0x279   :  { %2985 = vst [vmem:[#allocation1 + $0x20] ss:$2 sm:$0xff] %v7217_v37  ;;  %v1193_v24 = vsel %vm662_vm0, 0.0, %v1192_v39  ;;  %3453 = vmax.xlane.f32.xlu1 %v3452_v29  ;;  %v7273_v39 = vperm.slane %v8570_v50, %v5154_v32  ;;  %v1416_v29 = vrot.slane %v6890_v18, 4  ;;  %v1444_v50 = vrot.slane %v6895_v28, 4 }
 0x27a   :  { %8566 = vst [vmem:[#allocation19_spill] sm:$0xff] %v7231_v20  ;;  %v7234_v52 = vld.sshfl [vmem:[#allocation1] sm:$0xff pattern:$0x75316420]  ;;  %v7292_v9 = vpop.xlane.xlu0 %3333  ;;  %v800_v18 = vrot.slane %v6903_v15, 4  ;;  %v3464_v28 = vsel %vm3229_vm1, %v7127_v14, -inf }
 0x27b   :  { %2986 = vst [vmem:[#allocation1 + $0x21] ss:$2 sm:$0xff] %v7223_v53  ;;  %3456 = vmax.xlane.f32.xlu2 %v3455_v4  ;;  %v3467_v15 = vsel %vm3229_vm1, %v7201_v5, -inf }
 0x27c   :  { %8567 = vst [vmem:[#allocation23_spill] sm:$0xff] %v7242_v46  ;;  %3468 = vmax.xlane.f32.xlu0 %v3467_v15  ;;  %v801_v14 = vsel %vm662_vm0, 0.0, %v800_v18  ;;  %v1640_v18 = vrot.slane %v6943_v55, 4  ;;  %v7335_v15 = vperm.slane %v6491_v22, %v5154_v32  ;;  %v3473_v55 = vsel %vm3229_vm1, %v7009_v51, -inf }
 0x27d   :  { %3053 = vst [vmem:[#allocation1] ss:$2 sm:$0xff] %v1585_v30  ;;  %v7251_v3 = vld.sshfl [vmem:[#allocation1 + $0x30] sm:$0xff pattern:$0x75316420]  ;;  %v1221_v30 = vsel %vm662_vm0, 0.0, %v1220_v59  ;;  %v7277_v59 = vpop.xlane.xlu1 %3327 }
 0x27e   :  { %8568 = vst [vmem:[#allocation57_spill] sm:$0xff] %v7249_v23  ;;  %v8569_v23 = vld [vmem:[#allocation88_spill] sm:$0xff]  ;;  %v856_v22 = vrot.slane %v6980_v63, 4 }
 0x27f   :  { %3054 = vst [vmem:[#allocation1 + $0x1] ss:$2 sm:$0xff] %v1613_v27  ;;  %v7261_v2 = vld.sshfl [vmem:[#allocation1 + $0x10] sm:$0xff pattern:$0x75316420]  ;;  %v1836_v27 = vrot.slane %v6878_v58, 4  ;;  %v7267_v20 = vperm.slane %v8569_v23, %v5154_v32  ;;  %v7281_v23 = vpop.xlane.xlu2 %3330 }
 0x280   :  { %2975 = vst [vmem:[#allocation1 + $0x30] ss:$2 sm:$0xff] %v7240_v17  ;;  %v1809_v58 = vsel %vm662_vm0, 0.0, %v1808_v38  ;;  %v8573_v38 = vld [vmem:[#allocation82_spill] sm:$0xff] }
 0x281   :  { %2976 = vst [vmem:[#allocation1 + $0x31] ss:$2 sm:$0xff] %v7247_v12  ;;  %v7297_v46 = vperm.slane %v8573_v38, %v5154_v32  ;;  %v2032_v38 = vrot.slane %v6916_v33, 4 }
 0x282   :  { %3031 = vst [vmem:[#allocation1 + $0x10] ss:$2 sm:$0xff] %v1193_v24  ;;  %v7275_v43 = vld.sshfl [vmem:[#allocation1 + $0x20] sm:$0xff pattern:$0x75316420] }
 0x283   :  { %3032 = vst [vmem:[#allocation1 + $0x11] ss:$2 sm:$0xff] %v1221_v30  ;;  %v8571_v24 = vld [vmem:[#allocation80_spill] sm:$0xff]  ;;  %v1837_v30 = vsel %vm662_vm0, 0.0, %v1836_v27  ;;  %v828_v27 = vrot.slane %v6909_v10, 4  ;;  %3465 = vmax.xlane.f32.xlu2 %v3464_v28  ;;  %v2060_v10 = vrot.slane %v6924_v56, 4  ;;  %v7326_v28 = vpop.xlane.xlu0 %3342 }
 0x284   :  { %2997 = vst [vmem:[#allocation1 + $0x20] ss:$2 sm:$0xff] %v7267_v20  ;;  %v7289_v4 = vperm.slane %v8571_v24, %v5154_v32  ;;  %v3461_v24 = vsel %vm3229_vm1, %v6950_v49, -inf  ;;  %v1445_v49 = vsel %vm662_vm0, 0.0, %v1444_v50  ;;  %v2033_v5 = vsel %vm662_vm0, 0.0, %v2032_v38 }
 0x285   :  { %2998 = vst [vmem:[#allocation1 + $0x21] ss:$2 sm:$0xff] %v7273_v39  ;;  %3462 = vmax.xlane.f32.xlu1 %v3461_v24  ;;  %v7318_v24 = vpop.xlane.xlu1 %3336  ;;  %v829_v33 = vsel %vm662_vm0, 0.0, %v828_v27  ;;  %v2061_v50 = vsel %vm662_vm0, 0.0, %v2060_v10  ;;  %v7339_v27 = vperm.slane %v6533_v45, %v5154_v32  ;;  %v3470_v38 = vsel %vm3229_vm1, %v6880_v60, -inf  ;;  %v8577_v32 = vld [vmem:[#allocation56_spill] sm:$0xff] }
 0x286   :  { %v7284_v40 = vld.sshfl [vmem:[#allocation1] sm:$0xff pattern:$0x75316420]  ;;  %8572 = vst [vmem:[#allocation61_spill] sm:$0xff] %v7292_v9  ;;  %v1024_v10 = vrot.slane %v6954_v36, 4  ;;  %v3476_v45 = vsel %vm3229_vm1, %v7177_v41, -inf }
 0x287   :  { %3065 = vst [vmem:[#allocation1] ss:$2 sm:$0xff] %v1809_v58  ;;  %v1417_v58 = vsel %vm662_vm0, 0.0, %v1416_v29  ;;  %v7323_v29 = vpop.xlane.xlu2 %3339  ;;  %v1641_v60 = vsel %vm662_vm0, 0.0, %v1640_v18  ;;  %v2256_v36 = vrot.slane %v6966_v21, 4  ;;  %3477 = vmax.xlane.f32.xlu0 %v3476_v45  ;;  %v857_v21 = vsel %vm662_vm0, 0.0, %v856_v22 }
 0x288   :  { %v7299_v11 = vld.sshfl [vmem:[#allocation1 + $0x30] sm:$0xff pattern:$0x75316420]  ;;  %3066 = vst [vmem:[#allocation1 + $0x1] ss:$2 sm:$0xff] %v1837_v30  ;;  %v3479_v22 = vsel %vm3229_vm1, %v7251_v3, -inf }
 0x289   :  { %2987 = vst [vmem:[#allocation1 + $0x30] ss:$2 sm:$0xff] %v7289_v4 }
 0x28a   :  { %2988 = vst [vmem:[#allocation1 + $0x31] ss:$2 sm:$0xff] %v7297_v46  ;;  %v7313_v30 = vld.sshfl [vmem:[#allocation1 + $0x10] sm:$0xff pattern:$0x75316420] }
 0x28b   :  { %3043 = vst [vmem:[#allocation1 + $0x10] ss:$2 sm:$0xff] %v1417_v58  ;;  %v1668_v58 = vrot.slane %v6948_v8, 4  ;;  %v1052_v8 = vrot.slane %v6959_v34, 4  ;;  %3474 = vmax.xlane.f32.xlu2 %v3473_v55  ;;  %v1025_v34 = vsel %vm662_vm0, 0.0, %v1024_v10  ;;  %v7371_v45 = vpop.xlane.xlu0 %3351 }
 0x28c   :  { %v7320_v9 = vld.sshfl [vmem:[#allocation1 + $0x20] sm:$0xff pattern:$0x75316420]  ;;  %3044 = vst [vmem:[#allocation1 + $0x11] ss:$2 sm:$0xff] %v1445_v49 }
 0x28d   :  { %3009 = vst [vmem:[#allocation1 + $0x20] ss:$2 sm:$0xff] %v801_v14  ;;  %3471 = vmax.xlane.f32.xlu1 %v3470_v38  ;;  %v1669_v51 = vsel %vm662_vm0, 0.0, %v1668_v58  ;;  %v7360_v63 = vpop.xlane.xlu1 %3345  ;;  %v8576_v38 = vld [vmem:[#allocation54_spill] sm:$0xff]  ;;  %v1053_v58 = vsel %vm662_vm0, 0.0, %v1052_v8  ;;  %v8579_v8 = vld [vmem:[#allocation51_spill] sm:$0xff] }
 0x28e   :  { %3010 = vst [vmem:[#allocation1 + $0x21] ss:$2 sm:$0xff] %v829_v33  ;;  %v2284_v33 = vrot.slane %v6971_v62, 4  ;;  %v884_v55 = vrot.slane %v8576_v38, 4  ;;  %v2257_v62 = vsel %vm662_vm0, 0.0, %v2256_v36  ;;  %v3482_v38 = vsel %vm3229_vm1, %v8579_v8, -inf }
 0x28f   :  { %v7328_v56 = vld.sshfl [vmem:[#allocation1] sm:$0xff pattern:$0x75316420]  ;;  %8574 = vst [vmem:[#allocation67_spill] sm:$0xff] %v7360_v63  ;;  %v8578_v63 = vld [vmem:[#allocation59_spill] sm:$0xff] }
 0x290   :  { %3077 = vst [vmem:[#allocation1] ss:$2 sm:$0xff] %v2033_v5  ;;  %v7363_v5 = vpop.xlane.xlu2 %3348  ;;  %v885_v36 = vsel %vm662_vm0, 0.0, %v884_v55 }
 0x291   :  { %v7343_v49 = vld.sshfl [vmem:[#allocation1 + $0x30] sm:$0xff pattern:$0x75316420]  ;;  %3078 = vst [vmem:[#allocation1 + $0x1] ss:$2 sm:$0xff] %v2061_v50  ;;  %v8575_v50 = vld [vmem:[#allocation60_spill] sm:$0xff] }
 0x292   :  { %2999 = vst [vmem:[#allocation1 + $0x30] ss:$2 sm:$0xff] %v7335_v15  ;;  %v1248_v18 = vrot.slane %v8575_v50, 4  ;;  %v1892_v50 = vrot.slane %v8578_v63, 4 }
 0x293   :  { %3000 = vst [vmem:[#allocation1 + $0x31] ss:$2 sm:$0xff] %v7339_v27  ;;  %v7356_v14 = vld.sshfl [vmem:[#allocation1 + $0x10] sm:$0xff pattern:$0x75316420]  ;;  %3483 = vmax.xlane.f32.xlu2 %v3482_v38  ;;  %v1108_v38 = vrot.slane %v7041_v1, 4 }
 0x294   :  { %3055 = vst [vmem:[#allocation1 + $0x10] ss:$2 sm:$0xff] %v1641_v60  ;;  %v2285_v60 = vsel %vm662_vm0, 0.0, %v2284_v33  ;;  %v3485_v33 = vsel %vm3229_vm1, %v7060_v48, -inf  ;;  %v1080_v48 = vrot.slane %v7033_v25, 4  ;;  %v3491_v25 = vsel %vm3229_vm1, %v7299_v11, -inf }
 0x295   :  { %v7365_v41 = vld.sshfl [vmem:[#allocation1 + $0x20] sm:$0xff pattern:$0x75316420]  ;;  %3056 = vst [vmem:[#allocation1 + $0x11] ss:$2 sm:$0xff] %v1669_v51  ;;  %v1864_v51 = vrot.slane %v8577_v32, 4  ;;  %3480 = vmax.xlane.f32.xlu1 %v3479_v22  ;;  %3486 = vmax.xlane.f32.xlu0 %v3485_v33 }
 0x296   :  { %3021 = vst [vmem:[#allocation1 + $0x20] ss:$2 sm:$0xff] %v1025_v34  ;;  %v8580_v32 = vld [vmem:[#allocation31_spill] sm:$0xff]  ;;  %v1249_v22 = vsel %vm662_vm0, 0.0, %v1248_v18  ;;  %v3488_v18 = vsel %vm3229_vm1, %v7227_v6, -inf  ;;  %v1081_v33 = vsel %vm662_vm0, 0.0, %v1080_v48 }
 0x297   :  { %3022 = vst [vmem:[#allocation1 + $0x21] ss:$2 sm:$0xff] %v1053_v58  ;;  %v1276_v63 = vrot.slane %v8580_v32, 4  ;;  %v1865_v3 = vsel %vm662_vm0, 0.0, %v1864_v51  ;;  %v7390_v58 = vpop.xlane.xlu1 %3354  ;;  %v8582_v32 = vld [vmem:[#allocation64_spill] sm:$0xff]  ;;  %v1109_v6 = vsel %vm662_vm0, 0.0, %v1108_v38 }
 0x298   :  { %v7374_v10 = vld.sshfl [vmem:[#allocation1] sm:$0xff pattern:$0x75316420]  ;;  %v7396_v55 = vpop.xlane.xlu2 %3357 }
 0x299   :  { %3089 = vst [vmem:[#allocation1] ss:$2 sm:$0xff] %v2257_v62  ;;  %v1277_v51 = vsel %vm662_vm0, 0.0, %v1276_v63 }
 0x29a   :  { %v7383_v34 = vld.sshfl [vmem:[#allocation1 + $0x30] sm:$0xff pattern:$0x75316420]  ;;  %3090 = vst [vmem:[#allocation1 + $0x1] ss:$2 sm:$0xff] %v2285_v60  ;;  %v1893_v60 = vsel %vm662_vm0, 0.0, %v1892_v50 }
 0x29b   :  { %3011 = vst [vmem:[#allocation1 + $0x30] ss:$2 sm:$0xff] %v857_v21  ;;  %v7399_v21 = vpop.xlane.xlu0 %3360  ;;  %v8581_v50 = vld [vmem:[#allocation10_spill] sm:$0xff]  ;;  %3492 = vmax.xlane.f32.xlu2 %v3491_v25  ;;  %v1304_v25 = vrot.slane %v7085_v26, 4  ;;  %v3500_v26 = vsel %vm3229_vm1, %v7275_v43, -inf  ;;  %v8587_v43 = vld [vmem:[#allocation35_spill] sm:$0xff] }
 0x29c   :  { %3012 = vst [vmem:[#allocation1 + $0x31] ss:$2 sm:$0xff] %v885_v36  ;;  %v7392_v62 = vld.sshfl [vmem:[#allocation1 + $0x10] sm:$0xff pattern:$0x75316420]  ;;  %v2088_v36 = vrot.slane %v8581_v50, 4 }
 0x29d   :  { %3067 = vst [vmem:[#allocation1 + $0x10] ss:$2 sm:$0xff] %v1865_v3  ;;  %3489 = vmax.xlane.f32.xlu1 %v3488_v18  ;;  %v2116_v3 = vrot.slane %v8582_v32, 4 }
 0x29e   :  { %v7401_v8 = vld.sshfl [vmem:[#allocation1 + $0x20] sm:$0xff pattern:$0x75316420]  ;;  %3068 = vst [vmem:[#allocation1 + $0x11] ss:$2 sm:$0xff] %v1893_v60  ;;  %v8583_v60 = vld [vmem:[#allocation11_spill] sm:$0xff] }
 0x29f   :  { %3033 = vst [vmem:[#allocation1 + $0x20] ss:$2 sm:$0xff] %v1249_v22  ;;  %v3494_v63 = vsel %vm3229_vm1, %v8583_v60, -inf  ;;  %v1472_v22 = vrot.slane %v7065_v44, 4  ;;  %v7419_v18 = vpop.xlane.xlu1 %3363  ;;  %v2089_v11 = vsel %vm662_vm0, 0.0, %v2088_v36  ;;  %v2117_v32 = vsel %vm662_vm0, 0.0, %v2116_v3 }
 0x2a0   :  { %3034 = vst [vmem:[#allocation1 + $0x21] ss:$2 sm:$0xff] %v1277_v51  ;;  %3495 = vmax.xlane.f32.xlu0 %v3494_v63  ;;  %v1500_v51 = vrot.slane %v7070_v31, 4  ;;  %v7422_v48 = vpop.xlane.xlu2 %3366  ;;  %v8584_v31 = vld [vmem:[#allocation16_spill] sm:$0xff]  ;;  %v3497_v63 = vsel %vm3229_vm1, %v7113_v13, -inf }
 0x2a1   :  { %v1473_v38 = vsel %vm662_vm0, 0.0, %v1472_v22  ;;  %v1332_v60 = vrot.slane %v8584_v31, 4  ;;  %v8585_v3 = vld [vmem:[#allocation84_spill] sm:$0xff]  ;;  %v3503_v22 = vsel %vm3229_vm1, %v7343_v49, -inf }
 0x2a2   :  { %v1501_v36 = vsel %vm662_vm0, 0.0, %v1500_v51  ;;  %v8586_v51 = vld [vmem:[#allocation33_spill] sm:$0xff] }
 0x2a3   :  { %v7414_v1 = vld.sshfl [vmem:[#allocation1 + $0x30] sm:$0xff pattern:$0x75316420]  ;;  %v7428_v44 = vpop.xlane.xlu0 %3369  ;;  %3501 = vmax.xlane.f32.xlu2 %v3500_v26  ;;  %v2340_v31 = vrot.slane %v8586_v51, 4  ;;  %v8589_v51 = vld [vmem:[#allocation32_spill] sm:$0xff] }
 0x2a4   :  { %3023 = vst [vmem:[#allocation1 + $0x30] ss:$2 sm:$0xff] %v1081_v33 }
 0x2a5   :  { %3024 = vst [vmem:[#allocation1 + $0x31] ss:$2 sm:$0xff] %v1109_v6  ;;  %v7424_v50 = vld.sshfl [vmem:[#allocation1 + $0x10] sm:$0xff pattern:$0x75316420]  ;;  %3498 = vmax.xlane.f32.xlu1 %v3497_v63  ;;  %v2312_v6 = vrot.slane %v8585_v3, 4 }
 0x2a6   :  { %3079 = vst [vmem:[#allocation1 + $0x10] ss:$2 sm:$0xff] %v2089_v11  ;;  %v1305_v11 = vsel %vm662_vm0, 0.0, %v1304_v25  ;;  %v1528_v3 = vrot.slane %v7142_v35, 4  ;;  %v3512_v35 = vsel %vm3229_vm1, %v7320_v9, -inf  ;;  %v3515_v9 = vsel %vm3229_vm1, %v7383_v34, -inf }
 0x2a7   :  { %v7431_v33 = vld.sshfl [vmem:[#allocation1 + $0x20] sm:$0xff pattern:$0x75316420]  ;;  %3080 = vst [vmem:[#allocation1 + $0x11] ss:$2 sm:$0xff] %v2117_v32  ;;  %v1696_v32 = vrot.slane %v7118_v57, 4  ;;  %v7448_v63 = vpop.xlane.xlu1 %3372 }
 0x2a8   :  { %3045 = vst [vmem:[#allocation1 + $0x20] ss:$2 sm:$0xff] %v1473_v38  ;;  %3504 = vmax.xlane.f32.xlu0 %v3503_v22  ;;  %v1333_v38 = vsel %vm662_vm0, 0.0, %v1332_v60  ;;  %v7451_v26 = vpop.xlane.xlu2 %3375  ;;  %v2313_v49 = vsel %vm662_vm0, 0.0, %v2312_v6  ;;  %v2341_v60 = vsel %vm662_vm0, 0.0, %v2340_v31 }
 0x2a9   :  { %3046 = vst [vmem:[#allocation1 + $0x21] ss:$2 sm:$0xff] %v1501_v36  ;;  %v1724_v36 = vrot.slane %v8587_v43, 4  ;;  %v1697_v22 = vsel %vm662_vm0, 0.0, %v1696_v32  ;;  %v1529_v32 = vsel %vm662_vm0, 0.0, %v1528_v3  ;;  %v1752_v3 = vrot.slane %v7190_v47, 4 }
 0x2ab   :  { %v7454_v25 = vpop.xlane.xlu0 %3378  ;;  %v1725_v6 = vsel %vm662_vm0, 0.0, %v1724_v36  ;;  %v1920_v36 = vrot.slane %v7167_v42, 4  ;;  %v1753_v34 = vsel %vm662_vm0, 0.0, %v1752_v3 }
 0x2ac   :  { %v7445_v13 = vld.sshfl [vmem:[#allocation1 + $0x30] sm:$0xff pattern:$0x75316420]  ;;  %8588 = vst [vmem:[#allocation68_spill] sm:$0xff] %v7454_v25  ;;  %v3509_v25 = vsel %vm3229_vm1, %v7161_v7, -inf  ;;  %v1948_v7 = vrot.slane %v7173_v16, 4 }
 0x2ad   :  { %3035 = vst [vmem:[#allocation1 + $0x30] ss:$2 sm:$0xff] %v1305_v11  ;;  %v3506_v11 = vsel %vm3229_vm1, %v8589_v51, -inf  ;;  %3510 = vmax.xlane.f32.xlu2 %v3509_v25  ;;  %v8590_v51 = vld [vmem:[#allocation12_spill] sm:$0xff] }
 0x2ae   :  { %3036 = vst [vmem:[#allocation1 + $0x31] ss:$2 sm:$0xff] %v1333_v38  ;;  %v7456_v57 = vld.sshfl [vmem:[#allocation1 + $0x10] sm:$0xff pattern:$0x75316420]  ;;  %v1556_v38 = vrot.slane %v7147_v61, 4  ;;  %3507 = vmax.xlane.f32.xlu1 %v3506_v11 }
 0x2af   :  { %3091 = vst [vmem:[#allocation1 + $0x10] ss:$2 sm:$0xff] %v2313_v49  ;;  %v7472_v31 = vpop.xlane.xlu1 %3381  ;;  %v3518_v11 = vsel %vm3229_vm1, %v8590_v51, -inf  ;;  %v1949_v16 = vsel %vm662_vm0, 0.0, %v1948_v7  ;;  %v3524_v7 = vsel %vm3229_vm1, %v7365_v41, -inf }
 0x2b0   :  { %v7463_v43 = vld.sshfl [vmem:[#allocation1 + $0x20] sm:$0xff pattern:$0x75316420]  ;;  %3092 = vst [vmem:[#allocation1 + $0x11] ss:$2 sm:$0xff] %v2341_v60  ;;  %3513 = vmax.xlane.f32.xlu0 %v3512_v35  ;;  %v1557_v61 = vsel %vm662_vm0, 0.0, %v1556_v38  ;;  %v7478_v60 = vpop.xlane.xlu2 %3384 }
 0x2b1   :  { %3057 = vst [vmem:[#allocation1 + $0x20] ss:$2 sm:$0xff] %v1697_v22  ;;  %v1921_v22 = vsel %vm662_vm0, 0.0, %v1920_v36  ;;  %v1780_v38 = vrot.slane %v7197_v19, 4 }
 0x2b2   :  { %3058 = vst [vmem:[#allocation1 + $0x21] ss:$2 sm:$0xff] %v1725_v6  ;;  %v3521_v6 = vsel %vm3229_vm1, %v7211_v0, -inf  ;;  %v2172_v0 = vrot.slane %v7223_v53, 4 }
 0x2b3   :  { %v7481_v25 = vpop.xlane.xlu0 %3387  ;;  %v1781_v19 = vsel %vm662_vm0, 0.0, %v1780_v38  ;;  %v2004_v38 = vrot.slane %v7247_v12, 4  ;;  %v2396_v12 = vrot.slane %v7273_v39, 4  ;;  %v2228_v39 = vrot.slane %v7297_v46, 4 }
 0x2b4   :  { %v2173_v53 = vsel %vm662_vm0, 0.0, %v2172_v0  ;;  %v3536_v0 = vsel %vm3229_vm1, %v7401_v8, -inf  ;;  %v3545_v46 = vsel %vm3229_vm1, %v7313_v30, -inf }
 0x2b5   :  { %v7474_v49 = vld.sshfl [vmem:[#allocation1 + $0x30] sm:$0xff pattern:$0x75316420]  ;;  %3519 = vmax.xlane.f32.xlu2 %v3518_v11 }
 0x2b6   :  { %3047 = vst [vmem:[#allocation1 + $0x30] ss:$2 sm:$0xff] %v1529_v32  ;;  %3516 = vmax.xlane.f32.xlu1 %v3515_v9  ;;  %v3527_v9 = vsel %vm3229_vm1, %v7414_v1, -inf  ;;  %v3551_v30 = vsel %vm3229_vm1, %v7474_v49, -inf  ;;  %v3560_v49 = vsel %vm3229_vm1, %v7463_v43, -inf }
 0x2b7   :  { %3048 = vst [vmem:[#allocation1 + $0x31] ss:$2 sm:$0xff] %v1557_v61  ;;  %v7495_v47 = vpop.xlane.xlu1 %3390  ;;  %v2144_v61 = vrot.slane %v7217_v37, 4  ;;  %v8591_v37 = vld [vmem:[#allocation37_spill] sm:$0xff] }
 0x2b8   :  { %3522 = vmax.xlane.f32.xlu0 %v3521_v6  ;;  %v7498_v35 = vpop.xlane.xlu2 %3393  ;;  %v3530_v51 = vsel %vm3229_vm1, %v8591_v37, -inf }
 0x2b9   :  { %v7489_v42 = vld.sshfl [vmem:[#allocation1 + $0x20] sm:$0xff pattern:$0x75316420]  ;;  %v2145_v3 = vsel %vm662_vm0, 0.0, %v2144_v61  ;;  %v2005_v61 = vsel %vm662_vm0, 0.0, %v2004_v38  ;;  %v3548_v38 = vsel %vm3229_vm1, %v7431_v33, -inf }
 0x2ba   :  { %3069 = vst [vmem:[#allocation1 + $0x20] ss:$2 sm:$0xff] %v1921_v22  ;;  %v1976_v22 = vrot.slane %v7240_v17, 4  ;;  %v3572_v43 = vsel %vm3229_vm1, %v7489_v42, -inf }
 0x2bb   :  { %3070 = vst [vmem:[#allocation1 + $0x21] ss:$2 sm:$0xff] %v1949_v16  ;;  %v7504_v36 = vpop.xlane.xlu0 %3396 }
 0x2bc   :  { %v1977_v16 = vsel %vm662_vm0, 0.0, %v1976_v22 }
 0x2bd   :  { %3528 = vmax.xlane.f32.xlu2 %v3527_v9  ;;  %v2200_v9 = vrot.slane %v7289_v4, 4 }
 0x2be   :  { %v7500_v32 = vld.sshfl [vmem:[#allocation1 + $0x30] sm:$0xff pattern:$0x75316420]  ;;  %3525 = vmax.xlane.f32.xlu1 %v3524_v7  ;;  %v3539_v7 = vsel %vm3229_vm1, %v7445_v13, -inf }
 0x2bf   :  { %3059 = vst [vmem:[#allocation1 + $0x30] ss:$2 sm:$0xff] %v1753_v34  ;;  %v7519_v41 = vpop.xlane.xlu1 %3399  ;;  %v2368_v34 = vrot.slane %v7267_v20, 4  ;;  %v2201_v13 = vsel %vm662_vm0, 0.0, %v2200_v9 }
 0x2c0   :  { %3060 = vst [vmem:[#allocation1 + $0x31] ss:$2 sm:$0xff] %v1781_v19  ;;  %3531 = vmax.xlane.f32.xlu0 %v3530_v51  ;;  %v7521_v1 = vpop.xlane.xlu2 %3402  ;;  %v3533_v19 = vsel %vm3229_vm1, %v7261_v2, -inf  ;;  %v2397_v2 = vsel %vm662_vm0, 0.0, %v2396_v12  ;;  %v2229_v51 = vsel %vm662_vm0, 0.0, %v2228_v39 }
 0x2c1   :  { %v2369_v20 = vsel %vm662_vm0, 0.0, %v2368_v34 }
 0x2c2   :  { %v7515_v11 = vld.sshfl [vmem:[#allocation1 + $0x20] sm:$0xff pattern:$0x75316420] }
 0x2c3   :  { %3081 = vst [vmem:[#allocation1 + $0x20] ss:$2 sm:$0xff] %v2145_v3  ;;  %v7524_v17 = vpop.xlane.xlu0 %3405  ;;  %v3584_v42 = vsel %vm3229_vm1, %v7515_v11, -inf  ;;  %v3593_v11 = vsel %vm3229_vm1, %v7456_v57, -inf }
 0x2c4   :  { %3082 = vst [vmem:[#allocation1 + $0x21] ss:$2 sm:$0xff] %v2173_v53  ;;  %v3542_v53 = vsel %vm3229_vm1, %v7184_v54, -inf }
 0x2c5   :  { %8592 = vst [vmem:[#allocation38_spill] sm:$0xff] %v7524_v17  ;;  %3537 = vmax.xlane.f32.xlu2 %v3536_v0 }
 0x2c6   :  { %3534 = vmax.xlane.f32.xlu1 %v3533_v19 }
 0x2c7   :  { %v7526_v6 = vld.sshfl [vmem:[#allocation1 + $0x30] sm:$0xff pattern:$0x75316420]  ;;  %v7543_v22 = vpop.xlane.xlu1 %3408 }
 0x2c8   :  { %3071 = vst [vmem:[#allocation1 + $0x30] ss:$2 sm:$0xff] %v1977_v16  ;;  %3540 = vmax.xlane.f32.xlu0 %v3539_v7  ;;  %v7545_v37 = vpop.xlane.xlu2 %3411  ;;  %v2424_v16 = vrot.slane %v7335_v15, 4  ;;  %v3554_v15 = vsel %vm3229_vm1, %v7234_v52, -inf  ;;  %v3563_v52 = vsel %vm3229_vm1, %v7500_v32, -inf  ;;  %v3575_v32 = vsel %vm3229_vm1, %v7526_v6, -inf }
 0x2c9   :  { %3072 = vst [vmem:[#allocation1 + $0x31] ss:$2 sm:$0xff] %v2005_v61  ;;  %v2452_v61 = vrot.slane %v7339_v27, 4  ;;  %v3557_v27 = vsel %vm3229_vm1, %v7356_v14, -inf  ;;  %v3566_v14 = vsel %vm3229_vm1, %v7284_v40, -inf }
 0x2ca   :  { %v2425_v19 = vsel %vm662_vm0, 0.0, %v2424_v16 }
 0x2cb   :  { %v7539_v3 = vld.sshfl [vmem:[#allocation1 + $0x20] sm:$0xff pattern:$0x75316420]  ;;  %v7547_v8 = vpop.xlane.xlu0 %3414  ;;  %v2453_v7 = vsel %vm662_vm0, 0.0, %v2452_v61 }
 0x2cc   :  { %3093 = vst [vmem:[#allocation1 + $0x20] ss:$2 sm:$0xff] %v2369_v20 }
 0x2cd   :  { %3094 = vst [vmem:[#allocation1 + $0x21] ss:$2 sm:$0xff] %v2397_v2  ;;  %3546 = vmax.xlane.f32.xlu2 %v3545_v46 }
 0x2ce   :  { %8593 = vst [vmem:[#allocation45_spill] sm:$0xff] %v7547_v8  ;;  %3543 = vmax.xlane.f32.xlu1 %v3542_v53 }
 0x2cf   :  { %v7558_v34 = vpop.xlane.xlu1 %3417 }
 0x2d0   :  { %v3076_v4 = vld.sshfl [vmem:[#allocation1 + $0x30] sm:$0xff pattern:$0x75316420]  ;;  %3549 = vmax.xlane.f32.xlu0 %v3548_v38  ;;  %8594 = vst [vmem:[#allocation85_spill] sm:$0xff] %v7558_v34  ;;  %v7561_v12 = vpop.xlane.xlu2 %3420  ;;  %v3578_v38 = vsel %vm3229_vm1, %v7328_v56, -inf }
 0x2d1   :  { %3083 = vst [vmem:[#allocation1 + $0x30] ss:$2 sm:$0xff] %v2201_v13  ;;  %v3587_v56 = vsel %vm3229_vm1, %v3076_v4, -inf  ;;  %v3596_v4 = vsel %vm3229_vm1, %v7539_v3, -inf }
 0x2d2   :  { %3084 = vst [vmem:[#allocation1 + $0x31] ss:$2 sm:$0xff] %v2229_v51  ;;  %v3569_v51 = vsel %vm3229_vm1, %v7392_v62, -inf  ;;  %v3581_v62 = vsel %vm3229_vm1, %v7424_v50, -inf  ;;  %v3590_v50 = vsel %vm3229_vm1, %v7374_v10, -inf }
 0x2d3   :  { %8595 = vst [vmem:[#allocation24_spill] sm:$0xff] %v7561_v12  ;;  %v7563_v54 = vpop.xlane.xlu0 %3423 }
 0x2d5   :  { %3555 = vmax.xlane.f32.xlu2 %v3554_v15 }
 0x2d6   :  { %3552 = vmax.xlane.f32.xlu1 %v3551_v30 }
 0x2d7   :  { %v7573_v33 = vpop.xlane.xlu1 %3426 }
 0x2d8   :  { %3558 = vmax.xlane.f32.xlu0 %v3557_v27  ;;  %v7575_v9 = vpop.xlane.xlu2 %3429  ;;  %v3097_v27 = vld.sshfl [vmem:[#allocation1] sm:$0xff pattern:$0x75316420] }
 0x2d9   :  { %v3088_v0 = vld.sshfl [vmem:[#allocation1 + $0x30] sm:$0xff pattern:$0x75316420]  ;;  %v3602_v10 = vsel %vm3229_vm1, %v3097_v27, -inf }
 0x2da   :  { %3095 = vst [vmem:[#allocation1 + $0x30] ss:$2 sm:$0xff] %v2425_v19  ;;  %v5015_v19 = vmov 0  }
 0x2db   :  { %3096 = vst [vmem:[#allocation1 + $0x31] ss:$2 sm:$0xff] %v2453_v7  ;;  %v7577_v20 = vpop.xlane.xlu0 %3432  ;;  %4895 = vset.pattern.permute.xlu0 %v5015_v19  ;;  %4894 = vset.pattern.permute.xlu2 %v5015_v19 }
 0x2dc   :  { %4893 = vset.pattern.permute.xlu1 %v5015_v19 }
 0x2dd   :  { %3564 = vmax.xlane.f32.xlu2 %v3563_v52 }
 0x2de   :  { %3561 = vmax.xlane.f32.xlu1 %v3560_v49  ;;  %v3599_v49 = vsel %vm3229_vm1, %v3088_v0, -inf }
 0x2df   :  { %v7585_v39 = vpop.xlane.xlu1 %3435 }
 0x2e0   :  { %3567 = vmax.xlane.f32.xlu0 %v3566_v14  ;;  %v7587_v2 = vpop.xlane.xlu2 %3438  ;;  %v3098_v14 = vld.sshfl [vmem:[#allocation1 + $0x10] sm:$0xff pattern:$0x75316420] }
 0x2e3   :  { %v7589_v13 = vpop.xlane.xlu0 %3441 }
 0x2e5   :  { %3573 = vmax.xlane.f32.xlu2 %v3572_v43  ;;  %v3099_v43 = vld.sshfl [vmem:[#allocation1 + $0x20] sm:$0xff pattern:$0x75316420] }
 0x2e6   :  { %3570 = vmax.xlane.f32.xlu1 %v3569_v51  ;;  %v3608_v3 = vsel %vm3229_vm1, %v3099_v43, -inf }
 0x2e7   :  { %v7597_v40 = vpop.xlane.xlu1 %3444 }
 0x2e8   :  { %3576 = vmax.xlane.f32.xlu0 %v3575_v32  ;;  %v7599_v53 = vpop.xlane.xlu2 %3447  ;;  %v3100_v32 = vld.sshfl [vmem:[#allocation1 + $0x30] sm:$0xff pattern:$0x75316420] }
 0x2e9   :  { %v3611_v0 = vsel %vm3229_vm1, %v3100_v32, -inf }
 0x2eb   :  { %v7601_v46 = vpop.xlane.xlu0 %3450 }
 0x2ed   :  { %3582 = vmax.xlane.f32.xlu2 %v3581_v62 }
 0x2ee   :  { %3579 = vmax.xlane.f32.xlu1 %v3578_v38  ;;  %v3605_v38 = vsel %vm3229_vm1, %v3098_v14, -inf  ;;  %v8598_v14 = vld [vmem:[#allocation78_spill] sm:$0xff]  ;;  %vm4735_vm1 = vcmask 785408  }
 0x2ef   :  { %v7609_v6 = vpop.xlane.xlu1 %3453 }
 0x2f0   :  { %3585 = vmax.xlane.f32.xlu0 %v3584_v42  ;;  %v7611_v16 = vpop.xlane.xlu2 %3456 }
 0x2f3   :  { %v7613_v61 = vpop.xlane.xlu0 %3459 }
 0x2f5   :  { %3591 = vmax.xlane.f32.xlu2 %v3590_v50 }
 0x2f6   :  { %3588 = vmax.xlane.f32.xlu1 %v3587_v56 }
 0x2f8   :  { %3594 = vmax.xlane.f32.xlu0 %v3593_v11  ;;  %v7620_v30 = vpop.xlane.xlu1 %3462  ;;  %v7622_v7 = vpop.xlane.xlu2 %3465 }
 0x2fb   :  { %v7624_v15 = vpop.xlane.xlu0 %3468 }
 0x2fd   :  { %3600 = vmax.xlane.f32.xlu2 %v3599_v49 }
 0x2fe   :  { %3597 = vmax.xlane.f32.xlu1 %v3596_v4 }
 0x300   :  { %3603 = vmax.xlane.f32.xlu0 %v3602_v10  ;;  %v7630_v57 = vpop.xlane.xlu1 %3471  ;;  %v7632_v52 = vpop.xlane.xlu2 %3474  ;;  %v8597_v10 = vld [vmem:[#allocation42_spill] sm:$0xff] }
 0x303   :  { %v7634_v51 = vpop.xlane.xlu0 %3477 }
 0x305   :  { %3609 = vmax.xlane.f32.xlu2 %v3608_v3  ;;  %v8602_v3 = vld [vmem:[#allocation77_spill] sm:$0xff] }
 0x306   :  { %3606 = vmax.xlane.f32.xlu1 %v3605_v38 }
 0x308   :  { %3612 = vmax.xlane.f32.xlu0 %v3611_v0  ;;  %v7639_v62 = vpop.xlane.xlu1 %3480  ;;  %v7641_v42 = vpop.xlane.xlu2 %3483 }
 0x30b   :  { %v7643_v19 = vpop.xlane.xlu0 %3486 }
 0x310   :  { %v7645_v56 = vpop.xlane.xlu1 %3489  ;;  %v7647_v50 = vpop.xlane.xlu2 %3492 }
 0x313   :  { %v7649_v11 = vpop.xlane.xlu0 %3495 }
 0x318   :  { %v7651_v27 = vpop.xlane.xlu1 %3498  ;;  %v7653_v4 = vpop.xlane.xlu2 %3501 }
 0x31b   :  { %v7655_v49 = vpop.xlane.xlu0 %3504 }
 0x31c   :  { %8596 = vst [vmem:[#allocation28_spill] sm:$0xff] %v7655_v49  ;;  %3749 = vperm.xlu0 %4895, %v7277_v59   ;;  %v8611_v49 = vld [vmem:[#allocation65_spill] sm:$0xff] }
 0x31d   :  { %3746 = vperm.xlu2 %4894, %v8597_v10  }
 0x31f   :  { %3743 = vperm.xlu1 %4893, %v8598_v14  }
 0x320   :  { %v7662_v32 = vpop.xlane.xlu2 %3510 }
 0x321   :  { %v7660_v43 = vpop.xlane.xlu1 %3507  ;;  %8600 = vst [vmem:[#allocation22_spill] sm:$0xff] %v7662_v32 }
 0x322   :  { %8599 = vst [vmem:[#allocation18_spill] sm:$0xff] %v7660_v43 }
 0x323   :  { %v7664_v38 = vpop.xlane.xlu0 %3513 }
 0x324   :  { %8601 = vst [vmem:[#allocation49_spill] sm:$0xff] %v7664_v38  ;;  %3770 = vperm.xlu0 %4895, %v8602_v3   ;;  %v8604_v38 = vld [vmem:[#allocation40_spill] sm:$0xff] }
 0x325   :  { %3755 = vperm.xlu2 %4894, %v7563_v54  }
 0x327   :  { %3752 = vperm.xlu1 %4893, %v7281_v23   ;;  %v8605_v23 = vld [vmem:[#allocation61_spill] sm:$0xff] }
 0x328   :  { %v3520_v34 = vpop.xlane.xlu2 %3519 }
 0x329   :  { %v7669_v0 = vpop.xlane.xlu1 %3516 }
 0x32a   :  { %8603 = vst [vmem:[#allocation52_spill] sm:$0xff] %v7669_v0 }
 0x32b   :  { %v3523_v59 = vpop.xlane.xlu0 %3522 }
 0x32c   :  { %3779 = vperm.xlu0 %4895, %v7575_v9  }
 0x32d   :  { %3761 = vperm.xlu2 %4894, %v3520_v34  }
 0x32f   :  { %3758 = vperm.xlu1 %4893, %v7573_v33  }
 0x330   :  { %v3529_v14 = vpop.xlane.xlu2 %3528 }
 0x331   :  { %v3526_v10 = vpop.xlane.xlu1 %3525 }
 0x333   :  { %v3532_v8 = vpop.xlane.xlu0 %3531 }
 0x334   :  { %3788 = vperm.xlu0 %4895, %v3529_v14   ;;  %v8606_v14 = vld [vmem:[#allocation20_spill] sm:$0xff] }
 0x335   :  { %3767 = vperm.xlu2 %4894, %v8604_v38  }
 0x337   :  { %3764 = vperm.xlu1 %4893, %v3523_v59  }
 0x338   :  { %v3538_v54 = vpop.xlane.xlu2 %3537 }
 0x339   :  { %v3535_v3 = vpop.xlane.xlu1 %3534 }
 0x33b   :  { %v3541_v43 = vpop.xlane.xlu0 %3540 }
 0x33c   :  { %3797 = vperm.xlu0 %4895, %v7323_v29  }
 0x33d   :  { %3776 = vperm.xlu2 %4894, %v7318_v24   ;;  %v8607_v24 = vld [vmem:[#allocation21_spill] sm:$0xff] }
 0x33f   :  { %3773 = vperm.xlu1 %4893, %v8605_v23   ;;  %v8608_v23 = vld [vmem:[#allocation43_spill] sm:$0xff] }
 0x340   :  { %v3547_v9 = vpop.xlane.xlu2 %3546 }
 0x341   :  { %v3544_v33 = vpop.xlane.xlu1 %3543 }
 0x343   :  { %v7677_v34 = vpop.xlane.xlu0 %3549 }
 0x344   :  { %3806 = vperm.xlu0 %4895, %v7587_v2  }
 0x345   :  { %3785 = vperm.xlu2 %4894, %v3526_v10  }
 0x347   :  { %3782 = vperm.xlu1 %4893, %v7577_v20  }
 0x348   :  { %v7681_v38 = vpop.xlane.xlu2 %3555 }
 0x349   :  { %v7686_v29 = vpop.xlane.xlu1 %3552 }
 0x34b   :  { %v7683_v59 = vpop.xlane.xlu0 %3558 }
 0x34c   :  { %3815 = vperm.xlu0 %4895, %v8606_v14  }
 0x34d   :  { %3794 = vperm.xlu2 %4894, %v8607_v24  }
 0x34f   :  { %3791 = vperm.xlu1 %4893, %v8608_v23   ;;  %v8609_v23 = vld [vmem:[#allocation69_spill] sm:$0xff] }
 0x350   :  { %v7690_v0 = vpop.xlane.xlu2 %3564 }
 0x351   :  { %v7695_v2 = vpop.xlane.xlu1 %3561 }
 0x353   :  { %v7692_v12 = vpop.xlane.xlu0 %3567 }
 0x354   :  { %3824 = vperm.xlu0 %4895, %v7363_v5   ;;  %v8610_v5 = vld [vmem:[#allocation67_spill] sm:$0xff] }
 0x355   :  { %3803 = vperm.xlu2 %4894, %v7585_v39  }
 0x357   :  { %3800 = vperm.xlu1 %4893, %v7326_v28  }
 0x358   :  { %v7699_v20 = vpop.xlane.xlu2 %3573 }
 0x359   :  { %v7703_v14 = vpop.xlane.xlu1 %3570 }
 0x35b   :  { %v7701_v10 = vpop.xlane.xlu0 %3576 }
 0x35c   :  { %3833 = vperm.xlu0 %4895, %v3538_v54  }
 0x35d   :  { %3812 = vperm.xlu2 %4894, %v3535_v3  }
 0x35f   :  { %3809 = vperm.xlu1 %4893, %v3532_v8  }
 0x360   :  { %v7705_v24 = vpop.xlane.xlu2 %3582 }
 0x361   :  { %v7714_v32 = vpop.xlane.xlu1 %3579 }
 0x363   :  { %v7710_v39 = vpop.xlane.xlu0 %3585 }
 0x364   :  { %3842 = vperm.xlu0 %4895, %v8609_v23  }
 0x365   :  { %3821 = vperm.xlu2 %4894, %v8610_v5  }
 0x367   :  { %3818 = vperm.xlu1 %4893, %v8611_v49   ;;  %v8612_v49 = vld [vmem:[#allocation41_spill] sm:$0xff] }
 0x368   :  { %v7712_v28 = vpop.xlane.xlu2 %3591 }
 0x369   :  { %v7723_v54 = vpop.xlane.xlu1 %3588 }
 0x36b   :  { %v7719_v8 = vpop.xlane.xlu0 %3594 }
 0x36c   :  { %3851 = vperm.xlu0 %4895, %v7599_v53  }
 0x36d   :  { %3830 = vperm.xlu2 %4894, %v7597_v40  }
 0x36f   :  { %3827 = vperm.xlu1 %4893, %v7589_v13  }
 0x370   :  { %v7721_v3 = vpop.xlane.xlu2 %3600 }
 0x371   :  { %v7731_v53 = vpop.xlane.xlu1 %3597 }
 0x372   :  { %8615 = vst [vmem:[#allocation39_spill] sm:$0xff] %v7731_v53 }
 0x373   :  { %v7728_v5 = vpop.xlane.xlu0 %3603 }
 0x374   :  { %3860 = vperm.xlu0 %4895, %v3547_v9   ;;  %8614 = vst [vmem:[#allocation70_spill] sm:$0xff] %v7728_v5  ;;  %v8619_v5 = vld [vmem:[#allocation29_spill] sm:$0xff] }
 0x375   :  { %3839 = vperm.xlu2 %4894, %v8612_v49   ;;  %v8618_v49 = vld [vmem:[#allocation46_spill] sm:$0xff] }
 0x377   :  { %3836 = vperm.xlu1 %4893, %v3541_v43  }
 0x378   :  { %v7726_v23 = vpop.xlane.xlu2 %3609 }
 0x379   :  { %8613 = vst [vmem:[#allocation66_spill] sm:$0xff] %v7726_v23  ;;  %v7739_v43 = vpop.xlane.xlu1 %3606  ;;  %v8620_v23 = vld [vmem:[#allocation26_spill] sm:$0xff] }
 0x37a   :  { %8617 = vst [vmem:[#allocation25_spill] sm:$0xff] %v7739_v43 }
 0x37b   :  { %v7736_v40 = vpop.xlane.xlu0 %3612 }
 0x37c   :  { %3869 = vperm.xlu0 %4895, %v7396_v55   ;;  %8616 = vst [vmem:[#allocation44_spill] sm:$0xff] %v7736_v40 }
 0x37d   :  { %3848 = vperm.xlu2 %4894, %v7390_v58   ;;  %v4126_v58 = vlaneseq }
 0x37f   :  { %3845 = vperm.xlu1 %4893, %v7371_v45  }
 0x380   :  { %v3747_v13 = vpop.permute.xlu2 %3746 }
 0x384   :  { %3878 = vperm.xlu0 %4895, %v7611_v16   ;;  %v7745_v16 = vand.u32 127, %v4126_v58 }
 0x385   :  { %3857 = vperm.xlu2 %4894, %v3544_v33  }
 0x387   :  { %3854 = vperm.xlu1 %4893, %v7601_v46   ;;  %v7750_v46 = vadd.s32 4294967288, %v7745_v16 }
 0x388   :  { %v3756_v9 = vpop.permute.xlu2 %3755 }
 0x38c   :  { %3887 = vperm.xlu0 %4895, %v8618_v49  }
 0x38d   :  { %3866 = vperm.xlu2 %4894, %v8619_v5  }
 0x38e   :  { %v3750_v55 = vpop.permute.xlu0 %3749 }
 0x38f   :  { %3863 = vperm.xlu1 %4893, %v8620_v23  }
 0x390   :  { %v3762_v53 = vpop.permute.xlu2 %3761 }
 0x391   :  { %v3744_v45 = vpop.permute.xlu1 %3743 }
 0x394   :  { %3896 = vperm.xlu0 %4895, %v7422_v48  }
 0x395   :  { %3875 = vperm.xlu2 %4894, %v7609_v6   ;;  %v4133_v6 = vperm.slane %v3750_v55, %v7745_v16 }
 0x396   :  { %v3771_v33 = vpop.permute.xlu0 %3770 }
 0x397   :  { %3872 = vperm.xlu1 %4893, %v7399_v21   ;;  %v4143_v5 = vperm.slane %v3771_v33, %v7750_v46  ;;  %v4128_v21 = vperm.slane %v3744_v45, %v7745_v16  ;;  %v4130_v33 = vperm.slane %v3747_v13, %v7750_v46 }
 0x398   :  { %v3768_v40 = vpop.permute.xlu2 %3767 }
 0x399   :  { %v3753_v49 = vpop.permute.xlu1 %3752  ;;  %v4142_v23 = vperm.slane %v3768_v40, %v7745_v16  ;;  %v4132_v55 = vsel %vm4131_vm2, %v4130_v33, %v4128_v21 }
 0x39a   :  { %v4134_v48 = vperm.slane %v3753_v49, %v7750_v46 }
 0x39b   :  { %v4144_v58 = vsel %vm4131_vm2, %v4143_v5, %v4142_v23  ;;  %v8621_v23 = vld [vmem:[#allocation47_spill] sm:$0xff] }
 0x39c   :  { %3905 = vperm.xlu0 %4895, %v7681_v38   ;;  %v4135_v40 = vsel %vm4131_vm2, %v4134_v48, %v4133_v6  ;;  %v4136_v38 = vperm.slane %v3756_v9, %v7745_v16  ;;  %v8622_v48 = vld [vmem:[#allocation50_spill] sm:$0xff]  ;;  %v4139_v6 = vperm.slane %v3762_v53, %v7745_v16 }
 0x39d   :  { %3884 = vperm.xlu2 %4894, %v7686_v29   ;;  %v4323_v45 = vsel %vm4322_vm3, %v4135_v40, %v4132_v55 }
 0x39e   :  { %v3780_v43 = vpop.permute.xlu0 %3779 }
 0x39f   :  { %3881 = vperm.xlu1 %4893, %v7677_v34  }
 0x3a0   :  { %v3777_v5 = vpop.permute.xlu2 %3776 }
 0x3a1   :  { %v3759_v17 = vpop.permute.xlu1 %3758 }
 0x3a2   :  { %v4137_v49 = vperm.slane %v3759_v17, %v7750_v46 }
 0x3a4   :  { %v4138_v29 = vsel %vm4131_vm2, %v4137_v49, %v4136_v38  ;;  %3914 = vperm.xlu0 %4895, %v8621_v23  }
 0x3a5   :  { %v4325_v34 = vsel %vm4324_vm4, %v4138_v29, %v4323_v45  ;;  %3893 = vperm.xlu2 %4894, %v7419_v18   ;;  %v4146_v45 = vperm.slane %v3777_v5, %v7750_v46 }
 0x3a6   :  { %v3789_v13 = vpop.permute.xlu0 %3788 }
 0x3a7   :  { %3890 = vperm.xlu1 %4893, %v8622_v48   ;;  %v4152_v33 = vperm.slane %v3789_v13, %v7750_v46  ;;  %v8623_v48 = vld [vmem:[#allocation55_spill] sm:$0xff] }
 0x3a8   :  { %v3786_v21 = vpop.permute.xlu2 %3785 }
 0x3a9   :  { %v3765_v9 = vpop.permute.xlu1 %3764  ;;  %v4151_v40 = vperm.slane %v3786_v21, %v7745_v16 }
 0x3aa   :  { %v4140_v17 = vperm.slane %v3765_v9, %v7750_v46 }
 0x3ab   :  { %v4153_v18 = vsel %vm4131_vm2, %v4152_v33, %v4151_v40 }
 0x3ac   :  { %v4141_v38 = vsel %vm4131_vm2, %v4140_v17, %v4139_v6  ;;  %3923 = vperm.xlu0 %4895, %v7622_v7  }
 0x3ad   :  { %v7779_v49 = vsel %vm4326_vm5, %v4141_v38, %v4325_v34  ;;  %3902 = vperm.xlu2 %4894, %v7620_v30  }
 0x3ae   :  { %v3798_v55 = vpop.permute.xlu0 %3797 }
 0x3af   :  { %3899 = vperm.xlu1 %4893, %v7613_v61   ;;  %v4148_v61 = vperm.slane %v3780_v43, %v7745_v16 }
 0x3b0   :  { %v3795_v23 = vpop.permute.xlu2 %3794 }
 0x3b1   :  { %v3774_v53 = vpop.permute.xlu1 %3773  ;;  %v4155_v40 = vperm.slane %v3795_v23, %v7750_v46 }
 0x3b2   :  { %v4145_v29 = vperm.slane %v3774_v53, %v7745_v16 }
 0x3b4   :  { %v4147_v13 = vsel %vm4131_vm2, %v4146_v45, %v4145_v29  ;;  %3932 = vperm.xlu0 %4895, %v7690_v0  }
 0x3b5   :  { %v4328_v7 = vsel %vm4322_vm3, %v4147_v13, %v4144_v58  ;;  %3911 = vperm.xlu2 %4894, %v8623_v48  }
 0x3b6   :  { %v3807_v34 = vpop.permute.xlu0 %3806 }
 0x3b7   :  { %3908 = vperm.xlu1 %4893, %v7683_v59   ;;  %v4161_v6 = vperm.slane %v3807_v34, %v7750_v46  ;;  %v8624_v34 = vld [vmem:[#allocation73_spill] sm:$0xff] }
 0x3b8   :  { %v3804_v5 = vpop.permute.xlu2 %3803 }
 0x3b9   :  { %v3783_v30 = vpop.permute.xlu1 %3782  ;;  %v4160_v17 = vperm.slane %v3804_v5, %v7745_v16 }
 0x3ba   :  { %v4149_v9 = vperm.slane %v3783_v30, %v7750_v46  ;;  %v8625_v30 = vld [vmem:[#allocation74_spill] sm:$0xff] }
 0x3bb   :  { %v4162_v58 = vsel %vm4131_vm2, %v4161_v6, %v4160_v17 }
 0x3bc   :  { %v4150_v21 = vsel %vm4131_vm2, %v4149_v9, %v4148_v61  ;;  %3941 = vperm.xlu0 %4895, %v7451_v26  }
 0x3bd   :  { %v4329_v0 = vsel %vm4324_vm4, %v4150_v21, %v4328_v7  ;;  %3920 = vperm.xlu2 %4894, %v7448_v63   ;;  %v4157_v63 = vperm.slane %v3798_v55, %v7745_v16  ;;  %v8626_v55 = vld [vmem:[#allocation13_spill] sm:$0xff] }
 0x3be   :  { %v7800_v59 = vsel %vm4326_vm5, %v4153_v18, %v4329_v0  ;;  %v3816_v33 = vpop.permute.xlu0 %3815 }
 0x3bf   :  { %3917 = vperm.xlu1 %4893, %v7428_v44  }
 0x3c0   :  { %v3813_v53 = vpop.permute.xlu2 %3812 }
 0x3c1   :  { %v3792_v43 = vpop.permute.xlu1 %3791  ;;  %v4164_v9 = vperm.slane %v3813_v53, %v7750_v46  ;;  %v4166_v53 = vperm.slane %v3816_v33, %v7745_v16 }
 0x3c2   :  { %v4154_v38 = vperm.slane %v3792_v43, %v7745_v16 }
 0x3c4   :  { %v4156_v26 = vsel %vm4131_vm2, %v4155_v40, %v4154_v38  ;;  %3950 = vperm.xlu0 %4895, %v7632_v52  }
 0x3c5   :  { %3929 = vperm.xlu2 %4894, %v7695_v2  }
 0x3c6   :  { %v3825_v45 = vpop.permute.xlu0 %3824 }
 0x3c7   :  { %3926 = vperm.xlu1 %4893, %v7624_v15   ;;  %v4170_v23 = vperm.slane %v3825_v45, %v7750_v46 }
 0x3c8   :  { %v3822_v29 = vpop.permute.xlu2 %3821 }
 0x3c9   :  { %v3801_v18 = vpop.permute.xlu1 %3800  ;;  %v4169_v13 = vperm.slane %v3822_v29, %v7745_v16 }
 0x3ca   :  { %v4158_v44 = vperm.slane %v3801_v18, %v7750_v46 }
 0x3cb   :  { %v4171_v2 = vsel %vm4131_vm2, %v4170_v23, %v4169_v13 }
 0x3cc   :  { %v4159_v7 = vsel %vm4131_vm2, %v4158_v44, %v4157_v63  ;;  %3959 = vperm.xlu0 %4895, %v8624_v34   ;;  %v8628_v34 = vld [vmem:[#allocation81_spill] sm:$0xff] }
 0x3cd   :  { %v4331_v52 = vsel %vm4322_vm3, %v4159_v7, %v4156_v26  ;;  %3938 = vperm.xlu2 %4894, %v8625_v30  }
 0x3ce   :  { %v3834_v48 = vpop.permute.xlu0 %3833  ;;  %v4332_v15 = vsel %vm4324_vm4, %v4162_v58, %v4331_v52  ;;  %v8627_v58 = vld [vmem:[#allocation68_spill] sm:$0xff] }
 0x3cf   :  { %3935 = vperm.xlu1 %4893, %v8626_v55  }
 0x3d0   :  { %v3831_v6 = vpop.permute.xlu2 %3830 }
 0x3d1   :  { %v3810_v61 = vpop.permute.xlu1 %3809  ;;  %v4173_v33 = vperm.slane %v3831_v6, %v7750_v46 }
 0x3d2   :  { %v4163_v5 = vperm.slane %v3810_v61, %v7745_v16 }
 0x3d4   :  { %v4165_v17 = vsel %vm4131_vm2, %v4164_v9, %v4163_v5  ;;  %3968 = vperm.xlu0 %4895, %v7478_v60   ;;  %v8630_v5 = vld [vmem:[#allocation8_spill] sm:$0xff] }
 0x3d5   :  { %v4333_v21 = vsel %vm4326_vm5, %v4165_v17, %v4332_v15  ;;  %3947 = vperm.xlu2 %4894, %v7630_v57  }
 0x3d6   :  { %v4389_v0 = vrot.slane %v4333_v21, 4  ;;  %v3843_v43 = vpop.permute.xlu0 %3842 }
 0x3d7   :  { %3944 = vperm.xlu1 %4893, %v8627_v58   ;;  %v4179_v18 = vperm.slane %v3843_v43, %v7750_v46 }
 0x3d8   :  { %v4390_v40 = vsel %vm662_vm0, %v4389_v0, %v7779_v49  ;;  %v3840_v45 = vpop.permute.xlu2 %3839 }
 0x3d9   :  { %v3819_v38 = vpop.permute.xlu1 %3818  ;;  %v4178_v60 = vperm.slane %v3840_v45, %v7745_v16  ;;  %v4394_v6 = vperm.slane %v4390_v40, %v8630_v5 }
 0x3da   :  { %v4167_v26 = vperm.slane %v3819_v38, %v7750_v46 }
 0x3db   :  { %v4180_v44 = vsel %vm4131_vm2, %v4179_v18, %v4178_v60  ;;  %v4415_v43 = vrot.slane %v4394_v6, 4  ;;  %v8631_v60 = vld [vmem:[#allocation30_spill] sm:$0xff] }
 0x3dc   :  { %v4168_v63 = vsel %vm4131_vm2, %v4167_v26, %v4166_v53  ;;  %3977 = vperm.xlu0 %4895, %v7699_v20  }
 0x3dd   :  { %v4334_v57 = vsel %vm4322_vm3, %v4171_v2, %v4168_v63  ;;  %3956 = vperm.xlu2 %4894, %v7703_v14   ;;  %v8629_v2 = vld [vmem:[#allocation62_spill] sm:$0xff] }
 0x3de   :  { %v3852_v29 = vpop.permute.xlu0 %3851 }
 0x3df   :  { %3953 = vperm.xlu1 %4893, %v7692_v12   ;;  %v4175_v12 = vperm.slane %v3834_v48, %v7745_v16 }
 0x3e0   :  { %v3849_v13 = vpop.permute.xlu2 %3848 }
 0x3e1   :  { %v3828_v49 = vpop.permute.xlu1 %3827 }
 0x3e2   :  { %v4172_v23 = vperm.slane %v3828_v49, %v7745_v16 }
 0x3e4   :  { %v4174_v7 = vsel %vm4131_vm2, %v4173_v33, %v4172_v23  ;;  %3986 = vperm.xlu0 %4895, %v8628_v34  }
 0x3e5   :  { %v4335_v20 = vsel %vm4324_vm4, %v4174_v7, %v4334_v57  ;;  %3965 = vperm.xlu2 %4894, %v7472_v31   ;;  %v4184_v57 = vperm.slane %v3852_v29, %v7745_v16 }
 0x3e6   :  { %v3861_v52 = vpop.permute.xlu0 %3860 }
 0x3e7   :  { %3962 = vperm.xlu1 %4893, %v8629_v2   ;;  %v4188_v55 = vperm.slane %v3861_v52, %v7750_v46 }
 0x3e8   :  { %v3858_v30 = vpop.permute.xlu2 %3857 }
 0x3e9   :  { %v3837_v14 = vpop.permute.xlu1 %3836  ;;  %v4187_v61 = vperm.slane %v3858_v30, %v7745_v16 }
 0x3ea   :  { %v4176_v15 = vperm.slane %v3837_v14, %v7750_v46 }
 0x3eb   :  { %v4189_v17 = vsel %vm4131_vm2, %v4188_v55, %v4187_v61  ;;  %v8632_v55 = vld [vmem:[#allocation14_spill] sm:$0xff] }
 0x3ec   :  { %v4177_v9 = vsel %vm4131_vm2, %v4176_v15, %v4175_v12  ;;  %3995 = vperm.xlu0 %4895, %v7641_v42   ;;  %v4182_v42 = vperm.slane %v3849_v13, %v7750_v46 }
 0x3ed   :  { %v4336_v31 = vsel %vm4326_vm5, %v4177_v9, %v4335_v20  ;;  %3974 = vperm.xlu2 %4894, %v7639_v62  }
 0x3ee   :  { %v4395_v21 = vrot.slane %v4336_v31, 4  ;;  %v3870_v0 = vpop.permute.xlu0 %3869 }
 0x3ef   :  { %3971 = vperm.xlu1 %4893, %v7634_v51  }
 0x3f0   :  { %v4396_v48 = vsel %vm662_vm0, %v4395_v21, %v7800_v59  ;;  %v3867_v53 = vpop.permute.xlu2 %3866 }
 0x3f1   :  { %v4400_v58 = vperm.slane %v4396_v48, %v8630_v5  ;;  %v3846_v38 = vpop.permute.xlu1 %3845  ;;  %v4191_v20 = vperm.slane %v3867_v53, %v7750_v46 }
 0x3f2   :  { %v4181_v40 = vperm.slane %v3846_v38, %v7745_v16 }
 0x3f3   :  { %v4413_v26 = vrot.slane %v4400_v58, 4  ;;  %v7864_v45 = vsel %vm662_vm0, %v4400_v58, %v4415_v43 }
 0x3f4   :  { %v4183_v62 = vsel %vm4131_vm2, %v4182_v42, %v4181_v40  ;;  %4004 = vperm.xlu0 %4895, %v7705_v24  }
 0x3f5   :  { %v4337_v51 = vsel %vm4322_vm3, %v4183_v62, %v4180_v44  ;;  %v7870_v59 = vsel %vm662_vm0, %v4413_v26, %v4394_v6  ;;  %3983 = vperm.xlu2 %4894, %v8631_v60   ;;  %v8633_v6 = vld [vmem:[#allocation63_spill] sm:$0xff]  ;;  %v8636_v62 = vld [vmem:[#allocation58_spill] sm:$0xff] }
 0x3f6   :  { %v3879_v18 = vpop.permute.xlu0 %3878 }
 0x3f7   :  { %3980 = vperm.xlu1 %4893, %v7701_v10   ;;  %v4197_v23 = vperm.slane %v3879_v18, %v7750_v46 }
 0x3f8   :  { %v3876_v33 = vpop.permute.xlu2 %3875 }
 0x3f9   :  { %v3855_v63 = vpop.permute.xlu1 %3854  ;;  %v4196_v24 = vperm.slane %v3876_v33, %v7745_v16 }
 0x3fa   :  { %v4185_v49 = vperm.slane %v3855_v63, %v7750_v46 }
 0x3fb   :  { %v4198_v7 = vsel %vm4131_vm2, %v4197_v23, %v4196_v24 }
 0x3fc   :  { %v4186_v44 = vsel %vm4131_vm2, %v4185_v49, %v4184_v57  ;;  %4013 = vperm.xlu0 %4895, %v7498_v35  }
 0x3fd   :  { %v4338_v13 = vsel %vm4324_vm4, %v4186_v44, %v4337_v51  ;;  %3992 = vperm.xlu2 %4894, %v7495_v47   ;;  %v4193_v47 = vperm.slane %v3870_v0, %v7745_v16 }
 0x3fe   :  { %v7883_v10 = vsel %vm4326_vm5, %v4189_v17, %v4338_v13  ;;  %v3888_v34 = vpop.permute.xlu0 %3887 }
 0x3ff   :  { %3989 = vperm.xlu1 %4893, %v7481_v25  }
 0x400   :  { %v3885_v2 = vpop.permute.xlu2 %3884 }
 0x401   :  { %v3864_v29 = vpop.permute.xlu1 %3863  ;;  %v4200_v31 = vperm.slane %v3885_v2, %v7750_v46  ;;  %v8637_v2 = vld [vmem:[#allocation17_spill] sm:$0xff] }
 0x402   :  { %v4190_v52 = vperm.slane %v3864_v29, %v7745_v16 }
 0x404   :  { %v4192_v35 = vsel %vm4131_vm2, %v4191_v20, %v4190_v52  ;;  %4022 = vperm.xlu0 %4895, %v7647_v50  }
 0x405   :  { %4001 = vperm.xlu2 %4894, %v7714_v32   ;;  %v8634_v32 = vld [vmem:[#allocation15_spill] sm:$0xff] }
 0x406   :  { %v3897_v14 = vpop.permute.xlu0 %3896 }
 0x407   :  { %3998 = vperm.xlu1 %4893, %v7643_v19  }
 0x408   :  { %v3894_v15 = vpop.permute.xlu2 %3893 }
 0x409   :  { %v3873_v12 = vpop.permute.xlu1 %3872 }
 0x40a   :  { %v4194_v25 = vperm.slane %v3873_v12, %v7750_v46 }
 0x40c   :  { %v4195_v30 = vsel %vm4131_vm2, %v4194_v25, %v4193_v47  ;;  %4031 = vperm.xlu0 %4895, %v8632_v55  }
 0x40d   :  { %v4340_v61 = vsel %vm4322_vm3, %v4195_v30, %v4192_v35  ;;  %4010 = vperm.xlu2 %4894, %v8633_v6  }
 0x40e   :  { %v3906_v9 = vpop.permute.xlu0 %3905  ;;  %v4341_v50 = vsel %vm4324_vm4, %v4198_v7, %v4340_v61 }
 0x40f   :  { %4007 = vperm.xlu1 %4893, %v8634_v32   ;;  %v4211_v57 = vperm.slane %v3906_v9, %v7745_v16 }
 0x410   :  { %v3903_v21 = vpop.permute.xlu2 %3902 }
 0x411   :  { %v3882_v19 = vpop.permute.xlu1 %3881  ;;  %v4209_v60 = vperm.slane %v3903_v21, %v7750_v46 }
 0x412   :  { %v4199_v17 = vperm.slane %v3882_v19, %v7745_v16 }
 0x414   :  { %v4201_v0 = vsel %vm4131_vm2, %v4200_v31, %v4199_v17  ;;  %4040 = vperm.xlu0 %4895, %v7521_v1   ;;  %v8635_v1 = vld [vmem:[#allocation34_spill] sm:$0xff] }
 0x415   :  { %v7906_v48 = vsel %vm4326_vm5, %v4201_v0, %v4341_v50  ;;  %4019 = vperm.xlu2 %4894, %v7645_v56  }
 0x416   :  { %v3915_v43 = vpop.permute.xlu0 %3914 }
 0x417   :  { %4016 = vperm.xlu1 %4893, %v7504_v36   ;;  %v4215_v35 = vperm.slane %v3915_v43, %v7750_v46  ;;  %v8638_v43 = vld [vmem:[#allocation38_spill] sm:$0xff] }
 0x418   :  { %v3912_v38 = vpop.permute.xlu2 %3911 }
 0x419   :  { %v3891_v58 = vpop.permute.xlu1 %3890 }
 0x41a   :  { %v4203_v51 = vperm.slane %v3891_v58, %v7750_v46 }
 0x41c   :  { %4049 = vperm.xlu0 %4895, %v7712_v28  }
 0x41d   :  { %4028 = vperm.xlu2 %4894, %v7723_v54   ;;  %v4202_v54 = vperm.slane %v3888_v34, %v7745_v16 }
 0x41e   :  { %v3924_v42 = vpop.permute.xlu0 %3923 }
 0x41f   :  { %4025 = vperm.xlu1 %4893, %v7710_v39   ;;  %v4205_v39 = vperm.slane %v3894_v15, %v7745_v16  ;;  %v4204_v49 = vsel %vm4131_vm2, %v4203_v51, %v4202_v54  ;;  %v4220_v25 = vperm.slane %v3924_v42, %v7745_v16 }
 0x420   :  { %v3921_v53 = vpop.permute.xlu2 %3920 }
 0x421   :  { %v3900_v40 = vpop.permute.xlu1 %3899  ;;  %v4218_v20 = vperm.slane %v3921_v53, %v7750_v46 }
 0x422   :  { %v4208_v28 = vperm.slane %v3900_v40, %v7745_v16 }
 0x424   :  { %4058 = vperm.xlu0 %4895, %v8635_v1  }
 0x425   :  { %4037 = vperm.xlu2 %4894, %v7519_v41   ;;  %v4206_v41 = vperm.slane %v3897_v14, %v7750_v46 }
 0x426   :  { %v3933_v26 = vpop.permute.xlu0 %3932 }
 0x427   :  { %4034 = vperm.xlu1 %4893, %v8636_v62   ;;  %v4207_v33 = vsel %vm4131_vm2, %v4206_v41, %v4205_v39  ;;  %v4224_v55 = vperm.slane %v3933_v26, %v7750_v46 }
 0x428   :  { %v3930_v36 = vpop.permute.xlu2 %3929  ;;  %v4343_v44 = vsel %vm4322_vm3, %v4207_v33, %v4204_v49 }
 0x429   :  { %v3909_v56 = vpop.permute.xlu1 %3908  ;;  %v4223_v14 = vperm.slane %v3930_v36, %v7745_v16  ;;  %v8640_v36 = vld [vmem:[#allocation22_spill] sm:$0xff] }
 0x42a   :  { %v4212_v18 = vperm.slane %v3909_v56, %v7750_v46 }
 0x42b   :  { %v4225_v32 = vsel %vm4131_vm2, %v4224_v55, %v4223_v14  ;;  %v8644_v14 = vld [vmem:[#allocation19_spill] sm:$0xff]  ;;  %v8646_v55 = vld [vmem:[#allocation24_spill] sm:$0xff] }
 0x42c   :  { %4067 = vperm.xlu0 %4895, %v7653_v4   ;;  %v4210_v4 = vsel %vm4131_vm2, %v4209_v60, %v4208_v28  ;;  %v4213_v23 = vsel %vm4131_vm2, %v4212_v18, %v4211_v57  ;;  %v8641_v18 = vld [vmem:[#allocation39_spill] sm:$0xff]  ;;  %v8642_v60 = vld [vmem:[#allocation28_spill] sm:$0xff] }
 0x42d   :  { %4046 = vperm.xlu2 %4894, %v7651_v27   ;;  %v4344_v7 = vsel %vm4324_vm4, %v4210_v4, %v4343_v44 }
 0x42e   :  { %v7923_v63 = vpop.permute.xlu0 %3941  ;;  %v4345_v34 = vsel %vm4326_vm5, %v4213_v23, %v4344_v7 }
 0x42f   :  { %4043 = vperm.xlu1 %4893, %v7649_v11   ;;  %v4214_v11 = vperm.slane %v3912_v38, %v7745_v16  ;;  %v4401_v52 = vrot.slane %v4345_v34, 4  ;;  %v8639_v38 = vld [vmem:[#allocation9_spill] sm:$0xff]  ;;  %v4229_v44 = vperm.slane %v7923_v63, %v7745_v16 }
 0x430   :  { %v3939_v13 = vpop.permute.xlu2 %3938  ;;  %v4424_v42 = vperm.slane %v7864_v45, %v8639_v38 }
 0x431   :  { %v3918_v24 = vpop.permute.xlu1 %3917  ;;  %v4402_v61 = vsel %vm662_vm0, %v4401_v52, %v7883_v10  ;;  %v4227_v40 = vperm.slane %v3939_v13, %v7750_v46 }
 0x432   :  { %v4217_v27 = vperm.slane %v3918_v24, %v7745_v16  ;;  %v4406_v17 = vperm.slane %v4402_v61, %v8630_v5  ;;  %v4443_v28 = vrot.slane %v4424_v42, 4 }
 0x434   :  { %4076 = vperm.xlu0 %4895, %v7721_v3   ;;  %v4219_v12 = vsel %vm4131_vm2, %v4218_v20, %v4217_v27  ;;  %v4216_v3 = vsel %vm4131_vm2, %v4215_v35, %v4214_v11  ;;  %v4427_v62 = vrot.slane %v4406_v17, 4  ;;  %v8643_v20 = vld [vmem:[#allocation23_spill] sm:$0xff] }
 0x435   :  { %4055 = vperm.xlu2 %4894, %v8637_v2   ;;  %v4346_v50 = vsel %vm4322_vm3, %v4219_v12, %v4216_v3  ;;  %v8645_v12 = vld [vmem:[#allocation36_spill] sm:$0xff] }
 0x436   :  { %v3951_v29 = vpop.permute.xlu0 %3950 }
 0x437   :  { %4052 = vperm.xlu1 %4893, %v7719_v8   ;;  %v4233_v8 = vperm.slane %v3951_v29, %v7750_v46 }
 0x438   :  { %v3948_v30 = vpop.permute.xlu2 %3947 }
 0x439   :  { %v3927_v47 = vpop.permute.xlu1 %3926  ;;  %v4232_v9 = vperm.slane %v3948_v30, %v7745_v16 }
 0x43a   :  { %v4221_v15 = vperm.slane %v3927_v47, %v7750_v46 }
 0x43b   :  { %v4234_v31 = vsel %vm4131_vm2, %v4233_v8, %v4232_v9  ;;  %v8647_v9 = vld [vmem:[#allocation18_spill] sm:$0xff] }
 0x43c   :  { %v4222_v6 = vsel %vm4131_vm2, %v4221_v15, %v4220_v25  ;;  %4085 = vperm.xlu0 %4895, %v7545_v37  }
 0x43d   :  { %v4347_v19 = vsel %vm4324_vm4, %v4222_v6, %v4346_v50  ;;  %4064 = vperm.xlu2 %4894, %v7543_v22   ;;  %v4420_v22 = vperm.slane %v7870_v59, %v8639_v38  ;;  %v8648_v50 = vld [vmem:[#allocation45_spill] sm:$0xff] }
 0x43e   :  { %v4348_v10 = vsel %vm4326_vm5, %v4225_v32, %v4347_v19  ;;  %v7961_v21 = vpop.permute.xlu0 %3959 }
 0x43f   :  { %v4407_v0 = vrot.slane %v4348_v10, 4  ;;  %4061 = vperm.xlu1 %4893, %v8638_v43   ;;  %v4439_v59 = vrot.slane %v4420_v22, 4  ;;  %v4238_v32 = vperm.slane %v7961_v21, %v7745_v16  ;;  %v8649_v43 = vld [vmem:[#allocation66_spill] sm:$0xff] }
 0x440   :  { %v3957_v26 = vpop.permute.xlu2 %3956 }
 0x441   :  { %v4408_v37 = vsel %vm662_vm0, %v4407_v0, %v7906_v48  ;;  %v3936_v58 = vpop.permute.xlu1 %3935  ;;  %v4236_v3 = vperm.slane %v3957_v26, %v7750_v46 }
 0x442   :  { %v4412_v53 = vperm.slane %v4408_v37, %v8630_v5  ;;  %v4226_v1 = vperm.slane %v3936_v58, %v7745_v16 }
 0x444   :  { %v4228_v56 = vsel %vm4131_vm2, %v4227_v40, %v4226_v1  ;;  %4094 = vperm.xlu0 %4895, %v8640_v36   ;;  %v4425_v48 = vrot.slane %v4412_v53, 4  ;;  %v4428_v51 = vsel %vm662_vm0, %v4412_v53, %v4427_v62  ;;  %v8650_v40 = vld [vmem:[#allocation25_spill] sm:$0xff]  ;;  %v8651_v53 = vld [vmem:[#allocation70_spill] sm:$0xff] }
 0x445   :  { %v4436_v45 = vperm.slane %v4428_v51, %v8639_v38  ;;  %4073 = vperm.xlu2 %4894, %v8641_v18   ;;  %v8653_v51 = vld [vmem:[#allocation57_spill] sm:$0xff] }
 0x446   :  { %v3969_v54 = vpop.permute.xlu0 %3968  ;;  %v4426_v39 = vsel %vm662_vm0, %v4425_v48, %v4406_v17  ;;  %v8652_v48 = vld [vmem:[#allocation85_spill] sm:$0xff] }
 0x447   :  { %4070 = vperm.xlu1 %4893, %v8642_v60   ;;  %v4432_v41 = vperm.slane %v4426_v39, %v8639_v38  ;;  %v7983_v57 = vsel %vm662_vm0, %v4436_v45, %v4443_v28  ;;  %v4441_v49 = vrot.slane %v4436_v45, 4  ;;  %v4242_v34 = vperm.slane %v3969_v54, %v7750_v46 }
 0x448   :  { %v3966_v7 = vpop.permute.xlu2 %3965 }
 0x449   :  { %v3945_v4 = vpop.permute.xlu1 %3944  ;;  %v7986_v33 = vsel %vm662_vm0, %v4432_v41, %v4439_v59  ;;  %v4437_v23 = vrot.slane %v4432_v41, 4  ;;  %v7989_v24 = vsel %vm662_vm0, %v4441_v49, %v4424_v42  ;;  %v4241_v27 = vperm.slane %v3966_v7, %v7745_v16 }
 0x44a   :  { %v4230_v13 = vperm.slane %v3945_v4, %v7750_v46 }
 0x44b   :  { %v7997_v11 = vsel %vm662_vm0, %v4437_v23, %v4420_v22  ;;  %v4243_v2 = vsel %vm4131_vm2, %v4242_v34, %v4241_v27  ;;  %v8654_v23 = vld [vmem:[#allocation52_spill] sm:$0xff] }
 0x44c   :  { %v4231_v29 = vsel %vm4131_vm2, %v4230_v13, %v4229_v44  ;;  %4103 = vperm.xlu0 %4895, %v8643_v20   ;;  %v8655_v44 = vld [vmem:[#allocation49_spill] sm:$0xff] }
 0x44d   :  { %v4349_v52 = vsel %vm4322_vm3, %v4231_v29, %v4228_v56  ;;  %4082 = vperm.xlu2 %4894, %v8644_v14  }
 0x44e   :  { %v3978_v35 = vpop.permute.xlu0 %3977  ;;  %v4350_v63 = vsel %vm4324_vm4, %v4234_v31, %v4349_v52 }
 0x44f   :  { %4079 = vperm.xlu1 %4893, %v8645_v12   ;;  %v4247_v28 = vperm.slane %v3978_v35, %v7745_v16 }
 0x450   :  { %v3975_v15 = vpop.permute.xlu2 %3974 }
 0x451   :  { %v3954_v47 = vpop.permute.xlu1 %3953  ;;  %v4245_v1 = vperm.slane %v3975_v15, %v7750_v46 }
 0x452   :  { %v4235_v25 = vperm.slane %v3954_v47, %v7745_v16 }
 0x454   :  { %v4237_v30 = vsel %vm4131_vm2, %v4236_v3, %v4235_v25  ;;  %4112 = vperm.xlu0 %4895, %v8646_v55  }
 0x455   :  { %v8011_v61 = vsel %vm4326_vm5, %v4237_v30, %v4350_v63  ;;  %4091 = vperm.xlu2 %4894, %v8647_v9  }
 0x456   :  { %v3987_v8 = vpop.permute.xlu0 %3986 }
 0x457   :  { %4088 = vperm.xlu1 %4893, %v8648_v50   ;;  %v4251_v17 = vperm.slane %v3987_v8, %v7750_v46 }
 0x458   :  { %v3984_v31 = vpop.permute.xlu2 %3983 }
 0x459   :  { %v3963_v6 = vpop.permute.xlu1 %3962  ;;  %v4250_v10 = vperm.slane %v3984_v31, %v7745_v16 }
 0x45a   :  { %v4239_v19 = vperm.slane %v3963_v6, %v7750_v46 }
 0x45b   :  { %v4252_v58 = vsel %vm4131_vm2, %v4251_v17, %v4250_v10 }
 0x45c   :  { %v4240_v0 = vsel %vm4131_vm2, %v4239_v19, %v4238_v32  ;;  %4121 = vperm.xlu0 %4895, %v8649_v43  }
 0x45d   :  { %v4352_v37 = vsel %vm4322_vm3, %v4243_v2, %v4240_v0  ;;  %4100 = vperm.xlu2 %4894, %v8650_v40   ;;  %v8656_v2 = vld [vmem:[#allocation44_spill] sm:$0xff] }
 0x45e   :  { %v3996_v42 = vpop.permute.xlu0 %3995 }
 0x45f   :  { %4097 = vperm.xlu1 %4893, %v8651_v53   ;;  %v4256_v63 = vperm.slane %v3996_v42, %v7745_v16 }
 0x460   :  { %v3993_v62 = vpop.permute.xlu2 %3992 }
 0x461   :  { %v3972_v21 = vpop.permute.xlu1 %3971  ;;  %v4254_v7 = vperm.slane %v3993_v62, %v7750_v46 }
 0x462   :  { %v4244_v26 = vperm.slane %v3972_v21, %v7745_v16 }
 0x464   :  { %v4246_v22 = vsel %vm4131_vm2, %v4245_v1, %v4244_v26  ;;  %4513 = vrot.lane.b32.xlu0 %v7986_v33, %s4954_s14 }
 0x465   :  { %v4353_v56 = vsel %vm4324_vm4, %v4246_v22, %v4352_v37  ;;  %4109 = vperm.xlu2 %4894, %v8652_v48  }
 0x466   :  { %v4005_v36 = vpop.permute.xlu0 %4004 }
 0x467   :  { %4106 = vperm.xlu1 %4893, %v8653_v51   ;;  %v4260_v18 = vperm.slane %v4005_v36, %v7750_v46 }
 0x468   :  { %v4002_v39 = vpop.permute.xlu2 %4001 }
 0x469   :  { %v3981_v45 = vpop.permute.xlu1 %3980  ;;  %v4259_v60 = vperm.slane %v4002_v39, %v7745_v16 }
 0x46a   :  { %v4248_v54 = vperm.slane %v3981_v45, %v7750_v46 }
 0x46b   :  { %v4261_v49 = vsel %vm4131_vm2, %v4260_v18, %v4259_v60 }
 0x46c   :  { %v4249_v41 = vsel %vm4131_vm2, %v4248_v54, %v4247_v28 }
 0x46d   :  { %v4354_v59 = vsel %vm4326_vm5, %v4249_v41, %v4353_v56  ;;  %4118 = vperm.xlu2 %4894, %v8654_v23  }
 0x46e   :  { %v4014_v4 = vpop.permute.xlu0 %4013 }
 0x46f   :  { %4115 = vperm.xlu1 %4893, %v8655_v44   ;;  %v4265_v43 = vperm.slane %v4014_v4, %v7745_v16 }
 0x470   :  { %v4011_v27 = vpop.permute.xlu2 %4010 }
 0x471   :  { %v3990_v13 = vpop.permute.xlu1 %3989  ;;  %v4263_v32 = vperm.slane %v4011_v27, %v7750_v46 }
 0x472   :  { %v4253_v34 = vperm.slane %v3990_v13, %v7745_v16 }
 0x474   :  { %v4255_v29 = vsel %vm4131_vm2, %v4254_v7, %v4253_v34 }
 0x475   :  { %v4355_v20 = vsel %vm4322_vm3, %v4255_v29, %v4252_v58  ;;  %4521 = vrot.lane.b32.xlu2 %v7983_v57, %s4954_s14 }
 0x476   :  { %v4023_v52 = vpop.permute.xlu0 %4022 }
 0x477   :  { %4124 = vperm.xlu1 %4893, %v8656_v2   ;;  %v4269_v47 = vperm.slane %v4023_v52, %v7750_v46 }
 0x478   :  { %v4020_v12 = vpop.permute.xlu2 %4019 }
 0x479   :  { %v3999_v35 = vpop.permute.xlu1 %3998  ;;  %v4268_v3 = vperm.slane %v4020_v12, %v7745_v16 }
 0x47a   :  { %v4257_v14 = vperm.slane %v3999_v35, %v7750_v46 }
 0x47b   :  { %v4270_v30 = vsel %vm4131_vm2, %v4269_v47, %v4268_v3 }
 0x47c   :  { %v4258_v25 = vsel %vm4131_vm2, %v4257_v14, %v4256_v63 }
 0x47d   :  { %v4356_v15 = vsel %vm4324_vm4, %v4258_v25, %v4355_v20  ;;  %4509 = vrot.lane.b32.xlu2 %v7997_v11, %s4954_s14 }
 0x47e   :  { %v4357_v55 = vsel %vm4326_vm5, %v4261_v49, %v4356_v15  ;;  %v4032_v8 = vpop.permute.xlu0 %4031 }
 0x47f   :  { %v4445_v9 = vrot.slane %v4357_v55, 4  ;;  %4517 = vrot.lane.b32.xlu1 %v7989_v24, %s4954_s14  ;;  %v4274_v41 = vperm.slane %v4032_v8, %v7745_v16 }
 0x480   :  { %v4029_v31 = vpop.permute.xlu2 %4028 }
 0x481   :  { %v4446_v50 = vsel %vm662_vm0, %v4445_v9, %v8011_v61  ;;  %v4008_v6 = vpop.permute.xlu1 %4007  ;;  %v4272_v22 = vperm.slane %v4029_v31, %v7750_v46 }
 0x482   :  { %v4262_v19 = vperm.slane %v4008_v6, %v7745_v16  ;;  %v4450_v51 = vperm.slane %v4446_v50, %v8630_v5 }
 0x484   :  { %v4264_v17 = vsel %vm4131_vm2, %v4263_v32, %v4262_v19  ;;  %v4471_v60 = vrot.slane %v4450_v51, 4 }
 0x486   :  { %v4041_v10 = vpop.permute.xlu0 %4040 }
 0x487   :  { %v4278_v42 = vperm.slane %v4041_v10, %v7750_v46 }
 0x488   :  { %v4038_v58 = vpop.permute.xlu2 %4037 }
 0x489   :  { %v4017_v0 = vpop.permute.xlu1 %4016  ;;  %v4277_v40 = vperm.slane %v4038_v58, %v7745_v16 }
 0x48a   :  { %v4266_v37 = vperm.slane %v4017_v0, %v7750_v46 }
 0x48b   :  { %v4279_v21 = vsel %vm4131_vm2, %v4278_v42, %v4277_v40 }
 0x48c   :  { %v4267_v61 = vsel %vm4131_vm2, %v4266_v37, %v4265_v43 }
 0x48d   :  { %v4358_v53 = vsel %vm4322_vm3, %v4267_v61, %v4264_v17 }
 0x48e   :  { %v4359_v1 = vsel %vm4324_vm4, %v4270_v30, %v4358_v53  ;;  %v4050_v26 = vpop.permute.xlu0 %4049 }
 0x48f   :  { %v4283_v12 = vperm.slane %v4050_v26, %v7745_v16 }
 0x490   :  { %v4047_v36 = vpop.permute.xlu2 %4046 }
 0x491   :  { %v4026_v62 = vpop.permute.xlu1 %4025  ;;  %v4281_v29 = vperm.slane %v4047_v36, %v7750_v46 }
 0x492   :  { %v4271_v56 = vperm.slane %v4026_v62, %v7745_v16 }
 0x494   :  { %v4273_v48 = vsel %vm4131_vm2, %v4272_v22, %v4271_v56 }
 0x495   :  { %v4360_v45 = vsel %vm4326_vm5, %v4273_v48, %v4359_v1 }
 0x496   :  { %v4451_v28 = vrot.slane %v4360_v45, 4  ;;  %v8086_v44 = vpop.permute.xlu0 %4058 }
 0x498   :  { %v4452_v54 = vsel %vm662_vm0, %v4451_v28, %v4354_v59  ;;  %v8084_v4 = vpop.permute.xlu2 %4055 }
 0x499   :  { %v4456_v39 = vperm.slane %v4452_v54, %v8630_v5  ;;  %v4035_v18 = vpop.permute.xlu1 %4034 }
 0x49a   :  { %v4275_v49 = vperm.slane %v4035_v18, %v7750_v46 }
 0x49b   :  { %v4469_v23 = vrot.slane %v4456_v39, 4  ;;  %v8089_v13 = vsel %vm662_vm0, %v4456_v39, %v4471_v60 }
 0x49c   :  { %v4276_v7 = vsel %vm4131_vm2, %v4275_v49, %v4274_v41 }
 0x49d   :  { %v4361_v59 = vsel %vm4322_vm3, %v4279_v21, %v4276_v7  ;;  %v8094_v34 = vsel %vm662_vm0, %v4469_v23, %v4450_v51  ;;  %v4286_v23 = vperm.slane %v8084_v4, %v7745_v16 }
 0x49e   :  { %v4068_v35 = vpop.permute.xlu0 %4067 }
 0x4a0   :  { %v4065_v52 = vpop.permute.xlu2 %4064 }
 0x4a1   :  { %v4044_v27 = vpop.permute.xlu1 %4043 }
 0x4a2   :  { %v4280_v20 = vperm.slane %v4044_v27, %v7745_v16  ;;  %v4290_v27 = vperm.slane %v4065_v52, %v7750_v46 }
 0x4a4   :  { %v4282_v2 = vsel %vm4131_vm2, %v4281_v29, %v4280_v20 }
 0x4a5   :  { %v4362_v63 = vsel %vm4324_vm4, %v4282_v2, %v4361_v59 }
 0x4a6   :  { %v8106_v30 = vpop.permute.xlu0 %4076 }
 0x4a8   :  { %v8102_v3 = vpop.permute.xlu2 %4073 }
 0x4a9   :  { %v4053_v14 = vpop.permute.xlu1 %4052 }
 0x4aa   :  { %v4284_v47 = vperm.slane %v4053_v14, %v7750_v46  ;;  %v4292_v14 = vperm.slane %v4068_v35, %v7745_v16 }
 0x4ac   :  { %v4285_v25 = vsel %vm4131_vm2, %v4284_v47, %v4283_v12 }
 0x4ad   :  { %v4363_v15 = vsel %vm4326_vm5, %v4285_v25, %v4362_v63  ;;  %v4287_v63 = vperm.slane %v8086_v44, %v7750_v46 }
 0x4ae   :  { %v4086_v9 = vpop.permute.xlu0 %4085 }
 0x4af   :  { %v4301_v61 = vperm.slane %v4086_v9, %v7745_v16 }
 0x4b0   :  { %v4083_v8 = vpop.permute.xlu2 %4082 }
 0x4b1   :  { %v4062_v55 = vpop.permute.xlu1 %4061  ;;  %v4299_v21 = vperm.slane %v4083_v8, %v7750_v46  ;;  %v4295_v8 = vperm.slane %v8102_v3, %v7745_v16 }
 0x4b2   :  { %v4289_v41 = vperm.slane %v4062_v55, %v7745_v16  ;;  %v4288_v55 = vsel %vm4131_vm2, %v4287_v63, %v4286_v23 }
 0x4b4   :  { %v4291_v4 = vsel %vm4131_vm2, %v4290_v27, %v4289_v41 }
 0x4b6   :  { %v4095_v19 = vpop.permute.xlu0 %4094 }
 0x4b7   :  { %v4305_v36 = vperm.slane %v4095_v19, %v7750_v46 }
 0x4b8   :  { %v4092_v6 = vpop.permute.xlu2 %4091 }
 0x4b9   :  { %v4071_v50 = vpop.permute.xlu1 %4070  ;;  %v4304_v62 = vperm.slane %v4092_v6, %v7745_v16 }
 0x4ba   :  { %v4293_v7 = vperm.slane %v4071_v50, %v7750_v46 }
 0x4bb   :  { %v4306_v45 = vsel %vm4131_vm2, %v4305_v36, %v4304_v62 }
 0x4bc   :  { %v4294_v9 = vsel %vm4131_vm2, %v4293_v7, %v4292_v14 }
 0x4be   :  { %v4104_v10 = vpop.permute.xlu0 %4103 }
 0x4bf   :  { %v4310_v29 = vperm.slane %v4104_v10, %v7745_v16 }
 0x4c0   :  { %v4101_v31 = vpop.permute.xlu2 %4100 }
 0x4c1   :  { %v4080_v32 = vpop.permute.xlu1 %4079  ;;  %v4308_v56 = vperm.slane %v4101_v31, %v7750_v46  ;;  %v4364_v31 = vsel %vm4322_vm3, %v4291_v4, %v4288_v55 }
 0x4c2   :  { %v4298_v53 = vperm.slane %v4080_v32, %v7745_v16  ;;  %v4365_v10 = vsel %vm4324_vm4, %v4294_v9, %v4364_v31 }
 0x4c4   :  { %v4300_v22 = vsel %vm4131_vm2, %v4299_v21, %v4298_v53 }
 0x4c6   :  { %v4113_v37 = vpop.permute.xlu0 %4112 }
 0x4c7   :  { %v4314_v47 = vperm.slane %v4113_v37, %v7750_v46 }
 0x4c8   :  { %v4110_v0 = vpop.permute.xlu2 %4109 }
 0x4c9   :  { %v4089_v17 = vpop.permute.xlu1 %4088  ;;  %v4313_v20 = vperm.slane %v4110_v0, %v7745_v16 }
 0x4ca   :  { %v4302_v58 = vperm.slane %v4089_v17, %v7750_v46 }
 0x4cb   :  { %v4315_v50 = vsel %vm4131_vm2, %v4314_v47, %v4313_v20 }
 0x4cc   :  { %v4303_v1 = vsel %vm4131_vm2, %v4302_v58, %v4301_v61 }
 0x4cd   :  { %v4367_v48 = vsel %vm4322_vm3, %v4303_v1, %v4300_v22  ;;  %v4480_v1 = vperm.slane %v8089_v13, %v8639_v38 }
 0x4ce   :  { %v4122_v28 = vpop.permute.xlu0 %4121  ;;  %v4368_v39 = vsel %vm4324_vm4, %v4306_v45, %v4367_v48 }
 0x4cf   :  { %v4319_v6 = vperm.slane %v4122_v28, %v7745_v16 }
 0x4d0   :  { %v4119_v42 = vpop.permute.xlu2 %4118 }
 0x4d1   :  { %v4098_v43 = vpop.permute.xlu1 %4097  ;;  %v4317_v12 = vperm.slane %v4119_v42, %v7750_v46 }
 0x4d2   :  { %v4307_v26 = vperm.slane %v4098_v43, %v7745_v16 }
 0x4d4   :  { %v4309_v51 = vsel %vm4131_vm2, %v4308_v56, %v4307_v26  ;;  %v4476_v56 = vperm.slane %v8094_v34, %v8639_v38 }
 0x4d5   :  { %v4369_v60 = vsel %vm4326_vm5, %v4309_v51, %v4368_v39  ;;  %v4499_v39 = vrot.slane %v4480_v1, 4 }
 0x4d6   :  { %v4457_v2 = vrot.slane %v4369_v60, 4  ;;  %v4514_v17 = vpop.permute.xlu0 %4513  ;;  %v4495_v34 = vrot.slane %v4476_v56, 4 }
 0x4d8   :  { %v4522_v18 = vpop.permute.xlu2 %4521  ;;  %v4458_v32 = vsel %vm662_vm0, %v4457_v2, %v4363_v15 }
 0x4d9   :  { %v4107_v40 = vpop.permute.xlu1 %4106  ;;  %v4539_v52 = vmax.f32 %v7983_v57, %v4522_v18  ;;  %v4296_v57 = vperm.slane %v8106_v30, %v7750_v46  ;;  %v4462_v15 = vperm.slane %v4458_v32, %v8630_v5 }
 0x4da   :  { %v4311_v49 = vperm.slane %v4107_v40, %v7750_v46 }
 0x4db   :  { %v4553_v0 = vrot.slane %v4539_v52, 4  ;;  %v4297_v42 = vsel %vm4131_vm2, %v4296_v57, %v4295_v8  ;;  %v4483_v22 = vrot.slane %v4462_v15, 4 }
 0x4dc   :  { %v4312_v25 = vsel %vm4131_vm2, %v4311_v49, %v4310_v29  ;;  %v4366_v40 = vsel %vm4326_vm5, %v4297_v42, %v4365_v10 }
 0x4dd   :  { %v4370_v3 = vsel %vm4322_vm3, %v4315_v50, %v4312_v25  ;;  %vm4739_vm3 = vcmask 916480  }
 0x4e0   :  { %v4510_v37 = vpop.permute.xlu2 %4509 }
 0x4e1   :  { %v4116_v54 = vpop.permute.xlu1 %4115  ;;  %v4533_v61 = vmax.f32 %v7997_v11, %v4510_v37 }
 0x4e2   :  { %v4316_v59 = vperm.slane %v4116_v54, %v7745_v16 }
 0x4e3   :  { %v4543_v11 = vrot.slane %v4533_v61, 4 }
 0x4e4   :  { %v4318_v44 = vsel %vm4131_vm2, %v4317_v12, %v4316_v59 }
 0x4e5   :  { %v4371_v43 = vsel %vm4324_vm4, %v4318_v44, %v4370_v3  ;;  %vm4741_vm4 = vcmask 982016  }
 0x4e9   :  { %v4125_v35 = vpop.permute.xlu1 %4124 }
 0x4ea   :  { %v4320_v19 = vperm.slane %v4125_v35, %v7750_v46  ;;  %v4535_v46 = vmax.f32 %v7986_v33, %v4514_v17 }
 0x4ec   :  { %v4321_v16 = vsel %vm4131_vm2, %v4320_v19, %v4319_v6  ;;  %v4554_v53 = vsel %vm662_vm0, %v4553_v0, %v4535_v46  ;;  %v4555_v33 = vrot.slane %v4535_v46, 4  ;;  %vm4737_vm2 = vcmask 850944  }
 0x4ed   :  { %v4372_v58 = vsel %vm4326_vm5, %v4321_v16, %v4371_v43  ;;  %v4560_v48 = vperm.slane %v4554_v53, %v8630_v5 }
 0x4ee   :  { %v4463_v30 = vrot.slane %v4372_v58, 4  ;;  %v4556_v28 = vsel %vm662_vm0, %v4539_v52, %v4555_v33 }
 0x4ef   :  { %v4564_v7 = vperm.slane %v4556_v28, %v8630_v5  ;;  %v4565_v59 = vrot.slane %v4560_v48, 4 }
 0x4f0   :  { %v4464_v21 = vsel %vm662_vm0, %v4463_v30, %v4366_v40 }
 0x4f1   :  { %v4468_v26 = vperm.slane %v4464_v21, %v8630_v5  ;;  %v4518_v62 = vpop.permute.xlu1 %4517  ;;  %v4577_v25 = vrot.slane %v4564_v7, 4 }
 0x4f2   :  { %v4537_v36 = vmax.f32 %v7989_v24, %v4518_v62 }
 0x4f3   :  { %v4484_v51 = vsel %vm662_vm0, %v4468_v26, %v4483_v22  ;;  %v4481_v45 = vrot.slane %v4468_v26, 4 }
 0x4f4   :  { %v4541_v54 = vrot.slane %v4537_v36, 4  ;;  %v4492_v13 = vperm.slane %v4484_v51, %v8639_v38  ;;  %v4544_v18 = vsel %vm662_vm0, %v4537_v36, %v4543_v11 }
 0x4f5   :  { %v4482_v60 = vsel %vm662_vm0, %v4481_v45, %v4462_v15  ;;  %v4552_v63 = vperm.slane %v4544_v18, %v8630_v5 }
 0x4f6   :  { %v4542_v41 = vsel %vm662_vm0, %v4541_v54, %v4533_v61  ;;  %v4500_v24 = vsel %vm662_vm0, %v4492_v13, %v4499_v39  ;;  %v4497_v49 = vrot.slane %v4492_v13, 4  ;;  %v4488_v23 = vperm.slane %v4482_v60, %v8639_v38 }
 0x4f7   :  { %v4548_v27 = vperm.slane %v4542_v41, %v8630_v5  ;;  %4523 = vrot.lane.b32.xlu0 %v4500_v24, %s4954_s14  ;;  %v4578_v8 = vsel %vm662_vm0, %v4577_v25, %v4552_v63  ;;  %v4579_v50 = vrot.slane %v4552_v63, 4 }
 0x4f8   :  { %v4498_v29 = vsel %vm662_vm0, %v4497_v49, %v4480_v1  ;;  %v4496_v20 = vsel %vm662_vm0, %v4488_v23, %v4495_v34  ;;  %v4493_v2 = vrot.slane %v4488_v23, 4  ;;  %v4584_v35 = vperm.slane %v4578_v8, %v8639_v38 }
 0x4f9   :  { %v4567_v14 = vrot.slane %v4548_v27, 4  ;;  %4519 = vrot.lane.b32.xlu2 %v4498_v29, %s4954_s14  ;;  %4515 = vrot.lane.b32.xlu1 %v4496_v20, %s4954_s14  ;;  %v4566_v12 = vsel %vm662_vm0, %v4565_v59, %v4548_v27  ;;  %v4580_v19 = vsel %vm662_vm0, %v4564_v7, %v4579_v50 }
 0x4fa   :  { %v4494_v4 = vsel %vm662_vm0, %v4493_v2, %v4476_v56  ;;  %v8190_v47 = vperm.slane %v4566_v12, %v8639_v38  ;;  %v4593_v32 = vrot.slane %v4584_v35, 4  ;;  %v4588_v17 = vperm.slane %v4580_v19, %v8639_v38 }
 0x4fb   :  { %v4568_v52 = vsel %vm662_vm0, %v4560_v48, %v4567_v14 }
 0x4fc   :  { %v4589_v55 = vrot.slane %v8190_v47, 4  ;;  %v4576_v9 = vperm.slane %v4568_v52, %v8639_v38  ;;  %v4594_v31 = vsel %vm662_vm0, 0.0, %v4593_v32  ;;  %v4595_v3 = vrot.slane %v4588_v17, 4 }
 0x4fe   :  { %v4590_v44 = vsel %vm662_vm0, 0.0, %v4589_v55  ;;  %v4591_v6 = vrot.slane %v4576_v9, 4  ;;  %v4596_v10 = vsel %vm662_vm0, 0.0, %v4595_v3 }
 0x4ff   :  { %4511 = vrot.lane.b32.xlu0 %v4494_v4, %s4954_s14 }
 0x500   :  { %v4592_v57 = vsel %vm662_vm0, 0.0, %v4591_v6 }
 0x501   :  { %4658 = vrot.lane.b32.xlu2 %v4576_v9, %s8413_s24  ;;  %4654 = vrot.lane.b32.xlu1 %v4590_v44, %s8418_s26 }
 0x507   :  { %4662 = vrot.lane.b32.xlu0 %v4592_v57, %s8410_s21 }
 0x509   :  { %4670 = vrot.lane.b32.xlu2 %v4594_v31, %s8388_s3  ;;  %4666 = vrot.lane.b32.xlu1 %v4584_v35, %s8395_s9 }
 0x50f   :  { %4674 = vrot.lane.b32.xlu0 %v4588_v17, %s4991_s8 }
 0x511   :  { %4678 = vrot.lane.b32.xlu1 %v4596_v10, %s8371_s22 }
 0x553   :  { %v4520_v37 = vpop.permute.xlu2 %4519 }
 0x554   :  { %v4538_v42 = vmax.f32 %v4498_v29, %v4520_v37 }
 0x556   :  { %v4597_v21 = vrot.slane %v4538_v42, 4 }
 0x55b   :  { %v4659_v2 = vpop.permute.xlu2 %4658 }
 0x563   :  { %v4671_v12 = vpop.permute.xlu2 %4670 }
 0x569   :  { %v4524_v0 = vpop.permute.xlu0 %4523 }
 0x56a   :  { %v4540_v43 = vmax.f32 %v4500_v24, %v4524_v0 }
 0x56b   :  { %v4516_v16 = vpop.permute.xlu1 %4515 }
 0x56c   :  { %v4609_v15 = vrot.slane %v4540_v43, 4  ;;  %v4536_v58 = vmax.f32 %v4496_v20, %v4516_v16 }
 0x56e   :  { %v4610_v46 = vsel %vm662_vm0, %v4609_v15, %v4536_v58  ;;  %v4611_v30 = vrot.slane %v4536_v58, 4 }
 0x56f   :  { %v4616_v61 = vperm.slane %v4610_v46, %v8630_v5 }
 0x570   :  { %v4612_v40 = vsel %vm662_vm0, %v4540_v43, %v4611_v30 }
 0x571   :  { %v4512_v53 = vpop.permute.xlu0 %4511  ;;  %v4620_v26 = vperm.slane %v4612_v40, %v8630_v5  ;;  %v4621_v56 = vrot.slane %v4616_v61, 4 }
 0x572   :  { %v4534_v1 = vmax.f32 %v4494_v4, %v4512_v53 }
 0x573   :  { %v4633_v48 = vrot.slane %v4620_v26, 4  ;;  %v4655_v20 = vpop.permute.xlu1 %4654 }
 0x574   :  { %v4598_v62 = vsel %vm662_vm0, %v4597_v21, %v4534_v1  ;;  %v4599_v22 = vrot.slane %v4534_v1, 4  ;;  %v4714_v4 = vsel %vm4713_vm6, %v8190_v47, %v4655_v20 }
 0x575   :  { %v4604_v33 = vperm.slane %v4598_v62, %v8630_v5 }
 0x576   :  { %v4600_v36 = vsel %vm662_vm0, %v4538_v42, %v4599_v22 }
 0x577   :  { %v4608_v11 = vperm.slane %v4600_v36, %v8630_v5  ;;  %v4623_v51 = vrot.slane %v4604_v33, 4  ;;  %v4622_v45 = vsel %vm662_vm0, %v4621_v56, %v4604_v33 }
 0x578   :  { %v4628_v28 = vperm.slane %v4622_v45, %v8639_v38 }
 0x579   :  { %v4624_v54 = vsel %vm662_vm0, %v4616_v61, %v4623_v51  ;;  %v4634_v13 = vsel %vm662_vm0, %v4633_v48, %v4608_v11  ;;  %v4635_v34 = vrot.slane %v4608_v11, 4  ;;  %v4663_v63 = vpop.permute.xlu0 %4662 }
 0x57a   :  { %4682 = vrot.lane.b32.xlu2 %v4628_v28, %s8365_s20  ;;  %v4632_v39 = vperm.slane %v4624_v54, %v8639_v38  ;;  %v4645_v18 = vrot.slane %v4628_v28, 4  ;;  %v4640_v60 = vperm.slane %v4634_v13, %v8639_v38 }
 0x57b   :  { %v4636_v23 = vsel %vm662_vm0, %v4620_v26, %v4635_v34  ;;  %v4667_v14 = vpop.permute.xlu1 %4666 }
 0x57c   :  { %4690 = vrot.lane.b32.xlu1 %v4632_v39, %s4971_s2  ;;  %v4646_v5 = vsel %vm662_vm0, 0.0, %v4645_v18  ;;  %v4647_v41 = vrot.slane %v4632_v39, 4  ;;  %v4649_v24 = vrot.slane %v4640_v60, 4  ;;  %v4644_v59 = vperm.slane %v4636_v23, %v8639_v38 }
 0x57d   :  { %4686 = vrot.lane.b32.xlu0 %v4646_v5, %s8361_s16  ;;  %v4716_v38 = vsel %vm4715_vm7, %v4714_v4, %v4659_v2 }
 0x57e   :  { %v4648_v49 = vsel %vm662_vm0, 0.0, %v4647_v41  ;;  %v4650_v7 = vsel %vm662_vm0, 0.0, %v4649_v24  ;;  %v4651_v27 = vrot.slane %v4644_v59, 4  ;;  %v4718_v25 = vsel %vm4717_vm8, %v4716_v38, %v4663_v63 }
 0x57f   :  { %v4720_v55 = vsel %vm4719_vm9, %v4718_v25, %v4667_v14 }
 0x580   :  { %v4652_v29 = vsel %vm662_vm0, 0.0, %v4651_v27  ;;  %v4722_v44 = vsel %vm4721_vm10, %v4720_v55, %v4671_v12  ;;  %vm4733_vm0 = vcmask 719872  }
 0x581   :  { %v4675_v52 = vpop.permute.xlu0 %4674 }
 0x582   :  { %4694 = vrot.lane.b32.xlu2 %v4648_v49, %s4969_s29  ;;  %v4724_v35 = vsel %vm4723_vm11, %v4722_v44, %v4675_v52  ;;  %s4751_s29 = sshll.u32 %s8244_s1, 4  ;;  %s4752_s29 = int_to_ptr.hbm [resolvable:$true] %s4751_s29 }
 0x583   :  { %v4679_v8 = vpop.permute.xlu1 %4678 }
 0x584   :  { %4702 = vrot.lane.b32.xlu1 %v4650_v7, %s4959_s19  ;;  %v4726_v6 = vsel %vm4725_vm12, %v4724_v35, %v4679_v8 }
 0x585   :  { %4698 = vrot.lane.b32.xlu0 %v4640_v60, %s4967_s27 }
 0x58a   :  { %4706 = vrot.lane.b32.xlu2 %v4644_v59, %s4957_s17 }
 0x58d   :  { %4710 = vrot.lane.b32.xlu0 %v4652_v29, %s4954_s14  ;;  %s5016_s14 = smov [#allocation5]  }
 0x58e   :  { %s4749_s17 = sshll.u32 %s5016_s14, 4  ;;  %s4750_s17 = int_to_ptr.vmem [resolvable:$true] %s4749_s17 }
 0x5d4   :  { %v4683_v9 = vpop.permute.xlu2 %4682 }
 0x5d5   :  { %v4728_v32 = vsel %vm4727_vm13, %v4726_v6, %v4683_v9 }
 0x5dc   :  { %v4695_v57 = vpop.permute.xlu2 %4694 }
 0x5e4   :  { %v4707_v37 = vpop.permute.xlu2 %4706 }
 0x5ee   :  { %v4691_v47 = vpop.permute.xlu1 %4690 }
 0x5ef   :  { %v4687_v50 = vpop.permute.xlu0 %4686 }
 0x5f0   :  { %v4730_v19 = vsel %vm4729_vm14, %v4728_v32, %v4687_v50 }
 0x5f1   :  { %v4732_v31 = vsel %vm4731_vm15, %v4730_v19, %v4691_v47 }
 0x5f2   :  { %v4734_v3 = vsel %vm4733_vm0, %v4732_v31, %v4695_v57 }
 0x5f6   :  { %v4703_v0 = vpop.permute.xlu1 %4702 }
 0x5f7   :  { %v4699_v17 = vpop.permute.xlu0 %4698 }
 0x5f8   :  { %v4736_v10 = vsel %vm4735_vm1, %v4734_v3, %v4699_v17 }
 0x5f9   :  { %v4738_v43 = vsel %vm4737_vm2, %v4736_v10, %v4703_v0 }
 0x5fa   :  { %v4740_v16 = vsel %vm4739_vm3, %v4738_v43, %v4707_v37 }
 0x5ff   :  { %v4711_v15 = vpop.permute.xlu0 %4710 }
 0x600   :  { %v4742_v58 = vsel %vm4741_vm4, %v4740_v16, %v4711_v15 }
 0x601   :  { %4743 = vst [vmem:[#allocation5] sm:$0xf] %v4742_v58 }
 0x602   :  { %4754 = dma.vmem_to_hbm [thread:$0]  %s4750_s17, 64, %s4752_s29, [#allocation4]  }
 0x603   :  { %4947 = dma.done.wait [#allocation4], 64  }
 0x604   :  { %4948 = vsyncadd [#allocation4], 4294967232 }
 0x605   :  { %4759 = vsyncpa [#allocation3], 1 }
 0x606   :  { %4760 = vsyncpa [#allocation4], 1 }

</bundles_post_ra>
